<compile_context>
chip_gen: v6e
topology: v6e:2x2x1
jax: 0.10.0
libtpu: 0.0.40
codegen_flags: <defaults>
</compile_context>

<pallas_src>
import math

import jax
import jax.numpy as jnp
import numpy as np
from jax.experimental import pallas as pl
from jax.experimental.pallas import tpu as pltpu

# ----------------------------- static geometry ------------------------------
KSIZE = 3                     # 3x3 convs, stride 1, padding 1
IMG = 28                      # classifier hard-codes hidden*7*7 => 28x28 input
WGRID = IMG + 2               # 30: padded grid edge
SIMG = WGRID * WGRID          # 900: flattened padded grid per image
N_CORE = 1024                 # per-image core lane width (SIMG padded to 128)
MARG = 128                    # left margin lanes  (must be >= 2*WGRID + 2)
RMARG = 128                   # right margin lanes (must be >= 2*WGRID + 2)
BUF_LEN = MARG + N_CORE + RMARG   # 1280 lanes per activation buffer row
POOL_OUT = 7                  # 7x7 pooled map feeding the classifier
SEL_W = 32                    # contiguous window width for pooled-row gather
FEAT_W = 64                   # lane-padded compact feature width (7*8 -> 64)

assert MARG >= 2 * WGRID + 2 and RMARG >= 2 * WGRID + 2
assert MARG % 128 == 0 and N_CORE % 128 == 0 and BUF_LEN % 128 == 0
assert N_CORE >= SIMG


# ---------------------------------------------------------------------------
# Fused kernel builder (closure over static channel counts)
# ---------------------------------------------------------------------------
def _build_kernel(*, cin, hidden, n_cls):
    k9 = KSIZE * KSIZE

    def kernel(x_ref, w1_ref, b1_ref, w2_ref, b2_ref, w3_ref, b3_ref,
               w4_ref, b4_ref, wl_ref, bl_ref, sel_ref, m1_ref, m2_ref,
               out_ref, s1, s2, s3, s4, s5, s6, slab, feat):
        # --- zero ONLY the margins (core regions are fully overwritten). ---
        zl = jnp.zeros((hidden, MARG), jnp.float32)
        zr = jnp.zeros((hidden, RMARG), jnp.float32)
        for s in (s1, s2, s3, s4, s5, s6):
            s[:, pl.ds(0, MARG)] = zl
            s[:, pl.ds(MARG + N_CORE, RMARG)] = zr
        feat[...] = jnp.zeros((hidden, FEAT_W), jnp.float32)

        m1 = m1_ref[...]   # (1, N_CORE): valid 28x28 interior pixels
        m2 = m2_ref[...]   # (1, N_CORE): pooled 14x14 sites (odd rows/cols)

        def conv_layer(in_ref, w_ref, b_ref, mask, out_sref, *, step, c_in):
            # im2col: stack the 9 lane-shifted tap windows on sublanes, then
            # one (hidden, 9*c_in) x (9*c_in, N_CORE) MXU GEMM.
            for kh in range(KSIZE):
                for kw in range(KSIZE):
                    t = kh * KSIZE + kw
                    start = MARG + (kh - 1) * step * WGRID + (kw - 1) * step
                    slab[pl.ds(t * c_in, c_in), :] = in_ref[:, pl.ds(start, N_CORE)]
            acc = jnp.dot(w_ref[...], slab[pl.ds(0, k9 * c_in), :],
                          preferred_element_type=jnp.float32)
            y = jnp.maximum(acc + b_ref[...], 0.0)
            # where-mask restores the zero padding ring / pooled-site lattice
            # with exact zeros (robust even against garbage margin reads).
            out_sref[:, pl.ds(MARG, N_CORE)] = jnp.where(mask > 0.5, y, 0.0)

        def pool_layer(in_sref, out_sref, *, step, mask):
            a = in_sref[:, pl.ds(MARG, N_CORE)]
            b = in_sref[:, pl.ds(MARG + step, N_CORE)]
            c = in_sref[:, pl.ds(MARG + step * WGRID, N_CORE)]
            d = in_sref[:, pl.ds(MARG + step * WGRID + step, N_CORE)]
            y = jnp.maximum(jnp.maximum(a, b), jnp.maximum(c, d))
            if mask is not None:
                y = jnp.where(mask > 0.5, y, 0.0)
            out_sref[:, pl.ds(MARG, N_CORE)] = y

        # ---- conv block 1 (28x28 grid, stride-1 taps) ----
        conv_layer(x_ref, w1_ref, b1_ref, m1, s1, step=1, c_in=cin)
        conv_layer(s1, w2_ref, b2_ref, m1, s2, step=1, c_in=hidden)
        pool_layer(s2, s3, step=1, mask=m2)         # -> 14x14, kept in place

        # ---- conv block 2 (14x14 in place => tap stride 2) ----
        conv_layer(s3, w3_ref, b3_ref, m2, s4, step=2, c_in=hidden)
        conv_layer(s4, w4_ref, b4_ref, m2, s5, step=2, c_in=hidden)
        pool_layer(s5, s6, step=2, mask=None)       # -> 7x7 at stride-4 sites

        # ---- classifier: Linear(hidden*7*7 -> n_cls) on compact features ----
        # Gather each pooled row (sites at lane stride 4) via a one-hot
        # decimation matmul into a lane-dense (hidden, 64) buffer, then
        # contract K=64 per channel against the pre-transposed weight.
        sel = sel_ref[...]                                   # (SEL_W, 8) one-hot
        for i in range(POOL_OUT):
            start = MARG + (1 + 4 * i) * WGRID + 1
            win = s6[:, pl.ds(start, SEL_W)]                 # (hidden, 32)
            feat[:, pl.ds(i * 8, 8)] = jnp.dot(
                win, sel, preferred_element_type=jnp.float32)
        acc = bl_ref[...]                                    # (1, n_cls)
        for c in range(hidden):
            acc = acc + jnp.dot(feat[pl.ds(c, 1), :], wl_ref[c],
                                preferred_element_type=jnp.float32)
        out_ref[...] = acc

    return kernel


# ---------------------------------------------------------------------------
# One-time parameter / constant preparation (OUTSIDE the jitted forward)
# ---------------------------------------------------------------------------
def prepare_params(params):
    f32 = jnp.float32
    hidden = params["w1"].shape[0]
    n_cls = params["wl"].shape[0]

    def conv_w(w):   # (co, ci, 3, 3) -> (co, 9*ci), column = (kh*3+kw)*ci + c
        co, ci = w.shape[0], w.shape[1]
        return jnp.transpose(w, (0, 2, 3, 1)).reshape(co, 9 * ci).astype(f32)

    def conv_b(b):   # (co,) -> (co, 1)
        return b.reshape(-1, 1).astype(f32)

    # Classifier (n_cls, hidden*49) with NCHW flatten order (c, ph, pw) ->
    # per-channel (K=64, n_cls) with K lane index = ph*8 + pw (zero padded).
    wl = params["wl"].astype(f32).reshape(n_cls, hidden, POOL_OUT, POOL_OUT)
    wl = jnp.transpose(wl, (1, 2, 3, 0))                      # (h, 7, 7, n_cls)
    wl = jnp.pad(wl, ((0, 0), (0, 0), (0, 1), (0, 0)))        # (h, 7, 8, n_cls)
    wl = wl.reshape(hidden, POOL_OUT * 8, n_cls)              # (h, 56, n_cls)
    wl = jnp.pad(wl, ((0, 0), (0, FEAT_W - POOL_OUT * 8), (0, 0)))

    # One-hot decimation matrix: window lane 4*j -> compact column j.
    sel = np.zeros((SEL_W, 8), np.float32)
    for j in range(POOL_OUT):
        sel[4 * j, j] = 1.0

    # Masks over the padded-flat grid (lanes >= SIMG are zero).
    r = np.arange(WGRID)
    interior = (r >= 1) & (r <= IMG)
    site = ((r % 2) == 1) & (r <= IMG - 1)
    m1 = np.zeros((1, N_CORE), np.float32)
    m2 = np.zeros((1, N_CORE), np.float32)
    m1[0, :SIMG] = (interior[:, None] & interior[None, :]).reshape(-1)
    m2[0, :SIMG] = (site[:, None] & site[None, :]).reshape(-1)

    return dict(w1=conv_w(params["w1"]), b1=conv_b(params["b1"]),
                w2=conv_w(params["w2"]), b2=conv_b(params["b2"]),
                w3=conv_w(params["w3"]), b3=conv_b(params["b3"]),
                w4=conv_w(params["w4"]), b4=conv_b(params["b4"]),
                wl=wl, bl=params["bl"].astype(f32).reshape(1, n_cls),
                sel=jnp.asarray(sel), m1=jnp.asarray(m1), m2=jnp.asarray(m2))


# ---------------------------------------------------------------------------
# Forward wrapper: per-call input layout + one pallas_call over a batch grid
# ---------------------------------------------------------------------------
def fashion_mnist_model2_forward(x_nchw, prep):
    """Replicates FashionMNISTModel2.forward with one fused Pallas kernel."""
    f32 = jnp.float32
    x = x_nchw.astype(f32)
    batch, cin, h, w = x.shape
    assert h == IMG and w == IMG, "classifier assumes 28x28 inputs (hidden*7*7)"

    hidden = prep["w1"].shape[0]
    n_cls = prep["bl"].shape[1]
    assert prep["w1"].shape[1] == 9 * cin

    # NCHW -> per-image channel-major padded-flat layout (B, cin, BUF_LEN):
    # [128 zero margin | 900 grid + 124 zero lanes | 128 zero margin]
    xp = jnp.pad(x, ((0, 0), (0, 0), (1, 1), (1, 1)))         # (B, cin, 30, 30)
    xf = xp.reshape(batch, cin, SIMG)
    x_buf = jnp.pad(xf, ((0, 0), (0, 0), (MARG, BUF_LEN - MARG - SIMG)))

    kernel = _build_kernel(cin=cin, hidden=hidden, n_cls=n_cls)

    def full_spec(a):
        return pl.BlockSpec(a.shape, lambda b: (0,) * a.ndim)

    out = pl.pallas_call(
        kernel,
        out_shape=jax.ShapeDtypeStruct((batch, 1, n_cls), f32),
        grid=(batch,),
        in_specs=[
            pl.BlockSpec((None, cin, BUF_LEN), lambda b: (b, 0, 0)),   # x
            full_spec(prep["w1"]), full_spec(prep["b1"]),
            full_spec(prep["w2"]), full_spec(prep["b2"]),
            full_spec(prep["w3"]), full_spec(prep["b3"]),
            full_spec(prep["w4"]), full_spec(prep["b4"]),
            full_spec(prep["wl"]), full_spec(prep["bl"]),
            full_spec(prep["sel"]), full_spec(prep["m1"]), full_spec(prep["m2"]),
        ],
        out_specs=pl.BlockSpec((None, 1, n_cls), lambda b: (b, 0, 0)),
        scratch_shapes=[pltpu.VMEM((hidden, BUF_LEN), f32) for _ in range(6)]
                      + [pltpu.VMEM((9 * hidden, N_CORE), f32),   # im2col slab
                         pltpu.VMEM((hidden, FEAT_W), f32)],      # compact feats
        compiler_params=pltpu.CompilerParams(
            dimension_semantics=("parallel",)),
    )(x_buf,
      prep["w1"], prep["b1"], prep["w2"], prep["b2"],
      prep["w3"], prep["b3"], prep["w4"], prep["b4"],
      prep["wl"], prep["bl"], prep["sel"], prep["m1"], prep["m2"])

    return out.reshape(batch, n_cls)


# ---------------------------------------------------------------------------
# Deterministic PyTorch-layout parameter init (synthetic, mirrors shapes/init)
# ---------------------------------------------------------------------------
def init_params(key, in_channels, hidden_units, num_classes):
    ks = jax.random.split(key, 10)

    def conv_wb(kw, kb, cin, cout):
        bound = 1.0 / math.sqrt(cin * 9)
        w = jax.random.uniform(kw, (cout, cin, 3, 3), jnp.float32, -bound, bound)
        b = jax.random.uniform(kb, (cout,), jnp.float32, -bound, bound)
        return w, b

    w1, b1 = conv_wb(ks[0], ks[1], in_channels, hidden_units)
    w2, b2 = conv_wb(ks[2], ks[3], hidden_units, hidden_units)
    w3, b3 = conv_wb(ks[4], ks[5], hidden_units, hidden_units)
    w4, b4 = conv_wb(ks[6], ks[7], hidden_units, hidden_units)

    fan_in = hidden_units * 7 * 7
    lb = 1.0 / math.sqrt(fan_in)
    wl = jax.random.uniform(ks[8], (num_classes, fan_in), jnp.float32, -lb, lb)
    bl = jax.random.uniform(ks[9], (num_classes,), jnp.float32, -lb, lb)
    return dict(w1=w1, b1=b1, w2=w2, b2=b2, w3=w3, b3=b3, w4=w4, b4=b4,
                wl=wl, bl=bl)


# ---------------------------------------------------------------------------
# Pure-JAX reference (PyTorch semantics) used as a numerical cross-check
# ---------------------------------------------------------------------------
def _reference_forward(x, params):
    dn = ("NCHW", "OIHW", "NCHW")

    def conv(x, w, b):
        y = jax.lax.conv_general_dilated(x, w, (1, 1), ((1, 1), (1, 1)),
                                         dimension_numbers=dn)
        return jax.nn.relu(y + b[None, :, None, None])

    def pool(x):
        return jax.lax.reduce_window(x, -jnp.inf, jax.lax.max,
                                     (1, 1, 2, 2), (1, 1, 2, 2), "VALID")

    x = pool(conv(conv(x, params["w1"], params["b1"]),
                  params["w2"], params["b2"]))
    x = pool(conv(conv(x, params["w3"], params["b3"]),
                  params["w4"], params["b4"]))
    feat = x.reshape(x.shape[0], -1)                 # NCHW flatten
    return feat @ params["wl"].T + params["bl"][None, :]


# ---------------------------------------------------------------------------
if __name__ == "__main__":
    key = jax.random.PRNGKey(0)
    k_x, k_p = jax.random.split(key)

    # FashionMNIST geometry: 28x28 spatial required by the hidden*7*7 classifier.
    B, Cin, H, W = 2, 1, 28, 28
    hidden_units, num_classes = 8, 10

    x = jax.random.normal(k_x, (B, Cin, H, W), dtype=jnp.float32)
    params = init_params(k_p, Cin, hidden_units, num_classes)

    # One-time weight/mask re-layout, hoisted out of the jitted forward.
    prep = jax.tree_util.tree_map(jax.block_until_ready, prepare_params(params))

    fwd = jax.jit(fashion_mnist_model2_forward)
    out = jax.block_until_ready(fwd(x, prep))
    assert out.shape == (B, num_classes), out.shape
    assert out.dtype == jnp.float32

    ref = jax.block_until_ready(jax.jit(_reference_forward)(x, params))
    # Tolerance accommodates the platform-default f32 MXU path used by both
    # the Pallas matmuls and the lax.conv reference.
    np.testing.assert_allclose(np.asarray(out), np.asarray(ref),
                               rtol=1e-2, atol=1e-2)

    print("KERNEL_OK")
</pallas_src>

<mosaic_0001>
module attributes {stable_mosaic.version = 11 : i64} {
  func.func @kernel(%arg0: i32, %arg1: memref<1x1x1280xf32, #tpu.memory_space<vmem>>, %arg2: memref<8x9xf32, #tpu.memory_space<vmem>>, %arg3: memref<8x1xf32, #tpu.memory_space<vmem>>, %arg4: memref<8x72xf32, #tpu.memory_space<vmem>>, %arg5: memref<8x1xf32, #tpu.memory_space<vmem>>, %arg6: memref<8x72xf32, #tpu.memory_space<vmem>>, %arg7: memref<8x1xf32, #tpu.memory_space<vmem>>, %arg8: memref<8x72xf32, #tpu.memory_space<vmem>>, %arg9: memref<8x1xf32, #tpu.memory_space<vmem>>, %arg10: memref<8x64x10xf32, #tpu.memory_space<vmem>>, %arg11: memref<1x10xf32, #tpu.memory_space<vmem>>, %arg12: memref<32x8xf32, #tpu.memory_space<vmem>>, %arg13: memref<1x1024xf32, #tpu.memory_space<vmem>>, %arg14: memref<1x1024xf32, #tpu.memory_space<vmem>>, %arg15: memref<1x1x10xf32, #tpu.memory_space<vmem>>, %arg16: memref<8x1280xf32, #tpu.memory_space<vmem>>, %arg17: memref<8x1280xf32, #tpu.memory_space<vmem>>, %arg18: memref<8x1280xf32, #tpu.memory_space<vmem>>, %arg19: memref<8x1280xf32, #tpu.memory_space<vmem>>, %arg20: memref<8x1280xf32, #tpu.memory_space<vmem>>, %arg21: memref<8x1280xf32, #tpu.memory_space<vmem>>, %arg22: memref<72x1024xf32, #tpu.memory_space<vmem>>, %arg23: memref<8x64xf32, #tpu.memory_space<vmem>>) attributes {dimension_semantics = [#tpu.dimension_semantics<parallel>], iteration_bounds = array<i64: 2>, scalar_prefetch = 0 : i64, scratch_operands = 8 : i64, tpu.core_type = #tpu.core_type<tc>, window_params = [{transform_indices = @transform_0, window_bounds = array<i64: 1, 1, 1280>}, {pipeline_mode = #tpu.pipeline_mode<synchronous>, transform_indices = @transform_1, window_bounds = array<i64: 8, 9>}, {pipeline_mode = #tpu.pipeline_mode<synchronous>, transform_indices = @transform_2, window_bounds = array<i64: 8, 1>}, {pipeline_mode = #tpu.pipeline_mode<synchronous>, transform_indices = @transform_3, window_bounds = array<i64: 8, 72>}, {pipeline_mode = #tpu.pipeline_mode<synchronous>, transform_indices = @transform_4, window_bounds = array<i64: 8, 1>}, {pipeline_mode = #tpu.pipeline_mode<synchronous>, transform_indices = @transform_5, window_bounds = array<i64: 8, 72>}, {pipeline_mode = #tpu.pipeline_mode<synchronous>, transform_indices = @transform_6, window_bounds = array<i64: 8, 1>}, {pipeline_mode = #tpu.pipeline_mode<synchronous>, transform_indices = @transform_7, window_bounds = array<i64: 8, 72>}, {pipeline_mode = #tpu.pipeline_mode<synchronous>, transform_indices = @transform_8, window_bounds = array<i64: 8, 1>}, {pipeline_mode = #tpu.pipeline_mode<synchronous>, transform_indices = @transform_9, window_bounds = array<i64: 8, 64, 10>}, {pipeline_mode = #tpu.pipeline_mode<synchronous>, transform_indices = @transform_10, window_bounds = array<i64: 1, 10>}, {pipeline_mode = #tpu.pipeline_mode<synchronous>, transform_indices = @transform_11, window_bounds = array<i64: 32, 8>}, {pipeline_mode = #tpu.pipeline_mode<synchronous>, transform_indices = @transform_12, window_bounds = array<i64: 1, 1024>}, {pipeline_mode = #tpu.pipeline_mode<synchronous>, transform_indices = @transform_13, window_bounds = array<i64: 1, 1024>}, {transform_indices = @transform_14, window_bounds = array<i64: 1, 1, 10>}]} {
    %cst = arith.constant 0.000000e+00 : f32
    %0 = vector.broadcast %cst : f32 to vector<8x128xf32>
    %cst_0 = arith.constant 0.000000e+00 : f32
    %1 = vector.broadcast %cst_0 : f32 to vector<8x128xf32>
    %c0 = arith.constant 0 : index
    %c0_1 = arith.constant 0 : index
    %2 = vector.load %arg16[%c0, %c0_1] : memref<8x1280xf32, #tpu.memory_space<vmem>>, vector<8x128xf32>
    tpu.vector_store %arg16[%c0, %c0_1], %0 {strides = array<i32>} : memref<8x1280xf32, #tpu.memory_space<vmem>>, vector<8x128xf32>,
    %c0_2 = arith.constant 0 : index
    %c1152 = arith.constant 1152 : index
    %3 = vector.load %arg16[%c0_2, %c1152] : memref<8x1280xf32, #tpu.memory_space<vmem>>, vector<8x128xf32>
    tpu.vector_store %arg16[%c0_2, %c1152], %1 {strides = array<i32>} : memref<8x1280xf32, #tpu.memory_space<vmem>>, vector<8x128xf32>,
    %c0_3 = arith.constant 0 : index
    %c0_4 = arith.constant 0 : index
    %4 = vector.load %arg17[%c0_3, %c0_4] : memref<8x1280xf32, #tpu.memory_space<vmem>>, vector<8x128xf32>
    tpu.vector_store %arg17[%c0_3, %c0_4], %0 {strides = array<i32>} : memref<8x1280xf32, #tpu.memory_space<vmem>>, vector<8x128xf32>,
    %c0_5 = arith.constant 0 : index
    %c1152_6 = arith.constant 1152 : index
    %5 = vector.load %arg17[%c0_5, %c1152_6] : memref<8x1280xf32, #tpu.memory_space<vmem>>, vector<8x128xf32>
    tpu.vector_store %arg17[%c0_5, %c1152_6], %1 {strides = array<i32>} : memref<8x1280xf32, #tpu.memory_space<vmem>>, vector<8x128xf32>,
    %c0_7 = arith.constant 0 : index
    %c0_8 = arith.constant 0 : index
    %6 = vector.load %arg18[%c0_7, %c0_8] : memref<8x1280xf32, #tpu.memory_space<vmem>>, vector<8x128xf32>
    tpu.vector_store %arg18[%c0_7, %c0_8], %0 {strides = array<i32>} : memref<8x1280xf32, #tpu.memory_space<vmem>>, vector<8x128xf32>,
    %c0_9 = arith.constant 0 : index
    %c1152_10 = arith.constant 1152 : index
    %7 = vector.load %arg18[%c0_9, %c1152_10] : memref<8x1280xf32, #tpu.memory_space<vmem>>, vector<8x128xf32>
    tpu.vector_store %arg18[%c0_9, %c1152_10], %1 {strides = array<i32>} : memref<8x1280xf32, #tpu.memory_space<vmem>>, vector<8x128xf32>,
    %c0_11 = arith.constant 0 : index
    %c0_12 = arith.constant 0 : index
    %8 = vector.load %arg19[%c0_11, %c0_12] : memref<8x1280xf32, #tpu.memory_space<vmem>>, vector<8x128xf32>
    tpu.vector_store %arg19[%c0_11, %c0_12], %0 {strides = array<i32>} : memref<8x1280xf32, #tpu.memory_space<vmem>>, vector<8x128xf32>,
    %c0_13 = arith.constant 0 : index
    %c1152_14 = arith.constant 1152 : index
    %9 = vector.load %arg19[%c0_13, %c1152_14] : memref<8x1280xf32, #tpu.memory_space<vmem>>, vector<8x128xf32>
    tpu.vector_store %arg19[%c0_13, %c1152_14], %1 {strides = array<i32>} : memref<8x1280xf32, #tpu.memory_space<vmem>>, vector<8x128xf32>,
    %c0_15 = arith.constant 0 : index
    %c0_16 = arith.constant 0 : index
    %10 = vector.load %arg20[%c0_15, %c0_16] : memref<8x1280xf32, #tpu.memory_space<vmem>>, vector<8x128xf32>
    tpu.vector_store %arg20[%c0_15, %c0_16], %0 {strides = array<i32>} : memref<8x1280xf32, #tpu.memory_space<vmem>>, vector<8x128xf32>,
    %c0_17 = arith.constant 0 : index
    %c1152_18 = arith.constant 1152 : index
    %11 = vector.load %arg20[%c0_17, %c1152_18] : memref<8x1280xf32, #tpu.memory_space<vmem>>, vector<8x128xf32>
    tpu.vector_store %arg20[%c0_17, %c1152_18], %1 {strides = array<i32>} : memref<8x1280xf32, #tpu.memory_space<vmem>>, vector<8x128xf32>,
    %c0_19 = arith.constant 0 : index
    %c0_20 = arith.constant 0 : index
    %12 = vector.load %arg21[%c0_19, %c0_20] : memref<8x1280xf32, #tpu.memory_space<vmem>>, vector<8x128xf32>
    tpu.vector_store %arg21[%c0_19, %c0_20], %0 {strides = array<i32>} : memref<8x1280xf32, #tpu.memory_space<vmem>>, vector<8x128xf32>,
    %c0_21 = arith.constant 0 : index
    %c1152_22 = arith.constant 1152 : index
    %13 = vector.load %arg21[%c0_21, %c1152_22] : memref<8x1280xf32, #tpu.memory_space<vmem>>, vector<8x128xf32>
    tpu.vector_store %arg21[%c0_21, %c1152_22], %1 {strides = array<i32>} : memref<8x1280xf32, #tpu.memory_space<vmem>>, vector<8x128xf32>,
    %cst_23 = arith.constant 0.000000e+00 : f32
    %14 = vector.broadcast %cst_23 : f32 to vector<8x64xf32>
    %c0_24 = arith.constant 0 : index
    %c0_25 = arith.constant 0 : index
    %15 = vector.load %arg23[%c0_24, %c0_25] : memref<8x64xf32, #tpu.memory_space<vmem>>, vector<8x64xf32>
    tpu.vector_store %arg23[%c0_24, %c0_25], %14 {strides = array<i32>} : memref<8x64xf32, #tpu.memory_space<vmem>>, vector<8x64xf32>,
    %c0_26 = arith.constant 0 : index
    %c0_27 = arith.constant 0 : index
    %16 = vector.load %arg13[%c0_26, %c0_27] : memref<1x1024xf32, #tpu.memory_space<vmem>>, vector<1x1024xf32>
    %c0_28 = arith.constant 0 : index
    %c0_29 = arith.constant 0 : index
    %17 = vector.load %arg14[%c0_28, %c0_29] : memref<1x1024xf32, #tpu.memory_space<vmem>>, vector<1x1024xf32>
    %c0_30 = arith.constant 0 : index
    %c0_31 = arith.constant 0 : index
    %c97 = arith.constant 97 : index
    %18 = vector.load %arg1[%c0_30, %c0_31, %c97] : memref<1x1x1280xf32, #tpu.memory_space<vmem>>, vector<1x1x1024xf32>
    %19 = vector.shape_cast %18 : vector<1x1x1024xf32> to vector<1x1024xf32>
    %c0_32 = arith.constant 0 : index
    %c0_33 = arith.constant 0 : index
    %20 = vector.load %arg22[%c0_32, %c0_33] : memref<72x1024xf32, #tpu.memory_space<vmem>>, vector<1x1024xf32>
    tpu.vector_store %arg22[%c0_32, %c0_33], %19 {strides = array<i32>} : memref<72x1024xf32, #tpu.memory_space<vmem>>, vector<1x1024xf32>,
    %c0_34 = arith.constant 0 : index
    %c0_35 = arith.constant 0 : index
    %c98 = arith.constant 98 : index
    %21 = vector.load %arg1[%c0_34, %c0_35, %c98] : memref<1x1x1280xf32, #tpu.memory_space<vmem>>, vector<1x1x1024xf32>
    %22 = vector.shape_cast %21 : vector<1x1x1024xf32> to vector<1x1024xf32>
    %c1 = arith.constant 1 : index
    %c0_36 = arith.constant 0 : index
    %23 = vector.load %arg22[%c1, %c0_36] : memref<72x1024xf32, #tpu.memory_space<vmem>>, vector<1x1024xf32>
    tpu.vector_store %arg22[%c1, %c0_36], %22 {strides = array<i32>} : memref<72x1024xf32, #tpu.memory_space<vmem>>, vector<1x1024xf32>,
    %c0_37 = arith.constant 0 : index
    %c0_38 = arith.constant 0 : index
    %c99 = arith.constant 99 : index
    %24 = vector.load %arg1[%c0_37, %c0_38, %c99] : memref<1x1x1280xf32, #tpu.memory_space<vmem>>, vector<1x1x1024xf32>
    %25 = vector.shape_cast %24 : vector<1x1x1024xf32> to vector<1x1024xf32>
    %c2 = arith.constant 2 : index
    %c0_39 = arith.constant 0 : index
    %26 = vector.load %arg22[%c2, %c0_39] : memref<72x1024xf32, #tpu.memory_space<vmem>>, vector<1x1024xf32>
    tpu.vector_store %arg22[%c2, %c0_39], %25 {strides = array<i32>} : memref<72x1024xf32, #tpu.memory_space<vmem>>, vector<1x1024xf32>,
    %c0_40 = arith.constant 0 : index
    %c0_41 = arith.constant 0 : index
    %c127 = arith.constant 127 : index
    %27 = vector.load %arg1[%c0_40, %c0_41, %c127] : memref<1x1x1280xf32, #tpu.memory_space<vmem>>, vector<1x1x1024xf32>
    %28 = vector.shape_cast %27 : vector<1x1x1024xf32> to vector<1x1024xf32>
    %c3 = arith.constant 3 : index
    %c0_42 = arith.constant 0 : index
    %29 = vector.load %arg22[%c3, %c0_42] : memref<72x1024xf32, #tpu.memory_space<vmem>>, vector<1x1024xf32>
    tpu.vector_store %arg22[%c3, %c0_42], %28 {strides = array<i32>} : memref<72x1024xf32, #tpu.memory_space<vmem>>, vector<1x1024xf32>,
    %c0_43 = arith.constant 0 : index
    %c0_44 = arith.constant 0 : index
    %c128 = arith.constant 128 : index
    %30 = vector.load %arg1[%c0_43, %c0_44, %c128] : memref<1x1x1280xf32, #tpu.memory_space<vmem>>, vector<1x1x1024xf32>
    %31 = vector.shape_cast %30 : vector<1x1x1024xf32> to vector<1x1024xf32>
    %c4 = arith.constant 4 : index
    %c0_45 = arith.constant 0 : index
    %32 = vector.load %arg22[%c4, %c0_45] : memref<72x1024xf32, #tpu.memory_space<vmem>>, vector<1x1024xf32>
    tpu.vector_store %arg22[%c4, %c0_45], %31 {strides = array<i32>} : memref<72x1024xf32, #tpu.memory_space<vmem>>, vector<1x1024xf32>,
    %c0_46 = arith.constant 0 : index
    %c0_47 = arith.constant 0 : index
    %c129 = arith.constant 129 : index
    %33 = vector.load %arg1[%c0_46, %c0_47, %c129] : memref<1x1x1280xf32, #tpu.memory_space<vmem>>, vector<1x1x1024xf32>
    %34 = vector.shape_cast %33 : vector<1x1x1024xf32> to vector<1x1024xf32>
    %c5 = arith.constant 5 : index
    %c0_48 = arith.constant 0 : index
    %35 = vector.load %arg22[%c5, %c0_48] : memref<72x1024xf32, #tpu.memory_space<vmem>>, vector<1x1024xf32>
    tpu.vector_store %arg22[%c5, %c0_48], %34 {strides = array<i32>} : memref<72x1024xf32, #tpu.memory_space<vmem>>, vector<1x1024xf32>,
    %c0_49 = arith.constant 0 : index
    %c0_50 = arith.constant 0 : index
    %c157 = arith.constant 157 : index
    %36 = vector.load %arg1[%c0_49, %c0_50, %c157] : memref<1x1x1280xf32, #tpu.memory_space<vmem>>, vector<1x1x1024xf32>
    %37 = vector.shape_cast %36 : vector<1x1x1024xf32> to vector<1x1024xf32>
    %c6 = arith.constant 6 : index
    %c0_51 = arith.constant 0 : index
    %38 = vector.load %arg22[%c6, %c0_51] : memref<72x1024xf32, #tpu.memory_space<vmem>>, vector<1x1024xf32>
    tpu.vector_store %arg22[%c6, %c0_51], %37 {strides = array<i32>} : memref<72x1024xf32, #tpu.memory_space<vmem>>, vector<1x1024xf32>,
    %c0_52 = arith.constant 0 : index
    %c0_53 = arith.constant 0 : index
    %c158 = arith.constant 158 : index
    %39 = vector.load %arg1[%c0_52, %c0_53, %c158] : memref<1x1x1280xf32, #tpu.memory_space<vmem>>, vector<1x1x1024xf32>
    %40 = vector.shape_cast %39 : vector<1x1x1024xf32> to vector<1x1024xf32>
    %c7 = arith.constant 7 : index
    %c0_54 = arith.constant 0 : index
    %41 = vector.load %arg22[%c7, %c0_54] : memref<72x1024xf32, #tpu.memory_space<vmem>>, vector<1x1024xf32>
    tpu.vector_store %arg22[%c7, %c0_54], %40 {strides = array<i32>} : memref<72x1024xf32, #tpu.memory_space<vmem>>, vector<1x1024xf32>,
    %c0_55 = arith.constant 0 : index
    %c0_56 = arith.constant 0 : index
    %c159 = arith.constant 159 : index
    %42 = vector.load %arg1[%c0_55, %c0_56, %c159] : memref<1x1x1280xf32, #tpu.memory_space<vmem>>, vector<1x1x1024xf32>
    %43 = vector.shape_cast %42 : vector<1x1x1024xf32> to vector<1x1024xf32>
    %c8 = arith.constant 8 : index
    %c0_57 = arith.constant 0 : index
    %44 = vector.load %arg22[%c8, %c0_57] : memref<72x1024xf32, #tpu.memory_space<vmem>>, vector<1x1024xf32>
    tpu.vector_store %arg22[%c8, %c0_57], %43 {strides = array<i32>} : memref<72x1024xf32, #tpu.memory_space<vmem>>, vector<1x1024xf32>,
    %c0_58 = arith.constant 0 : index
    %c0_59 = arith.constant 0 : index
    %45 = vector.load %arg2[%c0_58, %c0_59] : memref<8x9xf32, #tpu.memory_space<vmem>>, vector<8x9xf32>
    %c0_60 = arith.constant 0 : index
    %c0_61 = arith.constant 0 : index
    %46 = vector.load %arg22[%c0_60, %c0_61] : memref<72x1024xf32, #tpu.memory_space<vmem>>, vector<9x1024xf32>
    %cst_62 = arith.constant dense<0.000000e+00> : vector<8x1024xf32>
    %47 = tpu.matmul %45, %46, %cst_62 {dimension_numbers = #tpu.dot_dimension_numbers<[1], [0], [0], [1], [0, 0, 1, 1], [], []>} : vector<8x9xf32>, vector<9x1024xf32>, vector<8x1024xf32> -> vector<8x1024xf32>
    %c0_63 = arith.constant 0 : index
    %c0_64 = arith.constant 0 : index
    %48 = vector.load %arg3[%c0_63, %c0_64] : memref<8x1xf32, #tpu.memory_space<vmem>>, vector<8x1xf32>
    %49 = vector.broadcast %48 : vector<8x1xf32> to vector<8x1024xf32>
    %50 = arith.addf %47, %49 : vector<8x1024xf32>
    %cst_65 = arith.constant 0.000000e+00 : f32
    %51 = vector.broadcast %cst_65 : f32 to vector<8x1024xf32>
    %52 = arith.maximumf %50, %51 : vector<8x1024xf32>
    %cst_66 = arith.constant 5.000000e-01 : f32
    %53 = vector.broadcast %cst_66 : f32 to vector<1x1024xf32>
    %54 = arith.cmpf ogt, %16, %53 : vector<1x1024xf32>
    %cst_67 = arith.constant 0.000000e+00 : f32
    %55 = vector.shape_cast %54 : vector<1x1024xi1> to vector<1x1024xi1>
    %56 = vector.broadcast %55 : vector<1x1024xi1> to vector<8x1024xi1>
    %57 = vector.broadcast %cst_67 : f32 to vector<8x1024xf32>
    %58 = arith.select %56, %52, %57 : vector<8x1024xi1>, vector<8x1024xf32>
    %c0_68 = arith.constant 0 : index
    %c128_69 = arith.constant 128 : index
    %59 = vector.load %arg16[%c0_68, %c128_69] : memref<8x1280xf32, #tpu.memory_space<vmem>>, vector<8x1024xf32>
    tpu.vector_store %arg16[%c0_68, %c128_69], %58 {strides = array<i32>} : memref<8x1280xf32, #tpu.memory_space<vmem>>, vector<8x1024xf32>,
    %c0_70 = arith.constant 0 : index
    %c97_71 = arith.constant 97 : index
    %60 = vector.load %arg16[%c0_70, %c97_71] : memref<8x1280xf32, #tpu.memory_space<vmem>>, vector<8x1024xf32>
    %c0_72 = arith.constant 0 : index
    %c0_73 = arith.constant 0 : index
    %61 = vector.load %arg22[%c0_72, %c0_73] : memref<72x1024xf32, #tpu.memory_space<vmem>>, vector<8x1024xf32>
    tpu.vector_store %arg22[%c0_72, %c0_73], %60 {strides = array<i32>} : memref<72x1024xf32, #tpu.memory_space<vmem>>, vector<8x1024xf32>,
    %c0_74 = arith.constant 0 : index
    %c98_75 = arith.constant 98 : index
    %62 = vector.load %arg16[%c0_74, %c98_75] : memref<8x1280xf32, #tpu.memory_space<vmem>>, vector<8x1024xf32>
    %c8_76 = arith.constant 8 : index
    %c0_77 = arith.constant 0 : index
    %63 = vector.load %arg22[%c8_76, %c0_77] : memref<72x1024xf32, #tpu.memory_space<vmem>>, vector<8x1024xf32>
    tpu.vector_store %arg22[%c8_76, %c0_77], %62 {strides = array<i32>} : memref<72x1024xf32, #tpu.memory_space<vmem>>, vector<8x1024xf32>,
    %c0_78 = arith.constant 0 : index
    %c99_79 = arith.constant 99 : index
    %64 = vector.load %arg16[%c0_78, %c99_79] : memref<8x1280xf32, #tpu.memory_space<vmem>>, vector<8x1024xf32>
    %c16 = arith.constant 16 : index
    %c0_80 = arith.constant 0 : index
    %65 = vector.load %arg22[%c16, %c0_80] : memref<72x1024xf32, #tpu.memory_space<vmem>>, vector<8x1024xf32>
    tpu.vector_store %arg22[%c16, %c0_80], %64 {strides = array<i32>} : memref<72x1024xf32, #tpu.memory_space<vmem>>, vector<8x1024xf32>,
    %c0_81 = arith.constant 0 : index
    %c127_82 = arith.constant 127 : index
    %66 = vector.load %arg16[%c0_81, %c127_82] : memref<8x1280xf32, #tpu.memory_space<vmem>>, vector<8x1024xf32>
    %c24 = arith.constant 24 : index
    %c0_83 = arith.constant 0 : index
    %67 = vector.load %arg22[%c24, %c0_83] : memref<72x1024xf32, #tpu.memory_space<vmem>>, vector<8x1024xf32>
    tpu.vector_store %arg22[%c24, %c0_83], %66 {strides = array<i32>} : memref<72x1024xf32, #tpu.memory_space<vmem>>, vector<8x1024xf32>,
    %c0_84 = arith.constant 0 : index
    %c128_85 = arith.constant 128 : index
    %68 = vector.load %arg16[%c0_84, %c128_85] : memref<8x1280xf32, #tpu.memory_space<vmem>>, vector<8x1024xf32>
    %c32 = arith.constant 32 : index
    %c0_86 = arith.constant 0 : index
    %69 = vector.load %arg22[%c32, %c0_86] : memref<72x1024xf32, #tpu.memory_space<vmem>>, vector<8x1024xf32>
    tpu.vector_store %arg22[%c32, %c0_86], %68 {strides = array<i32>} : memref<72x1024xf32, #tpu.memory_space<vmem>>, vector<8x1024xf32>,
    %c0_87 = arith.constant 0 : index
    %c129_88 = arith.constant 129 : index
    %70 = vector.load %arg16[%c0_87, %c129_88] : memref<8x1280xf32, #tpu.memory_space<vmem>>, vector<8x1024xf32>
    %c40 = arith.constant 40 : index
    %c0_89 = arith.constant 0 : index
    %71 = vector.load %arg22[%c40, %c0_89] : memref<72x1024xf32, #tpu.memory_space<vmem>>, vector<8x1024xf32>
    tpu.vector_store %arg22[%c40, %c0_89], %70 {strides = array<i32>} : memref<72x1024xf32, #tpu.memory_space<vmem>>, vector<8x1024xf32>,
    %c0_90 = arith.constant 0 : index
    %c157_91 = arith.constant 157 : index
    %72 = vector.load %arg16[%c0_90, %c157_91] : memref<8x1280xf32, #tpu.memory_space<vmem>>, vector<8x1024xf32>
    %c48 = arith.constant 48 : index
    %c0_92 = arith.constant 0 : index
    %73 = vector.load %arg22[%c48, %c0_92] : memref<72x1024xf32, #tpu.memory_space<vmem>>, vector<8x1024xf32>
    tpu.vector_store %arg22[%c48, %c0_92], %72 {strides = array<i32>} : memref<72x1024xf32, #tpu.memory_space<vmem>>, vector<8x1024xf32>,
    %c0_93 = arith.constant 0 : index
    %c158_94 = arith.constant 158 : index
    %74 = vector.load %arg16[%c0_93, %c158_94] : memref<8x1280xf32, #tpu.memory_space<vmem>>, vector<8x1024xf32>
    %c56 = arith.constant 56 : index
    %c0_95 = arith.constant 0 : index
    %75 = vector.load %arg22[%c56, %c0_95] : memref<72x1024xf32, #tpu.memory_space<vmem>>, vector<8x1024xf32>
    tpu.vector_store %arg22[%c56, %c0_95], %74 {strides = array<i32>} : memref<72x1024xf32, #tpu.memory_space<vmem>>, vector<8x1024xf32>,
    %c0_96 = arith.constant 0 : index
    %c159_97 = arith.constant 159 : index
    %76 = vector.load %arg16[%c0_96, %c159_97] : memref<8x1280xf32, #tpu.memory_space<vmem>>, vector<8x1024xf32>
    %c64 = arith.constant 64 : index
    %c0_98 = arith.constant 0 : index
    %77 = vector.load %arg22[%c64, %c0_98] : memref<72x1024xf32, #tpu.memory_space<vmem>>, vector<8x1024xf32>
    tpu.vector_store %arg22[%c64, %c0_98], %76 {strides = array<i32>} : memref<72x1024xf32, #tpu.memory_space<vmem>>, vector<8x1024xf32>,
    %c0_99 = arith.constant 0 : index
    %c0_100 = arith.constant 0 : index
    %78 = vector.load %arg4[%c0_99, %c0_100] : memref<8x72xf32, #tpu.memory_space<vmem>>, vector<8x72xf32>
    %c0_101 = arith.constant 0 : index
    %c0_102 = arith.constant 0 : index
    %79 = vector.load %arg22[%c0_101, %c0_102] : memref<72x1024xf32, #tpu.memory_space<vmem>>, vector<72x1024xf32>
    %cst_103 = arith.constant dense<0.000000e+00> : vector<8x1024xf32>
    %80 = tpu.matmul %78, %79, %cst_103 {dimension_numbers = #tpu.dot_dimension_numbers<[1], [0], [0], [1], [0, 0, 1, 1], [], []>} : vector<8x72xf32>, vector<72x1024xf32>, vector<8x1024xf32> -> vector<8x1024xf32>
    %c0_104 = arith.constant 0 : index
    %c0_105 = arith.constant 0 : index
    %81 = vector.load %arg5[%c0_104, %c0_105] : memref<8x1xf32, #tpu.memory_space<vmem>>, vector<8x1xf32>
    %82 = vector.broadcast %81 : vector<8x1xf32> to vector<8x1024xf32>
    %83 = arith.addf %80, %82 : vector<8x1024xf32>
    %cst_106 = arith.constant 0.000000e+00 : f32
    %84 = vector.broadcast %cst_106 : f32 to vector<8x1024xf32>
    %85 = arith.maximumf %83, %84 : vector<8x1024xf32>
    %cst_107 = arith.constant 5.000000e-01 : f32
    %86 = vector.broadcast %cst_107 : f32 to vector<1x1024xf32>
    %87 = arith.cmpf ogt, %16, %86 : vector<1x1024xf32>
    %cst_108 = arith.constant 0.000000e+00 : f32
    %88 = vector.shape_cast %87 : vector<1x1024xi1> to vector<1x1024xi1>
    %89 = vector.broadcast %88 : vector<1x1024xi1> to vector<8x1024xi1>
    %90 = vector.broadcast %cst_108 : f32 to vector<8x1024xf32>
    %91 = arith.select %89, %85, %90 : vector<8x1024xi1>, vector<8x1024xf32>
    %c0_109 = arith.constant 0 : index
    %c128_110 = arith.constant 128 : index
    %92 = vector.load %arg17[%c0_109, %c128_110] : memref<8x1280xf32, #tpu.memory_space<vmem>>, vector<8x1024xf32>
    tpu.vector_store %arg17[%c0_109, %c128_110], %91 {strides = array<i32>} : memref<8x1280xf32, #tpu.memory_space<vmem>>, vector<8x1024xf32>,
    %c0_111 = arith.constant 0 : index
    %c128_112 = arith.constant 128 : index
    %93 = vector.load %arg17[%c0_111, %c128_112] : memref<8x1280xf32, #tpu.memory_space<vmem>>, vector<8x1024xf32>
    %c0_113 = arith.constant 0 : index
    %c129_114 = arith.constant 129 : index
    %94 = vector.load %arg17[%c0_113, %c129_114] : memref<8x1280xf32, #tpu.memory_space<vmem>>, vector<8x1024xf32>
    %c0_115 = arith.constant 0 : index
    %c158_116 = arith.constant 158 : index
    %95 = vector.load %arg17[%c0_115, %c158_116] : memref<8x1280xf32, #tpu.memory_space<vmem>>, vector<8x1024xf32>
    %c0_117 = arith.constant 0 : index
    %c159_118 = arith.constant 159 : index
    %96 = vector.load %arg17[%c0_117, %c159_118] : memref<8x1280xf32, #tpu.memory_space<vmem>>, vector<8x1024xf32>
    %97 = arith.maximumf %93, %94 : vector<8x1024xf32>
    %98 = arith.maximumf %95, %96 : vector<8x1024xf32>
    %99 = arith.maximumf %97, %98 : vector<8x1024xf32>
    %cst_119 = arith.constant 5.000000e-01 : f32
    %100 = vector.broadcast %cst_119 : f32 to vector<1x1024xf32>
    %101 = arith.cmpf ogt, %17, %100 : vector<1x1024xf32>
    %cst_120 = arith.constant 0.000000e+00 : f32
    %102 = vector.shape_cast %101 : vector<1x1024xi1> to vector<1x1024xi1>
    %103 = vector.broadcast %102 : vector<1x1024xi1> to vector<8x1024xi1>
    %104 = vector.broadcast %cst_120 : f32 to vector<8x1024xf32>
    %105 = arith.select %103, %99, %104 : vector<8x1024xi1>, vector<8x1024xf32>
    %c0_121 = arith.constant 0 : index
    %c128_122 = arith.constant 128 : index
    %106 = vector.load %arg18[%c0_121, %c128_122] : memref<8x1280xf32, #tpu.memory_space<vmem>>, vector<8x1024xf32>
    tpu.vector_store %arg18[%c0_121, %c128_122], %105 {strides = array<i32>} : memref<8x1280xf32, #tpu.memory_space<vmem>>, vector<8x1024xf32>,
    %c0_123 = arith.constant 0 : index
    %c66 = arith.constant 66 : index
    %107 = vector.load %arg18[%c0_123, %c66] : memref<8x1280xf32, #tpu.memory_space<vmem>>, vector<8x1024xf32>
    %c0_124 = arith.constant 0 : index
    %c0_125 = arith.constant 0 : index
    %108 = vector.load %arg22[%c0_124, %c0_125] : memref<72x1024xf32, #tpu.memory_space<vmem>>, vector<8x1024xf32>
    tpu.vector_store %arg22[%c0_124, %c0_125], %107 {strides = array<i32>} : memref<72x1024xf32, #tpu.memory_space<vmem>>, vector<8x1024xf32>,
    %c0_126 = arith.constant 0 : index
    %c68 = arith.constant 68 : index
    %109 = vector.load %arg18[%c0_126, %c68] : memref<8x1280xf32, #tpu.memory_space<vmem>>, vector<8x1024xf32>
    %c8_127 = arith.constant 8 : index
    %c0_128 = arith.constant 0 : index
    %110 = vector.load %arg22[%c8_127, %c0_128] : memref<72x1024xf32, #tpu.memory_space<vmem>>, vector<8x1024xf32>
    tpu.vector_store %arg22[%c8_127, %c0_128], %109 {strides = array<i32>} : memref<72x1024xf32, #tpu.memory_space<vmem>>, vector<8x1024xf32>,
    %c0_129 = arith.constant 0 : index
    %c70 = arith.constant 70 : index
    %111 = vector.load %arg18[%c0_129, %c70] : memref<8x1280xf32, #tpu.memory_space<vmem>>, vector<8x1024xf32>
    %c16_130 = arith.constant 16 : index
    %c0_131 = arith.constant 0 : index
    %112 = vector.load %arg22[%c16_130, %c0_131] : memref<72x1024xf32, #tpu.memory_space<vmem>>, vector<8x1024xf32>
    tpu.vector_store %arg22[%c16_130, %c0_131], %111 {strides = array<i32>} : memref<72x1024xf32, #tpu.memory_space<vmem>>, vector<8x1024xf32>,
    %c0_132 = arith.constant 0 : index
    %c126 = arith.constant 126 : index
    %113 = vector.load %arg18[%c0_132, %c126] : memref<8x1280xf32, #tpu.memory_space<vmem>>, vector<8x1024xf32>
    %c24_133 = arith.constant 24 : index
    %c0_134 = arith.constant 0 : index
    %114 = vector.load %arg22[%c24_133, %c0_134] : memref<72x1024xf32, #tpu.memory_space<vmem>>, vector<8x1024xf32>
    tpu.vector_store %arg22[%c24_133, %c0_134], %113 {strides = array<i32>} : memref<72x1024xf32, #tpu.memory_space<vmem>>, vector<8x1024xf32>,
    %c0_135 = arith.constant 0 : index
    %c128_136 = arith.constant 128 : index
    %115 = vector.load %arg18[%c0_135, %c128_136] : memref<8x1280xf32, #tpu.memory_space<vmem>>, vector<8x1024xf32>
    %c32_137 = arith.constant 32 : index
    %c0_138 = arith.constant 0 : index
    %116 = vector.load %arg22[%c32_137, %c0_138] : memref<72x1024xf32, #tpu.memory_space<vmem>>, vector<8x1024xf32>
    tpu.vector_store %arg22[%c32_137, %c0_138], %115 {strides = array<i32>} : memref<72x1024xf32, #tpu.memory_space<vmem>>, vector<8x1024xf32>,
    %c0_139 = arith.constant 0 : index
    %c130 = arith.constant 130 : index
    %117 = vector.load %arg18[%c0_139, %c130] : memref<8x1280xf32, #tpu.memory_space<vmem>>, vector<8x1024xf32>
    %c40_140 = arith.constant 40 : index
    %c0_141 = arith.constant 0 : index
    %118 = vector.load %arg22[%c40_140, %c0_141] : memref<72x1024xf32, #tpu.memory_space<vmem>>, vector<8x1024xf32>
    tpu.vector_store %arg22[%c40_140, %c0_141], %117 {strides = array<i32>} : memref<72x1024xf32, #tpu.memory_space<vmem>>, vector<8x1024xf32>,
    %c0_142 = arith.constant 0 : index
    %c186 = arith.constant 186 : index
    %119 = vector.load %arg18[%c0_142, %c186] : memref<8x1280xf32, #tpu.memory_space<vmem>>, vector<8x1024xf32>
    %c48_143 = arith.constant 48 : index
    %c0_144 = arith.constant 0 : index
    %120 = vector.load %arg22[%c48_143, %c0_144] : memref<72x1024xf32, #tpu.memory_space<vmem>>, vector<8x1024xf32>
    tpu.vector_store %arg22[%c48_143, %c0_144], %119 {strides = array<i32>} : memref<72x1024xf32, #tpu.memory_space<vmem>>, vector<8x1024xf32>,
    %c0_145 = arith.constant 0 : index
    %c188 = arith.constant 188 : index
    %121 = vector.load %arg18[%c0_145, %c188] : memref<8x1280xf32, #tpu.memory_space<vmem>>, vector<8x1024xf32>
    %c56_146 = arith.constant 56 : index
    %c0_147 = arith.constant 0 : index
    %122 = vector.load %arg22[%c56_146, %c0_147] : memref<72x1024xf32, #tpu.memory_space<vmem>>, vector<8x1024xf32>
    tpu.vector_store %arg22[%c56_146, %c0_147], %121 {strides = array<i32>} : memref<72x1024xf32, #tpu.memory_space<vmem>>, vector<8x1024xf32>,
    %c0_148 = arith.constant 0 : index
    %c190 = arith.constant 190 : index
    %123 = vector.load %arg18[%c0_148, %c190] : memref<8x1280xf32, #tpu.memory_space<vmem>>, vector<8x1024xf32>
    %c64_149 = arith.constant 64 : index
    %c0_150 = arith.constant 0 : index
    %124 = vector.load %arg22[%c64_149, %c0_150] : memref<72x1024xf32, #tpu.memory_space<vmem>>, vector<8x1024xf32>
    tpu.vector_store %arg22[%c64_149, %c0_150], %123 {strides = array<i32>} : memref<72x1024xf32, #tpu.memory_space<vmem>>, vector<8x1024xf32>,
    %c0_151 = arith.constant 0 : index
    %c0_152 = arith.constant 0 : index
    %125 = vector.load %arg6[%c0_151, %c0_152] : memref<8x72xf32, #tpu.memory_space<vmem>>, vector<8x72xf32>
    %c0_153 = arith.constant 0 : index
    %c0_154 = arith.constant 0 : index
    %126 = vector.load %arg22[%c0_153, %c0_154] : memref<72x1024xf32, #tpu.memory_space<vmem>>, vector<72x1024xf32>
    %cst_155 = arith.constant dense<0.000000e+00> : vector<8x1024xf32>
    %127 = tpu.matmul %125, %126, %cst_155 {dimension_numbers = #tpu.dot_dimension_numbers<[1], [0], [0], [1], [0, 0, 1, 1], [], []>} : vector<8x72xf32>, vector<72x1024xf32>, vector<8x1024xf32> -> vector<8x1024xf32>
    %c0_156 = arith.constant 0 : index
    %c0_157 = arith.constant 0 : index
    %128 = vector.load %arg7[%c0_156, %c0_157] : memref<8x1xf32, #tpu.memory_space<vmem>>, vector<8x1xf32>
    %129 = vector.broadcast %128 : vector<8x1xf32> to vector<8x1024xf32>
    %130 = arith.addf %127, %129 : vector<8x1024xf32>
    %cst_158 = arith.constant 0.000000e+00 : f32
    %131 = vector.broadcast %cst_158 : f32 to vector<8x1024xf32>
    %132 = arith.maximumf %130, %131 : vector<8x1024xf32>
    %cst_159 = arith.constant 5.000000e-01 : f32
    %133 = vector.broadcast %cst_159 : f32 to vector<1x1024xf32>
    %134 = arith.cmpf ogt, %17, %133 : vector<1x1024xf32>
    %cst_160 = arith.constant 0.000000e+00 : f32
    %135 = vector.shape_cast %134 : vector<1x1024xi1> to vector<1x1024xi1>
    %136 = vector.broadcast %135 : vector<1x1024xi1> to vector<8x1024xi1>
    %137 = vector.broadcast %cst_160 : f32 to vector<8x1024xf32>
    %138 = arith.select %136, %132, %137 : vector<8x1024xi1>, vector<8x1024xf32>
    %c0_161 = arith.constant 0 : index
    %c128_162 = arith.constant 128 : index
    %139 = vector.load %arg19[%c0_161, %c128_162] : memref<8x1280xf32, #tpu.memory_space<vmem>>, vector<8x1024xf32>
    tpu.vector_store %arg19[%c0_161, %c128_162], %138 {strides = array<i32>} : memref<8x1280xf32, #tpu.memory_space<vmem>>, vector<8x1024xf32>,
    %c0_163 = arith.constant 0 : index
    %c66_164 = arith.constant 66 : index
    %140 = vector.load %arg19[%c0_163, %c66_164] : memref<8x1280xf32, #tpu.memory_space<vmem>>, vector<8x1024xf32>
    %c0_165 = arith.constant 0 : index
    %c0_166 = arith.constant 0 : index
    %141 = vector.load %arg22[%c0_165, %c0_166] : memref<72x1024xf32, #tpu.memory_space<vmem>>, vector<8x1024xf32>
    tpu.vector_store %arg22[%c0_165, %c0_166], %140 {strides = array<i32>} : memref<72x1024xf32, #tpu.memory_space<vmem>>, vector<8x1024xf32>,
    %c0_167 = arith.constant 0 : index
    %c68_168 = arith.constant 68 : index
    %142 = vector.load %arg19[%c0_167, %c68_168] : memref<8x1280xf32, #tpu.memory_space<vmem>>, vector<8x1024xf32>
    %c8_169 = arith.constant 8 : index
    %c0_170 = arith.constant 0 : index
    %143 = vector.load %arg22[%c8_169, %c0_170] : memref<72x1024xf32, #tpu.memory_space<vmem>>, vector<8x1024xf32>
    tpu.vector_store %arg22[%c8_169, %c0_170], %142 {strides = array<i32>} : memref<72x1024xf32, #tpu.memory_space<vmem>>, vector<8x1024xf32>,
    %c0_171 = arith.constant 0 : index
    %c70_172 = arith.constant 70 : index
    %144 = vector.load %arg19[%c0_171, %c70_172] : memref<8x1280xf32, #tpu.memory_space<vmem>>, vector<8x1024xf32>
    %c16_173 = arith.constant 16 : index
    %c0_174 = arith.constant 0 : index
    %145 = vector.load %arg22[%c16_173, %c0_174] : memref<72x1024xf32, #tpu.memory_space<vmem>>, vector<8x1024xf32>
    tpu.vector_store %arg22[%c16_173, %c0_174], %144 {strides = array<i32>} : memref<72x1024xf32, #tpu.memory_space<vmem>>, vector<8x1024xf32>,
    %c0_175 = arith.constant 0 : index
    %c126_176 = arith.constant 126 : index
    %146 = vector.load %arg19[%c0_175, %c126_176] : memref<8x1280xf32, #tpu.memory_space<vmem>>, vector<8x1024xf32>
    %c24_177 = arith.constant 24 : index
    %c0_178 = arith.constant 0 : index
    %147 = vector.load %arg22[%c24_177, %c0_178] : memref<72x1024xf32, #tpu.memory_space<vmem>>, vector<8x1024xf32>
    tpu.vector_store %arg22[%c24_177, %c0_178], %146 {strides = array<i32>} : memref<72x1024xf32, #tpu.memory_space<vmem>>, vector<8x1024xf32>,
    %c0_179 = arith.constant 0 : index
    %c128_180 = arith.constant 128 : index
    %148 = vector.load %arg19[%c0_179, %c128_180] : memref<8x1280xf32, #tpu.memory_space<vmem>>, vector<8x1024xf32>
    %c32_181 = arith.constant 32 : index
    %c0_182 = arith.constant 0 : index
    %149 = vector.load %arg22[%c32_181, %c0_182] : memref<72x1024xf32, #tpu.memory_space<vmem>>, vector<8x1024xf32>
    tpu.vector_store %arg22[%c32_181, %c0_182], %148 {strides = array<i32>} : memref<72x1024xf32, #tpu.memory_space<vmem>>, vector<8x1024xf32>,
    %c0_183 = arith.constant 0 : index
    %c130_184 = arith.constant 130 : index
    %150 = vector.load %arg19[%c0_183, %c130_184] : memref<8x1280xf32, #tpu.memory_space<vmem>>, vector<8x1024xf32>
    %c40_185 = arith.constant 40 : index
    %c0_186 = arith.constant 0 : index
    %151 = vector.load %arg22[%c40_185, %c0_186] : memref<72x1024xf32, #tpu.memory_space<vmem>>, vector<8x1024xf32>
    tpu.vector_store %arg22[%c40_185, %c0_186], %150 {strides = array<i32>} : memref<72x1024xf32, #tpu.memory_space<vmem>>, vector<8x1024xf32>,
    %c0_187 = arith.constant 0 : index
    %c186_188 = arith.constant 186 : index
    %152 = vector.load %arg19[%c0_187, %c186_188] : memref<8x1280xf32, #tpu.memory_space<vmem>>, vector<8x1024xf32>
    %c48_189 = arith.constant 48 : index
    %c0_190 = arith.constant 0 : index
    %153 = vector.load %arg22[%c48_189, %c0_190] : memref<72x1024xf32, #tpu.memory_space<vmem>>, vector<8x1024xf32>
    tpu.vector_store %arg22[%c48_189, %c0_190], %152 {strides = array<i32>} : memref<72x1024xf32, #tpu.memory_space<vmem>>, vector<8x1024xf32>,
    %c0_191 = arith.constant 0 : index
    %c188_192 = arith.constant 188 : index
    %154 = vector.load %arg19[%c0_191, %c188_192] : memref<8x1280xf32, #tpu.memory_space<vmem>>, vector<8x1024xf32>
    %c56_193 = arith.constant 56 : index
    %c0_194 = arith.constant 0 : index
    %155 = vector.load %arg22[%c56_193, %c0_194] : memref<72x1024xf32, #tpu.memory_space<vmem>>, vector<8x1024xf32>
    tpu.vector_store %arg22[%c56_193, %c0_194], %154 {strides = array<i32>} : memref<72x1024xf32, #tpu.memory_space<vmem>>, vector<8x1024xf32>,
    %c0_195 = arith.constant 0 : index
    %c190_196 = arith.constant 190 : index
    %156 = vector.load %arg19[%c0_195, %c190_196] : memref<8x1280xf32, #tpu.memory_space<vmem>>, vector<8x1024xf32>
    %c64_197 = arith.constant 64 : index
    %c0_198 = arith.constant 0 : index
    %157 = vector.load %arg22[%c64_197, %c0_198] : memref<72x1024xf32, #tpu.memory_space<vmem>>, vector<8x1024xf32>
    tpu.vector_store %arg22[%c64_197, %c0_198], %156 {strides = array<i32>} : memref<72x1024xf32, #tpu.memory_space<vmem>>, vector<8x1024xf32>,
    %c0_199 = arith.constant 0 : index
    %c0_200 = arith.constant 0 : index
    %158 = vector.load %arg8[%c0_199, %c0_200] : memref<8x72xf32, #tpu.memory_space<vmem>>, vector<8x72xf32>
    %c0_201 = arith.constant 0 : index
    %c0_202 = arith.constant 0 : index
    %159 = vector.load %arg22[%c0_201, %c0_202] : memref<72x1024xf32, #tpu.memory_space<vmem>>, vector<72x1024xf32>
    %cst_203 = arith.constant dense<0.000000e+00> : vector<8x1024xf32>
    %160 = tpu.matmul %158, %159, %cst_203 {dimension_numbers = #tpu.dot_dimension_numbers<[1], [0], [0], [1], [0, 0, 1, 1], [], []>} : vector<8x72xf32>, vector<72x1024xf32>, vector<8x1024xf32> -> vector<8x1024xf32>
    %c0_204 = arith.constant 0 : index
    %c0_205 = arith.constant 0 : index
    %161 = vector.load %arg9[%c0_204, %c0_205] : memref<8x1xf32, #tpu.memory_space<vmem>>, vector<8x1xf32>
    %162 = vector.broadcast %161 : vector<8x1xf32> to vector<8x1024xf32>
    %163 = arith.addf %160, %162 : vector<8x1024xf32>
    %cst_206 = arith.constant 0.000000e+00 : f32
    %164 = vector.broadcast %cst_206 : f32 to vector<8x1024xf32>
    %165 = arith.maximumf %163, %164 : vector<8x1024xf32>
    %cst_207 = arith.constant 5.000000e-01 : f32
    %166 = vector.broadcast %cst_207 : f32 to vector<1x1024xf32>
    %167 = arith.cmpf ogt, %17, %166 : vector<1x1024xf32>
    %cst_208 = arith.constant 0.000000e+00 : f32
    %168 = vector.shape_cast %167 : vector<1x1024xi1> to vector<1x1024xi1>
    %169 = vector.broadcast %168 : vector<1x1024xi1> to vector<8x1024xi1>
    %170 = vector.broadcast %cst_208 : f32 to vector<8x1024xf32>
    %171 = arith.select %169, %165, %170 : vector<8x1024xi1>, vector<8x1024xf32>
    %c0_209 = arith.constant 0 : index
    %c128_210 = arith.constant 128 : index
    %172 = vector.load %arg20[%c0_209, %c128_210] : memref<8x1280xf32, #tpu.memory_space<vmem>>, vector<8x1024xf32>
    tpu.vector_store %arg20[%c0_209, %c128_210], %171 {strides = array<i32>} : memref<8x1280xf32, #tpu.memory_space<vmem>>, vector<8x1024xf32>,
    %c0_211 = arith.constant 0 : index
    %c128_212 = arith.constant 128 : index
    %173 = vector.load %arg20[%c0_211, %c128_212] : memref<8x1280xf32, #tpu.memory_space<vmem>>, vector<8x1024xf32>
    %c0_213 = arith.constant 0 : index
    %c130_214 = arith.constant 130 : index
    %174 = vector.load %arg20[%c0_213, %c130_214] : memref<8x1280xf32, #tpu.memory_space<vmem>>, vector<8x1024xf32>
    %c0_215 = arith.constant 0 : index
    %c188_216 = arith.constant 188 : index
    %175 = vector.load %arg20[%c0_215, %c188_216] : memref<8x1280xf32, #tpu.memory_space<vmem>>, vector<8x1024xf32>
    %c0_217 = arith.constant 0 : index
    %c190_218 = arith.constant 190 : index
    %176 = vector.load %arg20[%c0_217, %c190_218] : memref<8x1280xf32, #tpu.memory_space<vmem>>, vector<8x1024xf32>
    %177 = arith.maximumf %173, %174 : vector<8x1024xf32>
    %178 = arith.maximumf %175, %176 : vector<8x1024xf32>
    %179 = arith.maximumf %177, %178 : vector<8x1024xf32>
    %c0_219 = arith.constant 0 : index
    %c128_220 = arith.constant 128 : index
    %180 = vector.load %arg21[%c0_219, %c128_220] : memref<8x1280xf32, #tpu.memory_space<vmem>>, vector<8x1024xf32>
    tpu.vector_store %arg21[%c0_219, %c128_220], %179 {strides = array<i32>} : memref<8x1280xf32, #tpu.memory_space<vmem>>, vector<8x1024xf32>,
    %c0_221 = arith.constant 0 : index
    %c0_222 = arith.constant 0 : index
    %181 = vector.load %arg12[%c0_221, %c0_222] : memref<32x8xf32, #tpu.memory_space<vmem>>, vector<32x8xf32>
    %c0_223 = arith.constant 0 : index
    %c159_224 = arith.constant 159 : index
    %182 = vector.load %arg21[%c0_223, %c159_224] : memref<8x1280xf32, #tpu.memory_space<vmem>>, vector<8x32xf32>
    %cst_225 = arith.constant dense<0.000000e+00> : vector<8x8xf32>
    %183 = tpu.matmul %182, %181, %cst_225 {dimension_numbers = #tpu.dot_dimension_numbers<[1], [0], [0], [1], [0, 0, 1, 1], [], []>} : vector<8x32xf32>, vector<32x8xf32>, vector<8x8xf32> -> vector<8x8xf32>
    %c0_226 = arith.constant 0 : index
    %c0_227 = arith.constant 0 : index
    %184 = vector.load %arg23[%c0_226, %c0_227] : memref<8x64xf32, #tpu.memory_space<vmem>>, vector<8x8xf32>
    tpu.vector_store %arg23[%c0_226, %c0_227], %183 {strides = array<i32>} : memref<8x64xf32, #tpu.memory_space<vmem>>, vector<8x8xf32>,
    %c0_228 = arith.constant 0 : index
    %c279 = arith.constant 279 : index
    %185 = vector.load %arg21[%c0_228, %c279] : memref<8x1280xf32, #tpu.memory_space<vmem>>, vector<8x32xf32>
    %cst_229 = arith.constant dense<0.000000e+00> : vector<8x8xf32>
    %186 = tpu.matmul %185, %181, %cst_229 {dimension_numbers = #tpu.dot_dimension_numbers<[1], [0], [0], [1], [0, 0, 1, 1], [], []>} : vector<8x32xf32>, vector<32x8xf32>, vector<8x8xf32> -> vector<8x8xf32>
    %c0_230 = arith.constant 0 : index
    %c8_231 = arith.constant 8 : index
    %187 = vector.load %arg23[%c0_230, %c8_231] : memref<8x64xf32, #tpu.memory_space<vmem>>, vector<8x8xf32>
    tpu.vector_store %arg23[%c0_230, %c8_231], %186 {strides = array<i32>} : memref<8x64xf32, #tpu.memory_space<vmem>>, vector<8x8xf32>,
    %c0_232 = arith.constant 0 : index
    %c399 = arith.constant 399 : index
    %188 = vector.load %arg21[%c0_232, %c399] : memref<8x1280xf32, #tpu.memory_space<vmem>>, vector<8x32xf32>
    %cst_233 = arith.constant dense<0.000000e+00> : vector<8x8xf32>
    %189 = tpu.matmul %188, %181, %cst_233 {dimension_numbers = #tpu.dot_dimension_numbers<[1], [0], [0], [1], [0, 0, 1, 1], [], []>} : vector<8x32xf32>, vector<32x8xf32>, vector<8x8xf32> -> vector<8x8xf32>
    %c0_234 = arith.constant 0 : index
    %c16_235 = arith.constant 16 : index
    %190 = vector.load %arg23[%c0_234, %c16_235] : memref<8x64xf32, #tpu.memory_space<vmem>>, vector<8x8xf32>
    tpu.vector_store %arg23[%c0_234, %c16_235], %189 {strides = array<i32>} : memref<8x64xf32, #tpu.memory_space<vmem>>, vector<8x8xf32>,
    %c0_236 = arith.constant 0 : index
    %c519 = arith.constant 519 : index
    %191 = vector.load %arg21[%c0_236, %c519] : memref<8x1280xf32, #tpu.memory_space<vmem>>, vector<8x32xf32>
    %cst_237 = arith.constant dense<0.000000e+00> : vector<8x8xf32>
    %192 = tpu.matmul %191, %181, %cst_237 {dimension_numbers = #tpu.dot_dimension_numbers<[1], [0], [0], [1], [0, 0, 1, 1], [], []>} : vector<8x32xf32>, vector<32x8xf32>, vector<8x8xf32> -> vector<8x8xf32>
    %c0_238 = arith.constant 0 : index
    %c24_239 = arith.constant 24 : index
    %193 = vector.load %arg23[%c0_238, %c24_239] : memref<8x64xf32, #tpu.memory_space<vmem>>, vector<8x8xf32>
    tpu.vector_store %arg23[%c0_238, %c24_239], %192 {strides = array<i32>} : memref<8x64xf32, #tpu.memory_space<vmem>>, vector<8x8xf32>,
    %c0_240 = arith.constant 0 : index
    %c639 = arith.constant 639 : index
    %194 = vector.load %arg21[%c0_240, %c639] : memref<8x1280xf32, #tpu.memory_space<vmem>>, vector<8x32xf32>
    %cst_241 = arith.constant dense<0.000000e+00> : vector<8x8xf32>
    %195 = tpu.matmul %194, %181, %cst_241 {dimension_numbers = #tpu.dot_dimension_numbers<[1], [0], [0], [1], [0, 0, 1, 1], [], []>} : vector<8x32xf32>, vector<32x8xf32>, vector<8x8xf32> -> vector<8x8xf32>
    %c0_242 = arith.constant 0 : index
    %c32_243 = arith.constant 32 : index
    %196 = vector.load %arg23[%c0_242, %c32_243] : memref<8x64xf32, #tpu.memory_space<vmem>>, vector<8x8xf32>
    tpu.vector_store %arg23[%c0_242, %c32_243], %195 {strides = array<i32>} : memref<8x64xf32, #tpu.memory_space<vmem>>, vector<8x8xf32>,
    %c0_244 = arith.constant 0 : index
    %c759 = arith.constant 759 : index
    %197 = vector.load %arg21[%c0_244, %c759] : memref<8x1280xf32, #tpu.memory_space<vmem>>, vector<8x32xf32>
    %cst_245 = arith.constant dense<0.000000e+00> : vector<8x8xf32>
    %198 = tpu.matmul %197, %181, %cst_245 {dimension_numbers = #tpu.dot_dimension_numbers<[1], [0], [0], [1], [0, 0, 1, 1], [], []>} : vector<8x32xf32>, vector<32x8xf32>, vector<8x8xf32> -> vector<8x8xf32>
    %c0_246 = arith.constant 0 : index
    %c40_247 = arith.constant 40 : index
    %199 = vector.load %arg23[%c0_246, %c40_247] : memref<8x64xf32, #tpu.memory_space<vmem>>, vector<8x8xf32>
    tpu.vector_store %arg23[%c0_246, %c40_247], %198 {strides = array<i32>} : memref<8x64xf32, #tpu.memory_space<vmem>>, vector<8x8xf32>,
    %c0_248 = arith.constant 0 : index
    %c879 = arith.constant 879 : index
    %200 = vector.load %arg21[%c0_248, %c879] : memref<8x1280xf32, #tpu.memory_space<vmem>>, vector<8x32xf32>
    %cst_249 = arith.constant dense<0.000000e+00> : vector<8x8xf32>
    %201 = tpu.matmul %200, %181, %cst_249 {dimension_numbers = #tpu.dot_dimension_numbers<[1], [0], [0], [1], [0, 0, 1, 1], [], []>} : vector<8x32xf32>, vector<32x8xf32>, vector<8x8xf32> -> vector<8x8xf32>
    %c0_250 = arith.constant 0 : index
    %c48_251 = arith.constant 48 : index
    %202 = vector.load %arg23[%c0_250, %c48_251] : memref<8x64xf32, #tpu.memory_space<vmem>>, vector<8x8xf32>
    tpu.vector_store %arg23[%c0_250, %c48_251], %201 {strides = array<i32>} : memref<8x64xf32, #tpu.memory_space<vmem>>, vector<8x8xf32>,
    %c0_252 = arith.constant 0 : index
    %c0_253 = arith.constant 0 : index
    %203 = vector.load %arg11[%c0_252, %c0_253] : memref<1x10xf32, #tpu.memory_space<vmem>>, vector<1x10xf32>
    %c0_254 = arith.constant 0 : index
    %c0_255 = arith.constant 0 : index
    %204 = vector.load %arg23[%c0_254, %c0_255] : memref<8x64xf32, #tpu.memory_space<vmem>>, vector<1x64xf32>
    %c0_256 = arith.constant 0 : index
    %c0_257 = arith.constant 0 : index
    %c0_258 = arith.constant 0 : index
    %205 = vector.load %arg10[%c0_256, %c0_257, %c0_258] : memref<8x64x10xf32, #tpu.memory_space<vmem>>, vector<1x64x10xf32>
    %206 = vector.shape_cast %205 : vector<1x64x10xf32> to vector<64x10xf32>
    %cst_259 = arith.constant dense<0.000000e+00> : vector<1x10xf32>
    %207 = tpu.matmul %204, %206, %cst_259 {dimension_numbers = #tpu.dot_dimension_numbers<[1], [0], [0], [1], [0, 0, 1, 1], [], []>} : vector<1x64xf32>, vector<64x10xf32>, vector<1x10xf32> -> vector<1x10xf32>
    %208 = arith.addf %203, %207 : vector<1x10xf32>
    %c1_260 = arith.constant 1 : index
    %c0_261 = arith.constant 0 : index
    %209 = vector.load %arg23[%c1_260, %c0_261] : memref<8x64xf32, #tpu.memory_space<vmem>>, vector<1x64xf32>
    %c1_262 = arith.constant 1 : index
    %c0_263 = arith.constant 0 : index
    %c0_264 = arith.constant 0 : index
    %210 = vector.load %arg10[%c1_262, %c0_263, %c0_264] : memref<8x64x10xf32, #tpu.memory_space<vmem>>, vector<1x64x10xf32>
    %211 = vector.shape_cast %210 : vector<1x64x10xf32> to vector<64x10xf32>
    %cst_265 = arith.constant dense<0.000000e+00> : vector<1x10xf32>
    %212 = tpu.matmul %209, %211, %cst_265 {dimension_numbers = #tpu.dot_dimension_numbers<[1], [0], [0], [1], [0, 0, 1, 1], [], []>} : vector<1x64xf32>, vector<64x10xf32>, vector<1x10xf32> -> vector<1x10xf32>
    %213 = arith.addf %208, %212 : vector<1x10xf32>
    %c2_266 = arith.constant 2 : index
    %c0_267 = arith.constant 0 : index
    %214 = vector.load %arg23[%c2_266, %c0_267] : memref<8x64xf32, #tpu.memory_space<vmem>>, vector<1x64xf32>
    %c2_268 = arith.constant 2 : index
    %c0_269 = arith.constant 0 : index
    %c0_270 = arith.constant 0 : index
    %215 = vector.load %arg10[%c2_268, %c0_269, %c0_270] : memref<8x64x10xf32, #tpu.memory_space<vmem>>, vector<1x64x10xf32>
    %216 = vector.shape_cast %215 : vector<1x64x10xf32> to vector<64x10xf32>
    %cst_271 = arith.constant dense<0.000000e+00> : vector<1x10xf32>
    %217 = tpu.matmul %214, %216, %cst_271 {dimension_numbers = #tpu.dot_dimension_numbers<[1], [0], [0], [1], [0, 0, 1, 1], [], []>} : vector<1x64xf32>, vector<64x10xf32>, vector<1x10xf32> -> vector<1x10xf32>
    %218 = arith.addf %213, %217 : vector<1x10xf32>
    %c3_272 = arith.constant 3 : index
    %c0_273 = arith.constant 0 : index
    %219 = vector.load %arg23[%c3_272, %c0_273] : memref<8x64xf32, #tpu.memory_space<vmem>>, vector<1x64xf32>
    %c3_274 = arith.constant 3 : index
    %c0_275 = arith.constant 0 : index
    %c0_276 = arith.constant 0 : index
    %220 = vector.load %arg10[%c3_274, %c0_275, %c0_276] : memref<8x64x10xf32, #tpu.memory_space<vmem>>, vector<1x64x10xf32>
    %221 = vector.shape_cast %220 : vector<1x64x10xf32> to vector<64x10xf32>
    %cst_277 = arith.constant dense<0.000000e+00> : vector<1x10xf32>
    %222 = tpu.matmul %219, %221, %cst_277 {dimension_numbers = #tpu.dot_dimension_numbers<[1], [0], [0], [1], [0, 0, 1, 1], [], []>} : vector<1x64xf32>, vector<64x10xf32>, vector<1x10xf32> -> vector<1x10xf32>
    %223 = arith.addf %218, %222 : vector<1x10xf32>
    %c4_278 = arith.constant 4 : index
    %c0_279 = arith.constant 0 : index
    %224 = vector.load %arg23[%c4_278, %c0_279] : memref<8x64xf32, #tpu.memory_space<vmem>>, vector<1x64xf32>
    %c4_280 = arith.constant 4 : index
    %c0_281 = arith.constant 0 : index
    %c0_282 = arith.constant 0 : index
    %225 = vector.load %arg10[%c4_280, %c0_281, %c0_282] : memref<8x64x10xf32, #tpu.memory_space<vmem>>, vector<1x64x10xf32>
    %226 = vector.shape_cast %225 : vector<1x64x10xf32> to vector<64x10xf32>
    %cst_283 = arith.constant dense<0.000000e+00> : vector<1x10xf32>
    %227 = tpu.matmul %224, %226, %cst_283 {dimension_numbers = #tpu.dot_dimension_numbers<[1], [0], [0], [1], [0, 0, 1, 1], [], []>} : vector<1x64xf32>, vector<64x10xf32>, vector<1x10xf32> -> vector<1x10xf32>
    %228 = arith.addf %223, %227 : vector<1x10xf32>
    %c5_284 = arith.constant 5 : index
    %c0_285 = arith.constant 0 : index
    %229 = vector.load %arg23[%c5_284, %c0_285] : memref<8x64xf32, #tpu.memory_space<vmem>>, vector<1x64xf32>
    %c5_286 = arith.constant 5 : index
    %c0_287 = arith.constant 0 : index
    %c0_288 = arith.constant 0 : index
    %230 = vector.load %arg10[%c5_286, %c0_287, %c0_288] : memref<8x64x10xf32, #tpu.memory_space<vmem>>, vector<1x64x10xf32>
    %231 = vector.shape_cast %230 : vector<1x64x10xf32> to vector<64x10xf32>
    %cst_289 = arith.constant dense<0.000000e+00> : vector<1x10xf32>
    %232 = tpu.matmul %229, %231, %cst_289 {dimension_numbers = #tpu.dot_dimension_numbers<[1], [0], [0], [1], [0, 0, 1, 1], [], []>} : vector<1x64xf32>, vector<64x10xf32>, vector<1x10xf32> -> vector<1x10xf32>
    %233 = arith.addf %228, %232 : vector<1x10xf32>
    %c6_290 = arith.constant 6 : index
    %c0_291 = arith.constant 0 : index
    %234 = vector.load %arg23[%c6_290, %c0_291] : memref<8x64xf32, #tpu.memory_space<vmem>>, vector<1x64xf32>
    %c6_292 = arith.constant 6 : index
    %c0_293 = arith.constant 0 : index
    %c0_294 = arith.constant 0 : index
    %235 = vector.load %arg10[%c6_292, %c0_293, %c0_294] : memref<8x64x10xf32, #tpu.memory_space<vmem>>, vector<1x64x10xf32>
    %236 = vector.shape_cast %235 : vector<1x64x10xf32> to vector<64x10xf32>
    %cst_295 = arith.constant dense<0.000000e+00> : vector<1x10xf32>
    %237 = tpu.matmul %234, %236, %cst_295 {dimension_numbers = #tpu.dot_dimension_numbers<[1], [0], [0], [1], [0, 0, 1, 1], [], []>} : vector<1x64xf32>, vector<64x10xf32>, vector<1x10xf32> -> vector<1x10xf32>
    %238 = arith.addf %233, %237 : vector<1x10xf32>
    %c7_296 = arith.constant 7 : index
    %c0_297 = arith.constant 0 : index
    %239 = vector.load %arg23[%c7_296, %c0_297] : memref<8x64xf32, #tpu.memory_space<vmem>>, vector<1x64xf32>
    %c7_298 = arith.constant 7 : index
    %c0_299 = arith.constant 0 : index
    %c0_300 = arith.constant 0 : index
    %240 = vector.load %arg10[%c7_298, %c0_299, %c0_300] : memref<8x64x10xf32, #tpu.memory_space<vmem>>, vector<1x64x10xf32>
    %241 = vector.shape_cast %240 : vector<1x64x10xf32> to vector<64x10xf32>
    %cst_301 = arith.constant dense<0.000000e+00> : vector<1x10xf32>
    %242 = tpu.matmul %239, %241, %cst_301 {dimension_numbers = #tpu.dot_dimension_numbers<[1], [0], [0], [1], [0, 0, 1, 1], [], []>} : vector<1x64xf32>, vector<64x10xf32>, vector<1x10xf32> -> vector<1x10xf32>
    %243 = arith.addf %238, %242 : vector<1x10xf32>
    %c0_302 = arith.constant 0 : index
    %c0_303 = arith.constant 0 : index
    %c0_304 = arith.constant 0 : index
    %244 = vector.load %arg15[%c0_302, %c0_303, %c0_304] : memref<1x1x10xf32, #tpu.memory_space<vmem>>, vector<1x1x10xf32>
    %245 = vector.shape_cast %244 : vector<1x1x10xf32> to vector<1x10xf32>
    %246 = vector.shape_cast %243 : vector<1x10xf32> to vector<1x1x10xf32>
    tpu.vector_store %arg15[%c0_302, %c0_303, %c0_304], %246 {strides = array<i32>} : memref<1x1x10xf32, #tpu.memory_space<vmem>>, vector<1x1x10xf32>,
    return
  }
  func.func @transform_0(%arg0: i32) -> (i32, i32, i32) {
    %c0_i32 = arith.constant 0 : i32
    %c0_i32_0 = arith.constant 0 : i32
    %c0_i32_1 = arith.constant 0 : i32
    return %arg0, %c0_i32, %c0_i32_0 : i32, i32, i32
  }
  func.func @transform_1(%arg0: i32) -> (i32, i32) {
    %c0_i32 = arith.constant 0 : i32
    %c0_i32_0 = arith.constant 0 : i32
    %c0_i32_1 = arith.constant 0 : i32
    return %c0_i32, %c0_i32_0 : i32, i32
  }
  func.func @transform_2(%arg0: i32) -> (i32, i32) {
    %c0_i32 = arith.constant 0 : i32
    %c0_i32_0 = arith.constant 0 : i32
    %c0_i32_1 = arith.constant 0 : i32
    return %c0_i32, %c0_i32_0 : i32, i32
  }
  func.func @transform_3(%arg0: i32) -> (i32, i32) {
    %c0_i32 = arith.constant 0 : i32
    %c0_i32_0 = arith.constant 0 : i32
    %c0_i32_1 = arith.constant 0 : i32
    return %c0_i32, %c0_i32_0 : i32, i32
  }
  func.func @transform_4(%arg0: i32) -> (i32, i32) {
    %c0_i32 = arith.constant 0 : i32
    %c0_i32_0 = arith.constant 0 : i32
    %c0_i32_1 = arith.constant 0 : i32
    return %c0_i32, %c0_i32_0 : i32, i32
  }
  func.func @transform_5(%arg0: i32) -> (i32, i32) {
    %c0_i32 = arith.constant 0 : i32
    %c0_i32_0 = arith.constant 0 : i32
    %c0_i32_1 = arith.constant 0 : i32
    return %c0_i32, %c0_i32_0 : i32, i32
  }
  func.func @transform_6(%arg0: i32) -> (i32, i32) {
    %c0_i32 = arith.constant 0 : i32
    %c0_i32_0 = arith.constant 0 : i32
    %c0_i32_1 = arith.constant 0 : i32
    return %c0_i32, %c0_i32_0 : i32, i32
  }
  func.func @transform_7(%arg0: i32) -> (i32, i32) {
    %c0_i32 = arith.constant 0 : i32
    %c0_i32_0 = arith.constant 0 : i32
    %c0_i32_1 = arith.constant 0 : i32
    return %c0_i32, %c0_i32_0 : i32, i32
  }
  func.func @transform_8(%arg0: i32) -> (i32, i32) {
    %c0_i32 = arith.constant 0 : i32
    %c0_i32_0 = arith.constant 0 : i32
    %c0_i32_1 = arith.constant 0 : i32
    return %c0_i32, %c0_i32_0 : i32, i32
  }
  func.func @transform_9(%arg0: i32) -> (i32, i32, i32) {
    %c0_i32 = arith.constant 0 : i32
    %c0_i32_0 = arith.constant 0 : i32
    %c0_i32_1 = arith.constant 0 : i32
    %c0_i32_2 = arith.constant 0 : i32
    return %c0_i32, %c0_i32_0, %c0_i32_1 : i32, i32, i32
  }
  func.func @transform_10(%arg0: i32) -> (i32, i32) {
    %c0_i32 = arith.constant 0 : i32
    %c0_i32_0 = arith.constant 0 : i32
    %c0_i32_1 = arith.constant 0 : i32
    return %c0_i32, %c0_i32_0 : i32, i32
  }
  func.func @transform_11(%arg0: i32) -> (i32, i32) {
    %c0_i32 = arith.constant 0 : i32
    %c0_i32_0 = arith.constant 0 : i32
    %c0_i32_1 = arith.constant 0 : i32
    return %c0_i32, %c0_i32_0 : i32, i32
  }
  func.func @transform_12(%arg0: i32) -> (i32, i32) {
    %c0_i32 = arith.constant 0 : i32
    %c0_i32_0 = arith.constant 0 : i32
    %c0_i32_1 = arith.constant 0 : i32
    return %c0_i32, %c0_i32_0 : i32, i32
  }
  func.func @transform_13(%arg0: i32) -> (i32, i32) {
    %c0_i32 = arith.constant 0 : i32
    %c0_i32_0 = arith.constant 0 : i32
    %c0_i32_1 = arith.constant 0 : i32
    return %c0_i32, %c0_i32_0 : i32, i32
  }
  func.func @transform_14(%arg0: i32) -> (i32, i32, i32) {
    %c0_i32 = arith.constant 0 : i32
    %c0_i32_0 = arith.constant 0 : i32
    %c0_i32_1 = arith.constant 0 : i32
    return %arg0, %c0_i32, %c0_i32_0 : i32, i32, i32
  }
}

</mosaic_0001>

<bundles_post_ra>
// kernel: fashion_mnist_model2_forward.1
= control target key start
LH: loop header
LB: loop body
LE: loop exit
PB: predicated region body
PF: predicated region fallthrough
CT: control target
= control target key end

     0   :  { %s7868_s0 = inlined_call_operand.vmem [shape: f32[2,1,1280], index: 0, kind: input, shape index: {}]   ;;  %s7869_s1 = inlined_call_operand.vmem [shape: f32[8,9], index: 1, kind: input, shape index: {}]   ;;  %s7870_s2 = inlined_call_operand.vmem [shape: f32[8,1], index: 2, kind: input, shape index: {}]   ;;  %s7871_s3 = inlined_call_operand.vmem [shape: f32[8,72], index: 3, kind: input, shape index: {}]   ;;  %s7872_s4 = inlined_call_operand.vmem [shape: f32[8,1], index: 4, kind: input, shape index: {}]   ;;  %s7873_s5 = inlined_call_operand.vmem [shape: f32[8,72], index: 5, kind: input, shape index: {}]   ;;  %s7874_s6 = inlined_call_operand.vmem [shape: f32[8,1], index: 6, kind: input, shape index: {}]   ;;  %s7875_s7 = inlined_call_operand.vmem [shape: f32[8,72], index: 7, kind: input, shape index: {}]   ;;  %s7876_s8 = inlined_call_operand.vmem [shape: f32[8,1], index: 8, kind: input, shape index: {}]   ;;  %s7877_s9 = inlined_call_operand.vmem [shape: f32[8,64,10], index: 9, kind: input, shape index: {}]   ;;  %s7878_s10 = inlined_call_operand.vmem [shape: f32[1,10], index: 10, kind: input, shape index: {}]   ;;  %s7879_s11 = inlined_call_operand.vmem [shape: f32[32,8], index: 11, kind: input, shape index: {}]   ;;  %s7880_s12 = inlined_call_operand.vmem [shape: f32[1,1024], index: 12, kind: input, shape index: {}]   ;;  %s7881_s13 = inlined_call_operand.vmem [shape: f32[1,1024], index: 13, kind: input, shape index: {}]   ;;  %s7882_s14 = inlined_call_operand.hbm [shape: f32[2,1,10], index: 14, kind: output, shape index: {}]  }
   0x1   :  { %7938 = sst [smem:[#allocation21_spill]] %s7868_s0 }
   0x2   :  { %7939 = sst [smem:[#allocation22_spill]] %s7869_s1 }
   0x3   :  { %7940 = sst [smem:[#allocation23_spill]] %s7870_s2 }
   0x4   :  { %7941 = sst [smem:[#allocation24_spill]] %s7871_s3 }
   0x5   :  { %7942 = sst [smem:[#allocation25_spill]] %s7872_s4 }
   0x6   :  { %19 = vsyncpa [#allocation11], 0 }
   0x7   :  { %21 = vsyncpa [#allocation11 + $0x1], 0  ;;  %s6046_s29 = smov 0   ;;  %s6048_s30 = smov 0  }
   0x8   :  { %s6050_s15 = smov 0   ;;  %s6052_s16 = smov 0  }
   0x9 LB: > { %s6067_s17 = sadd.s32 4294967295, %s5938_s16   ;;  %s5344_s18 = sadd.s32 4294967294, %s5938_s16   ;;  %s5938_s16 = sphi %s6052_s16, %s8001_s16   ;;  %s5934_s15 = sphi %s6050_s15, %s8000_s15   ;;  %s5930_s30 = sphi %s6048_s30, %s7999_s30   ;;  %s5926_s29 = sphi %s6046_s29, %s7998_s29  }
   0xa   : > { %s6071_s19 = sadd.s32 1, %s5938_s16   ;;  %s333_s20 = sadd.s32 1, %s5934_s15 }
   0xb   : > { %s330_s21 = ssub.s32 %s5938_s16, %s6071_s19  ;;  %p343_p0 = scmp.ne.s32.totalorder %s5934_s15, %s5930_s30 }
   0xc   : > { %p331_p1 = scmp.eq.s32.totalorder %s330_s21, 0  ;;  %p344_p2 = scmp.eq.s32.totalorder %s6067_s17, 1 }
   0xd   : > { %p349_p3 = scmp.ne.s32.totalorder %s5930_s30, %s5926_s29  ;;  %p350_p4 = scmp.eq.s32.totalorder %s5344_s18, 1 }
   0xe   : > { %s6082_s22 = scalar_select %p331_p1, %s5934_s15, %s333_s20  }
   0xf   : > { %p6084_p5 = por %p344_p2, %p343_p0  ;;  %p6088_p6 = por %p350_p4, %p349_p3 }
  0x10   : > { %p5347_p7 = scmp.ge.s32.totalorder %s5938_s16, 1  ;;  %p414_p8 = scmp.lt.s32.totalorder %s5938_s16, 3 }
  0x12   : > { %p415_p9 = pnand %p5347_p7, %p414_p8 }
  0x14   : > { %418 = sbr.rel (%p415_p9) target bundleno = 2904 (0xb58), region = 76 }
  0x19   : > { %p458_p10 = scmp.lt.s32.totalorder %s6067_s17, 1  ;;  %s7945_s0 = sld [smem:[#allocation21_spill]]  ;;  %v7906_v10 = vmov 0.0   ;;  %v5949_v12 = vmov 0   ;;  %vm488_vm0 = vcmask 1046528   ;;  %vm612_vm1 = vcmask 793600  }
  0x1a   : > { %s7885_s20 = smov 97   ;;  %s7893_s21 = smov 31   ;;  %734 = vmatprep.mubr.f32.mxu1 %v7906_v10  ;;  %876 = vmatprep.mubr.f32.mxu0 %v7906_v10  ;;  %vm490_vm2 = vcmask 252928   ;;  %vm506_vm3 = vcmask 244736   ;;  %vm523_vm4 = vcmask 236544   ;;  %vm645_vm5 = vcmask 1040384  }
  0x1b   : > { %s459_s25 = scalar_select %p458_p10, %s6067_s17, 1  ;;  %5852 = vset.pattern.permute.xlu0 %v5949_v12  ;;  %5853 = vset.pattern.permute.xlu1 %v5949_v12  ;;  %vm7935_vm6 = vcmask 7168   ;;  %vm561_vm7 = vcmask 1039360   ;;  %vm578_vm8 = vcmask 809984   ;;  %vm595_vm9 = vcmask 801792  }
  0x1c   : > { %s7889_s27 = smov 1   ;;  %s7887_s28 = smov 127   ;;  %vm7899_vm10 = vcmask 72704  }
  0x1d   : > { %s5782_s26 = smul.u32 10, %s459_s25  ;;  %s7883_s25 = smov 30  }
  0x1e   : > { %s7946_s2 = sld [smem:[#allocation23_spill]] }
  0x1f   : > { %s6099_s18 = scalar_lea.vmem %s7945_s0, %s5782_s26  ;;  %s7895_s26 = smov 29  }
  0x20   : > { %v601_v0 = vld [vmem:[%s6099_s18 + $0x1] sm:$0xff]  ;;  %v602_v2 = vld [vmem:[%s6099_s18 + $0x9] sm:$0x1]  ;;  %s7951_s1 = sld [smem:[#allocation22_spill]]  ;;  %s7960_s0 = smov 98  }
  0x21   : > { %v478_v1 = vld [vmem:[%s6099_s18] sm:$0xff]  ;;  %605 = vrot.lane.b32.xlu0 %v601_v0, %s7885_s20  ;;  %548 = vst [vmem:[#allocation8 + $0x4] ss:$8 sm:$0xf] %v601_v0  ;;  %v479_v3 = vld [vmem:[%s6099_s18 + $0x8] sm:$0x1] }
  0x22   : > { %482 = vrot.lane.b32.xlu1 %v478_v1, %s7893_s21  ;;  %549 = vst [vmem:[#allocation8 + $0x4] ss:$8 sm:$0xf0] %v601_v0  ;;  %v496_v4 = vld [vmem:[%s6099_s18 + $0x8] sm:$0x1]  ;;  %s7964_s4 = sld [smem:[#allocation25_spill]] }
  0x23   : > { %v513_v5 = vld [vmem:[%s6099_s18 + $0x8] sm:$0x1]  ;;  %v551_v7 = vld [vmem:[%s6099_s18 + $0x9] sm:$0x1]  ;;  %s7967_s3 = sld [smem:[#allocation24_spill]] }
  0x24   : > { %v530_v6 = vld [vmem:[%s6099_s18 + $0x8] sm:$0x1]  ;;  %v568_v8 = vld [vmem:[%s6099_s18 + $0x9] sm:$0x1]  ;;  %v635_v11 = vld [vmem:[%s7946_s2] sm:$0xff]  ;;  %s7983_s2 = smov 58  }
  0x25   : > { %607 = vrot.lane.b32.xlu0 %v602_v2, %s7885_s20  ;;  %v585_v9 = vld [vmem:[%s6099_s18 + $0x9] sm:$0x1]  ;;  %s7897_s20 = smov 98   ;;  %s7947_s18 = smov 97  }
  0x26   : > { %484 = vrot.lane.b32.xlu1 %v479_v3, %s7893_s21 }
  0x29   : > { %499 = vrot.lane.b32.xlu0 %v478_v1, %s7883_s25 }
  0x2a   : > { %501 = vrot.lane.b32.xlu1 %v496_v4, %s7883_s25  ;;  %s7891_s25 = smov 99  }
  0x2d   : > { %516 = vrot.lane.b32.xlu0 %v478_v1, %s7895_s26 }
  0x2e   : > { %518 = vrot.lane.b32.xlu1 %v513_v5, %s7895_s26 }
  0x31   : > { %533 = vrot.lane.b32.xlu0 %v478_v1, %s7889_s27  ;;  %v618_v1 = vld [vmem:[%s7951_s1] sm:$0xff]  ;;  %s7923_s1 = smov 62  }
  0x32   : > { %535 = vrot.lane.b32.xlu1 %v530_v6, %s7889_s27  ;;  %s7950_s27 = smov 99  }
  0x35   : > { %554 = vrot.lane.b32.xlu0 %v601_v0, %s7887_s28 }
  0x36   : > { %556 = vrot.lane.b32.xlu1 %v551_v7, %s7887_s28  ;;  %s7963_s28 = smov 31  }
  0x39   : > { %571 = vrot.lane.b32.xlu0 %v601_v0, %s7891_s25 }
  0x3a   : > { %573 = vrot.lane.b32.xlu1 %v568_v8, %s7891_s25  ;;  %s7948_s25 = smov 1  }
  0x3d   : > { %588 = vrot.lane.b32.xlu0 %v601_v0, %s7897_s20 }
  0x3e   : > { %590 = vrot.lane.b32.xlu1 %v585_v9, %s7897_s20 }
  0x41   : > { %638 = vperm.xlu0 %5852, %v635_v11  }
  0x42   : > { %1158 = vrot.lane.b32.xlu1 %v7906_v10, %s7895_s26  ;;  %s7962_s26 = smov 29  }
  0x45   : > { %1218 = vrot.lane.b32.xlu0 %v7906_v10, %s7948_s25 }
  0x46   : > { %1038 = vrot.lane.b32.xlu1 %v7906_v10, %s7893_s21  ;;  %s7949_s21 = smov 30  }
  0x49   : > { %1098 = vrot.lane.b32.xlu0 %v7906_v10, %s7949_s21 }
  0x4a   : > { %1490 = vrot.lane.b32.xlu1 %v7906_v10, %s7947_s18 }
  0x4e   : > { %1430 = vrot.lane.b32.xlu1 %v7906_v10, %s7897_s20  ;;  %s7961_s20 = smov 127  }
  0x52   : > { %1370 = vrot.lane.b32.xlu1 %v7906_v10, %s7950_s27 }
  0x93   : > { %v606_v13 = vpop.permute.xlu0 %605 }
  0x94   : > { %v483_v14 = vpop.permute.xlu1 %482  ;;  %v609_v17 = vrot.slane %v606_v13, 1 }
  0x95   : > { %v486_v18 = vrot.slane %v483_v14, 1 }
  0x97   : > { %v608_v15 = vpop.permute.xlu0 %607 }
  0x98   : > { %v485_v16 = vpop.permute.xlu1 %484  ;;  %v610_v19 = vrot.slane %v608_v15, 1 }
  0x99   : > { %v487_v20 = vrot.slane %v485_v16, 1  ;;  %v477_v16 = vld [vmem:[%s7881_s13] sm:$0xff] }
  0x9a   : > { %v611_v21 = vsel %vm488_vm0, %v609_v17, %v610_v19  ;;  %v964_v17 = vlaneseq  ;;  %vm2036_vm11 = vcmp.gt.f32.partialorder %v477_v16, 0.5 }
  0x9b   : > { %v489_v22 = vsel %vm488_vm0, %v486_v18, %v487_v20  ;;  %v613_v23 = vsel %vm612_vm1, %v606_v13, %v611_v21  ;;  %v500_v25 = vpop.permute.xlu0 %499  ;;  %v2037_v19 = vsel %vm2036_vm11, 1, %v5949_v12  ;;  %v476_v20 = vld [vmem:[%s7880_s12] sm:$0xff] }
  0x9c   : > { %v491_v24 = vsel %vm490_vm2, %v483_v14, %v489_v22  ;;  %v502_v26 = vpop.permute.xlu1 %501  ;;  %616 = vst [vmem:[#allocation8 + $0x40] ss:$8 sm:$0xf] %v613_v23  ;;  %617 = vst [vmem:[#allocation8 + $0x40] ss:$8 sm:$0xf0] %v613_v23 }
  0x9d   : > { %493 = vst [vmem:[#allocation8] ss:$8 sm:$0xf] %v491_v24  ;;  %494 = vst [vmem:[#allocation8] ss:$8 sm:$0xf0] %v491_v24 }
  0x9e   : > { %v503_v27 = vrot.slane %v500_v25, 1  ;;  %v504_v28 = vrot.slane %v502_v26, 1  ;;  %v6186_v18 = vshrl.u32 %v964_v17, 7  ;;  %vm962_vm12 = vcmp.gt.f32.partialorder %v476_v20, 0.5 }
  0x9f   : > { %v517_v31 = vpop.permute.xlu0 %516 }
  0xa0   : > { %v505_v29 = vsel %vm488_vm0, %v503_v27, %v504_v28  ;;  %v519_v32 = vpop.permute.xlu1 %518  ;;  %v520_v33 = vrot.slane %v517_v31, 1  ;;  %v966_v21 = vsub.s32 0, %v6186_v18  ;;  %v982_v22 = vsub.s32 4, %v6186_v18 }
  0xa1   : > { %v507_v30 = vsel %vm506_vm3, %v500_v25, %v505_v29  ;;  %v521_v34 = vrot.slane %v519_v32, 1  ;;  %v970_v24 = vsub.s32 1, %v6186_v18  ;;  %v986_v26 = vsub.s32 5, %v6186_v18 }
  0xa2   : > { %510 = vst [vmem:[#allocation8 + $0x1] ss:$8 sm:$0xf] %v507_v30  ;;  %511 = vst [vmem:[#allocation8 + $0x1] ss:$8 sm:$0xf0] %v507_v30  ;;  %v6194_v23 = vrot.slane %v2037_v19, %v966_v21  ;;  %v6197_v25 = vrot.slane %v2037_v19, %v982_v22 }
  0xa3   : > { %v522_v35 = vsel %vm488_vm0, %v520_v33, %v521_v34  ;;  %v534_v37 = vpop.permute.xlu0 %533  ;;  %v628_v39 = vld [vmem:[#allocation8 + $0x48] sm:$0x1]  ;;  %v627_v41 = vld [vmem:[#allocation8 + $0x40] sm:$0x1]  ;;  %v630_v6 = vld [vmem:[#allocation8 + $0x58] sm:$0x1]  ;;  %v6200_v27 = vrot.slane %v2037_v19, %v970_v24  ;;  %v6203_v29 = vrot.slane %v2037_v19, %v986_v26 }
  0xa4   : > { %v524_v36 = vsel %vm523_vm4, %v517_v31, %v522_v35  ;;  %v536_v38 = vpop.permute.xlu1 %535  ;;  %v632_v40 = vld [vmem:[#allocation8 + $0x68] sm:$0x1]  ;;  %v537_v42 = vrot.slane %v534_v37, 1  ;;  %5348 = vmatprep.subr.msk.mxu1 %vm645_vm5, %v628_v39  ;;  %v631_v44 = vld [vmem:[#allocation8 + $0x60] sm:$0x1]  ;;  %7952 = vst [vmem:[#allocation13_spill] sm:$0xff] %v6194_v23 }
  0xa5   : > { %527 = vst [vmem:[#allocation8 + $0x2] ss:$8 sm:$0xf] %v524_v36  ;;  %528 = vst [vmem:[#allocation8 + $0x2] ss:$8 sm:$0xf0] %v524_v36  ;;  %5354 = vmatprep.subr.msk.mxu0 %vm645_vm5, %v632_v40  ;;  %5349 = vmatpush1.msk.msra.mxu1 %vm645_vm5, %v627_v41 }
  0xa6   : > { %v538_v43 = vrot.slane %v536_v38, 1  ;;  %5355 = vmatpush1.msk.msra.mxu0 %vm645_vm5, %v631_v44  ;;  %v629_v7 = vld [vmem:[#allocation8 + $0x50] sm:$0x1]  ;;  %v634_v11 = vld [vmem:[#allocation8 + $0x78] sm:$0x1]  ;;  %7953 = vst [vmem:[#allocation14_spill] sm:$0xff] %v6197_v25 }
  0xa7   : > { %v555_v47 = vpop.permute.xlu0 %554  ;;  %v633_v13 = vld [vmem:[#allocation8 + $0x70] sm:$0x1]  ;;  %7954 = vst [vmem:[#allocation15_spill] sm:$0xff] %v6200_v27  ;;  %v974_v28 = vsub.s32 2, %v6186_v18  ;;  %7955 = vst [vmem:[#allocation16_spill] sm:$0xff] %v6203_v29  ;;  %v978_v30 = vsub.s32 3, %v6186_v18 }
  0xa8   : > { %v539_v45 = vsel %vm488_vm0, %v537_v42, %v538_v43  ;;  %v557_v48 = vpop.permute.xlu1 %556  ;;  %v558_v49 = vrot.slane %v555_v47, 1  ;;  %v963_v31 = vsel %vm962_vm12, 1, %v5949_v12  ;;  %v990_v34 = vsub.s32 6, %v6186_v18 }
  0xa9   : > { %v541_v46 = vsel %vm7935_vm6, %v534_v37, %v539_v45  ;;  %v559_v50 = vrot.slane %v557_v48, 1  ;;  %v6209_v32 = vrot.slane %v2037_v19, %v974_v28  ;;  %v6211_v33 = vrot.slane %v963_v31, %v978_v30 }
  0xaa   : > { %544 = vst [vmem:[#allocation8 + $0x3] ss:$8 sm:$0xf] %v541_v46  ;;  %545 = vst [vmem:[#allocation8 + $0x3] ss:$8 sm:$0xf0] %v541_v46  ;;  %v6214_v35 = vrot.slane %v2037_v19, %v978_v30  ;;  %v6216_v36 = vrot.slane %v963_v31, %v990_v34  ;;  %v6219_v38 = vrot.slane %v2037_v19, %v990_v34 }
  0xab   : > { %v560_v51 = vsel %vm488_vm0, %v558_v49, %v559_v50  ;;  %v572_v53 = vpop.permute.xlu0 %571  ;;  %7956 = vst [vmem:[#allocation17_spill] sm:$0xff] %v6209_v32  ;;  %v994_v37 = vsub.s32 7, %v6186_v18  ;;  %v6227_v41 = vrot.slane %v963_v31, %v966_v21  ;;  %v6243_v48 = vrot.slane %v963_v31, %v982_v22 }
  0xac   : > { %v562_v52 = vsel %vm561_vm7, %v555_v47, %v560_v51  ;;  %v574_v54 = vpop.permute.xlu1 %573  ;;  %v575_v55 = vrot.slane %v572_v53, 1  ;;  %7957 = vst [vmem:[#allocation18_spill] sm:$0xff] %v6214_v35  ;;  %7958 = vst [vmem:[#allocation19_spill] sm:$0xff] %v6219_v38  ;;  %vm999_vm11 = vcmp.eq.s32.totalorder %v6211_v33, 1  ;;  %vm1002_vm12 = vcmp.eq.s32.totalorder %v6216_v36, 1 }
  0xad   : > { %565 = vst [vmem:[#allocation8 + $0x5] ss:$8 sm:$0xf] %v562_v52  ;;  %566 = vst [vmem:[#allocation8 + $0x5] ss:$8 sm:$0xf0] %v562_v52  ;;  %v6221_v39 = vrot.slane %v963_v31, %v994_v37  ;;  %v6223_v40 = vrot.slane %v2037_v19, %v994_v37 }
  0xae   : > { %v576_v56 = vrot.slane %v574_v54, 1  ;;  %vm996_vm13 = vcmp.eq.s32.totalorder %v6227_v41, 1  ;;  %vm1000_vm14 = vcmp.eq.s32.totalorder %v6243_v48, 1 }
  0xaf   : > { %v589_v59 = vpop.permute.xlu0 %588  ;;  %7959 = vst [vmem:[#allocation20_spill] sm:$0xff] %v6223_v40 }
  0xb0   : > { %v577_v57 = vsel %vm488_vm0, %v575_v55, %v576_v56  ;;  %v591_v60 = vpop.permute.xlu1 %590  ;;  %v592_v61 = vrot.slane %v589_v59, 1 }
  0xb1   : > { %v579_v58 = vsel %vm578_vm8, %v572_v53, %v577_v57  ;;  %v593_v62 = vrot.slane %v591_v60, 1  ;;  %v6260_v53 = vrot.slane %v963_v31, %v970_v24 }
  0xb2   : > { %582 = vst [vmem:[#allocation8 + $0x6] ss:$8 sm:$0xf] %v579_v58  ;;  %583 = vst [vmem:[#allocation8 + $0x6] ss:$8 sm:$0xf0] %v579_v58  ;;  %v6281_v58 = vrot.slane %v963_v31, %v986_v26 }
  0xb3   : > { %v594_v63 = vsel %vm488_vm0, %v592_v61, %v593_v62  ;;  %vm7918_vm15 = vcmp.eq.s32.totalorder %v6260_v53, 1 }
  0xb4   : > { %v596_v0 = vsel %vm595_vm9, %v589_v59, %v594_v63  ;;  %vm1001_vm0 = vcmp.eq.s32.totalorder %v6281_v58, 1  ;;  %v6300_v63 = vrot.slane %v963_v31, %v974_v28 }
  0xb5   : > { %599 = vst [vmem:[#allocation8 + $0x7] ss:$8 sm:$0xf] %v596_v0  ;;  %600 = vst [vmem:[#allocation8 + $0x7] ss:$8 sm:$0xf0] %v596_v0 }
  0xbc   : > { %v620_v2 = vld [vmem:[#allocation8 + $0x8] sm:$0xff]  ;;  %v619_v4 = vld [vmem:[#allocation8] sm:$0xff]  ;;  %v622_v8 = vld [vmem:[#allocation8 + $0x18] sm:$0xff]  ;;  %v6225_v12 = vpop.permute.xlu0 %638 }
  0xbd   : > { %v624_v3 = vld [vmem:[#allocation8 + $0x28] sm:$0xff]  ;;  %700 = vmatprep.subr.mxu1 %v620_v2  ;;  %v623_v5 = vld [vmem:[#allocation8 + $0x20] sm:$0xff]  ;;  %v621_v9 = vld [vmem:[#allocation8 + $0x10] sm:$0xff] }
  0xbe   : > { %842 = vmatprep.subr.mxu0 %v624_v3  ;;  %701 = vmatpush1.msra.mxu1 %v619_v4  ;;  %v626_v14 = vld [vmem:[#allocation8 + $0x38] sm:$0xff]  ;;  %v625_v15 = vld [vmem:[#allocation8 + $0x30] sm:$0xff] }
  0xbf   : > { %843 = vmatpush1.msra.mxu0 %v623_v5  ;;  %5350 = vmatmul.mubr.msk.f32.vlgmr.msra.gmra.mxu1 %vm7899_vm10, %v618_v1 }
  0xc0   : > { %5351 = vmatprep.subr.msk.mxu1 %vm645_vm5, %v630_v6  ;;  %5356 = vmatmul.mubr.msk.f32.vlgmr.msra.gmra.mxu0 %vm7899_vm10, %v618_v1  ;;  %v6365_v18 = vpop.permute.xlu0 %1218 }
  0xc1   : > { %5352 = vmatpush1.msk.msra.mxu1 %vm645_vm5, %v629_v7  ;;  %805 = vmatprep.mubr.f32.mxu1 %v7906_v10 }
  0xc2   : > { %771 = vmatprep.subr.mxu1 %v622_v8  ;;  %1663 = vmatprep.mubr.f32.mxu0 %v7906_v10 }
  0xc3   : > { %772 = vmatpush1.msra.mxu1 %v621_v9  ;;  %v6342_v9 = vpop.permute.xlu1 %1158 }
  0xc4   : > { %5353 = vmatmul.mubr.msk.f32.vlgmr.msra.gmra.mxu1 %vm7899_vm10, %v618_v1  ;;  %5357 = vmatprep.subr.msk.mxu1 %vm645_vm5, %v634_v11  ;;  %v6378_v21 = vpop.permute.xlu0 %1098 }
  0xc5   : > { %5358 = vmatpush1.msk.msra.mxu1 %vm645_vm5, %v633_v13  ;;  %947 = vmatprep.mubr.f32.mxu1 %v7906_v10  ;;  %vm998_vm5 = vcmp.eq.s32.totalorder %v6300_v63, 1 }
  0xc6   : > { %913 = vmatprep.subr.mxu1 %v626_v14 }
  0xc7   : > { %914 = vmatpush1.msra.mxu1 %v625_v15  ;;  %v6350_v13 = vpop.permute.xlu1 %1038 }
  0xc8   : > { %5359 = vmatmul.mubr.msk.f32.vlgmr.msra.gmra.mxu1 %vm7899_vm10, %v618_v1  ;;  %vm1003_vm10 = vcmp.eq.s32.totalorder %v6221_v39, 1 }
  0xc9   : > { %1734 = vmatprep.mubr.f32.mxu1 %v7906_v10 }
  0xcb   : > { %v6359_v16 = vpop.permute.xlu1 %1490 }
  0xcf   : > { %v6367_v19 = vpop.permute.xlu1 %1430 }
  0xd3   : > { %v6380_v22 = vpop.permute.xlu1 %1370 }
 0x17f   : > { %v736_v42 = vpop.f32.mrf.mxu1 }
 0x180   : > { %v6230_v43 = vadd.f32 %v736_v42, %v6225_v12  ;;  %v878_v46 = vpop.f32.mrf.mxu0  ;;  %v1589_v42 = vld [vmem:[%s7964_s4] sm:$0xff]  ;;  %s5443_s4 = sshll.u32 %s6067_s17, 4  ;;  %s5970_s17 = smov [#allocation10]  }
 0x181   : > { %v6241_v47 = vadd.f32 %v878_v46, %v6225_v12  ;;  %v738_v51 = vpop.f32.mrf.mxu1 }
 0x182   : > { %v7908_v44 = vmax.f32 %v6230_v43, 0.0  ;;  %v6258_v52 = vadd.f32 %v738_v51, %v6225_v12  ;;  %v880_v56 = vpop.f32.mrf.mxu0 }
 0x183   : > { %v7902_v49 = vmax.f32 %v6241_v47, 0.0  ;;  %v6279_v57 = vadd.f32 %v880_v56, %v6225_v12 }
 0x184   : > { %v1004_v45 = vsel %vm996_vm13, %v7908_v44, 0.0  ;;  %v7909_v54 = vmax.f32 %v6258_v52, 0.0  ;;  %v807_v61 = vpop.f32.mrf.mxu1 }
 0x185   : > { %1414 = vrot.lane.b32.xlu1 %v1004_v45, %s7960_s0  ;;  %1474 = vrot.lane.b32.xlu0 %v1004_v45, %s7947_s18  ;;  %v1008_v50 = vsel %vm1000_vm14, %v7902_v49, 0.0  ;;  %v7903_v59 = vmax.f32 %v6279_v57, 0.0  ;;  %v6296_v62 = vadd.f32 %v807_v61, %v6225_v12 }
 0x186   : > { %v1005_v55 = vsel %vm7918_vm15, %v7909_v54, 0.0  ;;  %v809_v1 = vpop.f32.mrf.mxu1 }
 0x187   : > { %v1009_v60 = vsel %vm1001_vm0, %v7903_v59, 0.0  ;;  %v7904_v0 = vmax.f32 %v6296_v62, 0.0  ;;  %v6313_v3 = vadd.f32 %v809_v1, %v6225_v12 }
 0x188   : > { %v949_v6 = vpop.f32.mrf.mxu1 }
 0x189   : > { %1294 = vrot.lane.b32.xlu1 %v1004_v45, %s7961_s20  ;;  %1354 = vrot.lane.b32.xlu0 %v1004_v45, %s7950_s27  ;;  %v1006_v2 = vsel %vm998_vm5, %v7904_v0, 0.0  ;;  %v7905_v4 = vmax.f32 %v6313_v3, 0.0  ;;  %v6334_v7 = vadd.f32 %v949_v6, %v6225_v12 }
 0x18a   : > { %v951_v14 = vpop.f32.mrf.mxu1 }
 0x18b   : > { %v1007_v5 = vsel %vm999_vm11, %v7905_v4, 0.0  ;;  %v7900_v8 = vmax.f32 %v6334_v7, 0.0  ;;  %v6355_v15 = vadd.f32 %v951_v14, %v6225_v12 }
 0x18d   : > { %1160 = vrot.lane.b32.xlu1 %v1004_v45, %s7962_s26  ;;  %1220 = vrot.lane.b32.xlu0 %v1004_v45, %s7948_s25  ;;  %v1010_v11 = vsel %vm1002_vm12, %v7900_v8, 0.0  ;;  %v7901_v17 = vmax.f32 %v6355_v15, 0.0 }
 0x18f   : > { %v1011_v20 = vsel %vm1003_vm10, %v7901_v17, 0.0 }
 0x191   : > { %1422 = vrot.lane.b32.xlu1 %v1008_v50, %s7960_s0  ;;  %1482 = vrot.lane.b32.xlu0 %v1008_v50, %s7947_s18 }
 0x195   : > { %1040 = vrot.lane.b32.xlu1 %v1004_v45, %s7963_s28  ;;  %1100 = vrot.lane.b32.xlu0 %v1004_v45, %s7949_s21 }
 0x199   : > { %1302 = vrot.lane.b32.xlu1 %v1008_v50, %s7961_s20  ;;  %1362 = vrot.lane.b32.xlu0 %v1008_v50, %s7950_s27 }
 0x19d   : > { %1476 = vrot.lane.b32.xlu1 %v1005_v55, %s7947_s18  ;;  %1228 = vrot.lane.b32.xlu0 %v1008_v50, %s7948_s25 }
 0x1a1   : > { %1416 = vrot.lane.b32.xlu1 %v1005_v55, %s7960_s0  ;;  %1168 = vrot.lane.b32.xlu0 %v1008_v50, %s7962_s26 }
 0x1a5   : > { %1296 = vrot.lane.b32.xlu1 %v1005_v55, %s7961_s20  ;;  %1108 = vrot.lane.b32.xlu0 %v1008_v50, %s7949_s21 }
 0x1a9   : > { %1222 = vrot.lane.b32.xlu1 %v1005_v55, %s7948_s25  ;;  %1048 = vrot.lane.b32.xlu0 %v1008_v50, %s7963_s28 }
 0x1ad   : > { %1102 = vrot.lane.b32.xlu1 %v1005_v55, %s7949_s21  ;;  %1356 = vrot.lane.b32.xlu0 %v1005_v55, %s7950_s27 }
 0x1b1   : > { %1230 = vrot.lane.b32.xlu1 %v1009_v60, %s7948_s25  ;;  %1162 = vrot.lane.b32.xlu0 %v1005_v55, %s7962_s26 }
 0x1b5   : > { %1170 = vrot.lane.b32.xlu1 %v1009_v60, %s7962_s26  ;;  %1042 = vrot.lane.b32.xlu0 %v1005_v55, %s7963_s28 }
 0x1b9   : > { %1110 = vrot.lane.b32.xlu1 %v1009_v60, %s7949_s21  ;;  %1484 = vrot.lane.b32.xlu0 %v1009_v60, %s7947_s18 }
 0x1bd   : > { %1478 = vrot.lane.b32.xlu1 %v1006_v2, %s7947_s18  ;;  %1424 = vrot.lane.b32.xlu0 %v1009_v60, %s7960_s0 }
 0x1c1   : > { %1358 = vrot.lane.b32.xlu1 %v1006_v2, %s7950_s27  ;;  %1364 = vrot.lane.b32.xlu0 %v1009_v60, %s7950_s27 }
 0x1c5   : > { %1480 = vrot.lane.b32.xlu1 %v1007_v5, %s7947_s18  ;;  %1304 = vrot.lane.b32.xlu0 %v1009_v60, %s7961_s20 }
 0x1c9   : > { %1360 = vrot.lane.b32.xlu1 %v1007_v5, %s7950_s27  ;;  %1418 = vrot.lane.b32.xlu0 %v1006_v2, %s7960_s0 }
 0x1cd   : > { %1226 = vrot.lane.b32.xlu1 %v1007_v5, %s7948_s25  ;;  %1298 = vrot.lane.b32.xlu0 %v1006_v2, %s7961_s20 }
 0x1d1   : > { %1166 = vrot.lane.b32.xlu1 %v1007_v5, %s7962_s26  ;;  %1224 = vrot.lane.b32.xlu0 %v1006_v2, %s7948_s25 }
 0x1d5   : > { %1106 = vrot.lane.b32.xlu1 %v1007_v5, %s7949_s21  ;;  %1164 = vrot.lane.b32.xlu0 %v1006_v2, %s7962_s26 }
 0x1d9   : > { %1046 = vrot.lane.b32.xlu1 %v1007_v5, %s7963_s28  ;;  %1104 = vrot.lane.b32.xlu0 %v1006_v2, %s7949_s21 }
 0x1dd   : > { %1486 = vrot.lane.b32.xlu1 %v1010_v11, %s7947_s18  ;;  %1044 = vrot.lane.b32.xlu0 %v1006_v2, %s7963_s28 }
 0x1e1   : > { %1426 = vrot.lane.b32.xlu1 %v1010_v11, %s7960_s0  ;;  %1420 = vrot.lane.b32.xlu0 %v1007_v5, %s7960_s0 }
 0x1e5   : > { %1366 = vrot.lane.b32.xlu1 %v1010_v11, %s7950_s27  ;;  %1300 = vrot.lane.b32.xlu0 %v1007_v5, %s7961_s20 }
 0x1e9   : > { %1306 = vrot.lane.b32.xlu1 %v1010_v11, %s7961_s20  ;;  %1232 = vrot.lane.b32.xlu0 %v1010_v11, %s7948_s25 }
 0x1ed   : > { %1050 = vrot.lane.b32.xlu1 %v1009_v60, %s7963_s28  ;;  %1488 = vrot.lane.b32.xlu0 %v1011_v20, %s7947_s18 }
 0x1f1   : > { %1310 = vrot.lane.b32.xlu1 %v7906_v10, %s7961_s20  ;;  %1428 = vrot.lane.b32.xlu0 %v1011_v20, %s7960_s0 }
 0x1f5   : > { %1234 = vrot.lane.b32.xlu1 %v1011_v20, %s7948_s25  ;;  %1368 = vrot.lane.b32.xlu0 %v1011_v20, %s7950_s27  ;;  %s7929_s27 = smov 58  }
 0x1f7   : > { %v1475_v24 = vpop.permute.xlu0 %1474  ;;  %v1415_v26 = vpop.permute.xlu1 %1414 }
 0x1f9   : > { %1174 = vrot.lane.b32.xlu1 %v1011_v20, %s7962_s26  ;;  %1308 = vrot.lane.b32.xlu0 %v1011_v20, %s7961_s20 }
 0x1fb   : > { %v1355_v28 = vpop.permute.xlu0 %1354  ;;  %v1295_v30 = vpop.permute.xlu1 %1294 }
 0x1fd   : > { %1114 = vrot.lane.b32.xlu1 %v1011_v20, %s7949_s21  ;;  %1172 = vrot.lane.b32.xlu0 %v1010_v11, %s7962_s26  ;;  %s7921_s26 = smov 2  }
 0x1ff   : > { %v6388_v31 = vpop.permute.xlu0 %1220  ;;  %v6390_v34 = vpop.permute.xlu1 %1160 }
 0x201   : > { %1054 = vrot.lane.b32.xlu1 %v1011_v20, %s7963_s28  ;;  %1112 = vrot.lane.b32.xlu0 %v1010_v11, %s7949_s21  ;;  %s7933_s21 = smov 66  }
 0x203   : > { %v6394_v37 = vpop.permute.xlu0 %1482  ;;  %v6396_v12 = vpop.permute.xlu1 %1422 }
 0x205   : > { %1052 = vrot.lane.b32.xlu0 %v1010_v11, %s7963_s28  ;;  %s7919_s28 = smov 60  }
 0x207   : > { %v6402_v45 = vpop.permute.xlu0 %1100  ;;  %v6404_v46 = vpop.permute.xlu1 %1040 }
 0x209   : > { %1592 = vperm.xlu0 %5852, %v1589_v42  }
 0x20b   : > { %v6406_v50 = vpop.permute.xlu0 %1362  ;;  %v6408_v51 = vpop.permute.xlu1 %1302 }
 0x20f   : > { %v6410_v55 = vpop.permute.xlu0 %1228  ;;  %v1477_v56 = vpop.permute.xlu1 %1476 }
 0x210   : > { %v1492_v44 = vsel %vm612_vm1, %v1475_v24, %v1477_v56 }
 0x213   : > { %v6412_v60 = vpop.permute.xlu0 %1168  ;;  %v1417_v61 = vpop.permute.xlu1 %1416 }
 0x217   : > { %v6414_v1 = vpop.permute.xlu0 %1108  ;;  %v1297_v2 = vpop.permute.xlu1 %1296 }
 0x21b   : > { %v6416_v5 = vpop.permute.xlu0 %1048  ;;  %v6418_v6 = vpop.permute.xlu1 %1222 }
 0x21f   : > { %v1357_v11 = vpop.permute.xlu0 %1356  ;;  %v6420_v14 = vpop.permute.xlu1 %1102 }
 0x223   : > { %v6422_v20 = vpop.permute.xlu0 %1162  ;;  %v6424_v42 = vpop.permute.xlu1 %1230 }
 0x227   : > { %v6426_v8 = vpop.permute.xlu0 %1042  ;;  %v6428_v17 = vpop.permute.xlu1 %1170 }
 0x22b   : > { %v6430_v49 = vpop.permute.xlu0 %1484  ;;  %v6432_v59 = vpop.permute.xlu1 %1110 }
 0x22f   : > { %v6434_v0 = vpop.permute.xlu0 %1424  ;;  %v1479_v4 = vpop.permute.xlu1 %1478 }
 0x230   : > { %v1493_v10 = vsel %vm612_vm1, %v1477_v56, %v1479_v4  ;;  %v1372_v56 = vsel %vm578_vm8, %v1355_v28, %v1357_v11  ;;  %v1237_v28 = vsel %vm7935_vm6, %v6388_v31, %v6418_v6 }
 0x231   : > { %1613 = vmatprep.subr.mxu0 %v1493_v10  ;;  %v1432_v10 = vsel %vm595_vm9, %v1415_v26, %v1417_v61 }
 0x232   : > { %1614 = vmatpush1.msra.mxu0 %v1492_v44 }
 0x233   : > { %v6438_v54 = vpop.permute.xlu0 %1364  ;;  %v6440_v40 = vpop.permute.xlu1 %1358 }
 0x234   : > { %v1373_v44 = vsel %vm578_vm8, %v1357_v11, %v6440_v40  ;;  %v7966_v11 = vmax.f32 %v6230_v43, 0.0  ;;  %v1117_v43 = vsel %vm506_vm3, %v6402_v45, %v6420_v14 }
 0x237   : > { %v6442_v29 = vpop.permute.xlu0 %1304  ;;  %v1481_v38 = vpop.permute.xlu1 %1480 }
 0x238   : > { %v1494_v25 = vsel %vm612_vm1, %v1479_v4, %v1481_v38  ;;  %v1495_v35 = vsel %vm612_vm1, %v1481_v38, %v6394_v37 }
 0x239   : > { %1684 = vmatprep.subr.mxu1 %v1495_v35 }
 0x23a   : > { %1685 = vmatpush1.msra.mxu1 %v1494_v25  ;;  %v1312_v25 = vsel %vm561_vm7, %v1295_v30, %v1297_v2  ;;  %v1236_v30 = vsel %vm7935_vm6, %v6365_v18, %v6388_v31  ;;  %v1116_v18 = vsel %vm506_vm3, %v6378_v21, %v6402_v45  ;;  %v1057_v31 = vsel %vm490_vm2, %v6404_v46, %v6426_v8 }
 0x23b   : > { %v1419_v32 = vpop.permute.xlu0 %1418  ;;  %v1361_v27 = vpop.permute.xlu1 %1360  ;;  %v7968_v21 = vmov 0.0  }
 0x23c   : > { %v1433_v24 = vsel %vm595_vm9, %v1417_v61, %v1419_v32  ;;  %v7965_v61 = vmax.f32 %v6258_v52, 0.0  ;;  %v1177_v52 = vsel %vm523_vm4, %v6390_v34, %v6422_v20 }
 0x23d   : > { %1615 = vmatprep.subr.mxu0 %v1433_v24 }
 0x23e   : > { %1616 = vmatpush1.msra.mxu0 %v1432_v10 }
 0x23f   : > { %v1299_v23 = vpop.permute.xlu0 %1298  ;;  %v6452_v4 = vpop.permute.xlu1 %1226  ;;  %1617 = vmatprep.subr.mxu0 %v1373_v44 }
 0x240   : > { %v1313_v35 = vsel %vm561_vm7, %v1297_v2, %v1299_v23  ;;  %1618 = vmatpush1.msra.mxu0 %v1372_v56  ;;  %v1176_v2 = vsel %vm523_vm4, %v6342_v9, %v6390_v34  ;;  %v6494_v9 = vld [vmem:[%s7967_s3] sm:$0xff]  ;;  %v1056_v34 = vsel %vm490_vm2, %v6350_v13, %v6404_v46  ;;  %v1496_v13 = vsel %vm612_vm1, %v6394_v37, %v6430_v49  ;;  %s456_s3 = sand.u32 1, %s5930_s30  }
 0x241   : > { %1619 = vmatprep.subr.mxu0 %v1313_v35 }
 0x242   : > { %1620 = vmatpush1.msra.mxu0 %v1312_v25 }
 0x243   : > { %v6456_v38 = vpop.permute.xlu0 %1224  ;;  %v6458_v26 = vpop.permute.xlu1 %1166  ;;  %5854 = vmatprep.subr.msk.mxu0 %vm7918_vm15, %v7965_v61  ;;  %vm7937_vm15 = vcmask 588800  }
 0x244   : > { %5855 = vmatpush1.msk.msra.mxu0 %vm996_vm13, %v7966_v11 }
 0x245   : > { %1623 = vmatprep.subr.mxu0 %v1237_v28 }
 0x246   : > { %1624 = vmatpush1.msra.mxu0 %v1236_v30 }
 0x247   : > { %v1165_v24 = vpop.permute.xlu0 %1164  ;;  %v6480_v10 = vpop.permute.xlu1 %1106  ;;  %1625 = vmatprep.subr.mxu0 %v1177_v52  ;;  %v1436_v52 = vsel %vm595_vm9, %v6396_v12, %v6434_v0 }
 0x248   : > { %1626 = vmatpush1.msra.mxu0 %v1176_v2 }
 0x249   : > { %1627 = vmatprep.subr.mxu0 %v1117_v43 }
 0x24a   : > { %1628 = vmatpush1.msra.mxu0 %v1116_v18 }
 0x24b   : > { %v1105_v44 = vpop.permute.xlu0 %1104  ;;  %v6499_v56 = vpop.permute.xlu1 %1046  ;;  %1629 = vmatprep.subr.mxu0 %v1057_v31  ;;  %v1239_v31 = vsel %vm7935_vm6, %v6456_v38, %v6452_v4 }
 0x24c   : > { %1630 = vmatpush1.msra.mxu0 %v1056_v34  ;;  %v1238_v34 = vsel %vm7935_vm6, %v6418_v6, %v6456_v38  ;;  %v1119_v6 = vsel %vm506_vm3, %v1105_v44, %v6480_v10  ;;  %v7972_v38 = vmax.f32 %v6241_v47, 0.0  ;;  %v1180_v47 = vsel %vm523_vm4, %v6458_v26, %v6412_v60 }
 0x24d   : > { %5360 = vmatmul.mubr.msk.f32.vlgmr.msra.gmra.mxu0 %vm7937_vm15, %v6494_v9 }
 0x24e   : > { %1805 = vmatprep.mubr.f32.mxu0 %v7968_v21 }
 0x24f   : > { %v1045_v45 = vpop.permute.xlu0 %1044  ;;  %v6504_v35 = vpop.permute.xlu1 %1486 }
 0x250   : > { %v1497_v25 = vsel %vm612_vm1, %v6430_v49, %v6504_v35  ;;  %v1375_v49 = vsel %vm578_vm8, %v1361_v27, %v6406_v50 }
 0x251   : > { %1755 = vmatprep.subr.mxu0 %v1497_v25  ;;  %v1179_v25 = vsel %vm523_vm4, %v1165_v24, %v6458_v26 }
 0x252   : > { %1756 = vmatpush1.msra.mxu0 %v1496_v13 }
 0x253   : > { %v1421_v46 = vpop.permute.xlu0 %1420  ;;  %v6512_v61 = vpop.permute.xlu1 %1426 }
 0x254   : > { %v1434_v28 = vsel %vm595_vm9, %v1419_v32, %v1421_v46  ;;  %v1435_v11 = vsel %vm595_vm9, %v1421_v46, %v6396_v12  ;;  %v1437_v30 = vsel %vm595_vm9, %v6434_v0, %v6512_v61  ;;  %v1374_v32 = vsel %vm578_vm8, %v6440_v40, %v1361_v27 }
 0x255   : > { %1686 = vmatprep.subr.mxu1 %v1435_v11  ;;  %1757 = vmatprep.subr.mxu0 %v1437_v30  ;;  %v1376_v12 = vsel %vm578_vm8, %v6406_v50, %v6438_v54  ;;  %v7970_v50 = vmax.f32 %v6296_v62, 0.0  ;;  %v1178_v62 = vsel %vm523_vm4, %v6422_v20, %v1165_v24  ;;  %v1118_v20 = vsel %vm506_vm3, %v6420_v14, %v1105_v44 }
 0x256   : > { %1687 = vmatpush1.msra.mxu1 %v1434_v28  ;;  %1758 = vmatpush1.msra.mxu0 %v1436_v52  ;;  %v1181_v24 = vsel %vm523_vm4, %v6412_v60, %v6428_v17  ;;  %v1059_v28 = vsel %vm490_vm2, %v1045_v45, %v6499_v56  ;;  %v1121_v44 = vsel %vm506_vm3, %v6414_v1, %v6432_v59 }
 0x257   : > { %v1301_v37 = vpop.permute.xlu0 %1300  ;;  %v6527_v2 = vpop.permute.xlu1 %1366  ;;  %1688 = vmatprep.subr.mxu1 %v1375_v49  ;;  %v1120_v11 = vsel %vm506_vm3, %v6480_v10, %v6414_v1  ;;  %v1060_v1 = vsel %vm490_vm2, %v6499_v56, %v6416_v5  ;;  %v7973_v49 = vmax.f32 %v6355_v15, 0.0 }
 0x258   : > { %v1314_v43 = vsel %vm561_vm7, %v1299_v23, %v1301_v37  ;;  %v1315_v18 = vsel %vm561_vm7, %v1301_v37, %v6408_v51  ;;  %v1377_v0 = vsel %vm578_vm8, %v6438_v54, %v6527_v2  ;;  %1689 = vmatpush1.msra.mxu1 %v1374_v32  ;;  %v7969_v23 = vmax.f32 %v6313_v3, 0.0 }
 0x259   : > { %1690 = vmatprep.subr.mxu1 %v1315_v18  ;;  %1759 = vmatprep.subr.mxu0 %v1377_v0  ;;  %v1316_v3 = vsel %vm561_vm7, %v6408_v51, %v6442_v29  ;;  %v1241_v51 = vsel %vm7935_vm6, %v6410_v55, %v6424_v42  ;;  %v7974_v37 = vmax.f32 %v6334_v7, 0.0 }
 0x25a   : > { %1691 = vmatpush1.msra.mxu1 %v1314_v43  ;;  %1760 = vmatpush1.msra.mxu0 %v1376_v12 }
 0x25b   : > { %v6538_v27 = vpop.permute.xlu0 %1232  ;;  %v6540_v40 = vpop.permute.xlu1 %1306  ;;  %5856 = vmatprep.subr.msk.mxu1 %vm999_vm11, %v7969_v23 }
 0x25c   : > { %v1317_v54 = vsel %vm561_vm7, %v6442_v29, %v6540_v40  ;;  %5857 = vmatpush1.msk.msra.mxu1 %vm998_vm5, %v7970_v50  ;;  %v7971_v29 = vmax.f32 %v6279_v57, 0.0  ;;  %v1240_v57 = vsel %vm7935_vm6, %v6452_v4, %v6410_v55  ;;  %v1058_v55 = vsel %vm490_vm2, %v6426_v8, %v1045_v45 }
 0x25d   : > { %1694 = vmatprep.subr.mxu1 %v1239_v31  ;;  %1761 = vmatprep.subr.mxu0 %v1317_v54 }
 0x25e   : > { %1695 = vmatpush1.msra.mxu1 %v1238_v34  ;;  %1762 = vmatpush1.msra.mxu0 %v1316_v3 }
 0x25f   : > { %v1489_v13 = vpop.permute.xlu0 %1488  ;;  %v6566_v46 = vpop.permute.xlu1 %1050  ;;  %1696 = vmatprep.subr.mxu1 %v1179_v25  ;;  %5858 = vmatprep.subr.msk.mxu0 %vm1001_vm0, %v7971_v29 }
 0x260   : > { %1697 = vmatpush1.msra.mxu1 %v1178_v62  ;;  %5859 = vmatpush1.msk.msra.mxu0 %vm1000_vm14, %v7972_v38  ;;  %v1499_v60 = vsel %vm612_vm1, %v1489_v13, %v6359_v16  ;;  %v1498_v8 = vsel %vm612_vm1, %v6504_v35, %v1489_v13  ;;  %v1061_v26 = vsel %vm490_vm2, %v6416_v5, %v6566_v46  ;;  %vm7975_vm1 = vcmp.eq.s32.totalorder %v6260_v53, 1 }
 0x261   : > { %1698 = vmatprep.subr.mxu1 %v1119_v6  ;;  %1765 = vmatprep.subr.mxu0 %v1241_v51 }
 0x262   : > { %1699 = vmatpush1.msra.mxu1 %v1118_v20  ;;  %1766 = vmatpush1.msra.mxu0 %v1240_v57 }
 0x263   : > { %v1429_v4 = vpop.permute.xlu0 %1428  ;;  %v1311_v14 = vpop.permute.xlu1 %1310  ;;  %1700 = vmatprep.subr.mxu1 %v1059_v28  ;;  %1767 = vmatprep.subr.mxu0 %v1181_v24 }
 0x264   : > { %1701 = vmatpush1.msra.mxu1 %v1058_v55  ;;  %1768 = vmatpush1.msra.mxu0 %v1180_v47  ;;  %v1439_v16 = vsel %vm595_vm9, %v1429_v4, %v6367_v19  ;;  %v1438_v35 = vsel %vm595_vm9, %v6512_v61, %v1429_v4 }
 0x265   : > { %5361 = vmatmul.mubr.msk.f32.vlgmr.msra.gmra.mxu1 %vm7937_vm15, %v6494_v9  ;;  %1769 = vmatprep.subr.mxu0 %v1121_v44 }
 0x266   : > { %1826 = vmatprep.subr.mxu1 %v1499_v60  ;;  %1770 = vmatpush1.msra.mxu0 %v1120_v11 }
 0x267   : > { %v1369_v10 = vpop.permute.xlu0 %1368  ;;  %v1235_v45 = vpop.permute.xlu1 %1234  ;;  %1827 = vmatpush1.msra.mxu1 %v1498_v8  ;;  %1771 = vmatprep.subr.mxu0 %v1061_v26 }
 0x268   : > { %v1378_v30 = vsel %vm578_vm8, %v6527_v2, %v1369_v10  ;;  %v1379_v52 = vsel %vm578_vm8, %v1369_v10, %v6380_v22  ;;  %1828 = vmatprep.subr.mxu1 %v1439_v16  ;;  %1772 = vmatpush1.msra.mxu0 %v1060_v1  ;;  %v1243_v32 = vsel %vm7935_vm6, %v6538_v27, %v1235_v45 }
 0x269   : > { %1829 = vmatpush1.msra.mxu1 %v1438_v35  ;;  %5362 = vmatmul.mubr.msk.f32.vlgmr.msra.gmra.mxu0 %vm7937_vm15, %v6494_v9  ;;  %v1242_v2 = vsel %vm7935_vm6, %v6424_v42, %v6538_v27  ;;  %vm2191_vm6 = vcmask 490496  }
 0x26a   : > { %1830 = vmatprep.subr.mxu1 %v1379_v52  ;;  %1876 = vmatprep.mubr.f32.mxu1 %v7968_v21 }
 0x26b   : > { %v1309_v19 = vpop.permute.xlu0 %1308  ;;  %v1175_v5 = vpop.permute.xlu1 %1174  ;;  %1831 = vmatpush1.msra.mxu1 %v1378_v30  ;;  %2744 = vmatprep.mubr.f32.mxu0 %v7968_v21 }
 0x26c   : > { %v1318_v56 = vsel %vm561_vm7, %v6540_v40, %v1309_v19  ;;  %v1319_v61 = vsel %vm561_vm7, %v1309_v19, %v1311_v14 }
 0x26d   : > { %1832 = vmatprep.subr.mxu1 %v1319_v61 }
 0x26e   : > { %1833 = vmatpush1.msra.mxu1 %v1318_v56 }
 0x26f   : > { %v1173_v22 = vpop.permute.xlu0 %1172  ;;  %5860 = vmatprep.subr.msk.mxu1 %vm1003_vm10, %v7973_v49  ;;  %v1115_v43 = vpop.permute.xlu1 %1114 }
 0x270   : > { %5861 = vmatpush1.msk.msra.mxu1 %vm1002_vm12, %v7974_v37  ;;  %v1183_v18 = vsel %vm523_vm4, %v1173_v22, %v1175_v5  ;;  %v1182_v15 = vsel %vm523_vm4, %v6428_v17, %v1173_v22 }
 0x271   : > { %1836 = vmatprep.subr.mxu1 %v1243_v32 }
 0x272   : > { %1837 = vmatpush1.msra.mxu1 %v1242_v2 }
 0x273   : > { %v1113_v0 = vpop.permute.xlu0 %1112  ;;  %1838 = vmatprep.subr.mxu1 %v1183_v18  ;;  %v1055_v40 = vpop.permute.xlu1 %1054 }
 0x274   : > { %v1122_v7 = vsel %vm506_vm3, %v6432_v59, %v1113_v0  ;;  %v1123_v12 = vsel %vm506_vm3, %v1113_v0, %v1115_v43  ;;  %1839 = vmatpush1.msra.mxu1 %v1182_v15 }
 0x275   : > { %1840 = vmatprep.subr.mxu1 %v1123_v12 }
 0x276   : > { %1841 = vmatpush1.msra.mxu1 %v1122_v7 }
 0x277   : > { %v1053_v42 = vpop.permute.xlu0 %1052 }
 0x278   : > { %v1062_v27 = vsel %vm490_vm2, %v6566_v46, %v1053_v42  ;;  %v1063_v23 = vsel %vm490_vm2, %v1053_v42, %v1055_v40 }
 0x279   : > { %1842 = vmatprep.subr.mxu1 %v1063_v23 }
 0x27a   : > { %1843 = vmatpush1.msra.mxu1 %v1062_v27 }
 0x27b   : > { %5363 = vmatmul.mubr.msk.f32.vlgmr.msra.gmra.mxu1 %vm7937_vm15, %v6494_v9 }
 0x27c   : > { %2815 = vmatprep.mubr.f32.mxu1 %v7968_v21 }
 0x284   : > { %v1593_v59 = vpop.permute.xlu0 %1592 }
 0x30d   : > { %v1665_v17 = vpop.f32.mrf.mxu0 }
 0x30e   : > { %v1666_v31 = vadd.f32 %v1665_v17, %v1593_v59 }
 0x30f   : > { %v1667_v54 = vpop.f32.mrf.mxu0 }
 0x310   : > { %v1883_v50 = vmax.f32 %v1666_v31, 0.0  ;;  %v1668_v3 = vadd.f32 %v1667_v54, %v1593_v59 }
 0x312   : > { %v1884_v34 = vmax.f32 %v1668_v3, 0.0  ;;  %v1891_v25 = vsel %vm996_vm13, %v1883_v50, 0.0 }
 0x313   : > { %1933 = vrot.lane.b32.xlu1 %v1891_v25, %s7961_s20 }
 0x314   : > { %v6659_v62 = vsel %vm7975_vm1, %v1884_v34, 0.0  ;;  %vm2252_vm1 = vcmask 474112  }
 0x317   : > { %1935 = vrot.lane.b32.xlu1 %v6659_v62, %s7961_s20 }
 0x325   : > { %v1736_v9 = vpop.f32.mrf.mxu1 }
 0x326   : > { %v1737_v13 = vadd.f32 %v1736_v9, %v1593_v59 }
 0x327   : > { %v1738_v46 = vpop.f32.mrf.mxu1 }
 0x328   : > { %v1885_v29 = vmax.f32 %v1737_v13, 0.0  ;;  %v1739_v51 = vadd.f32 %v1738_v46, %v1593_v59 }
 0x329   : > { %v1807_v36 = vpop.f32.mrf.mxu0 }
 0x32a   : > { %v1886_v6 = vmax.f32 %v1739_v51, 0.0  ;;  %v1893_v38 = vsel %vm998_vm5, %v1885_v29, 0.0  ;;  %v1808_v44 = vadd.f32 %v1807_v36, %v1593_v59  ;;  %v7985_v36 = vld [vmem:[#allocation18_spill] sm:$0xff]  ;;  %vm2451_vm5 = vcmask 572416  }
 0x32b   : > { %1937 = vrot.lane.b32.xlu0 %v1893_v38, %s7961_s20  ;;  %v1809_v60 = vpop.f32.mrf.mxu0 }
 0x32c   : > { %v1894_v41 = vsel %vm999_vm11, %v1886_v6, 0.0  ;;  %v1887_v1 = vmax.f32 %v1808_v44, 0.0  ;;  %v1810_v16 = vadd.f32 %v1809_v60, %v1593_v59  ;;  %v7978_v6 = vld [vmem:[#allocation15_spill] sm:$0xff]  ;;  %v7986_v44 = vld [vmem:[#allocation14_spill] sm:$0xff]  ;;  %vm2390_vm11 = vcmask 1031168  }
 0x32d   : > { %1939 = vrot.lane.b32.xlu1 %v1894_v41, %s7961_s20  ;;  %vm7936_vm3 = vcmp.eq.s32.totalorder %v7978_v6, 1  ;;  %vm2074_vm8 = vcmp.eq.s32.totalorder %v7986_v44, 1 }
 0x32e   : > { %v1888_v10 = vmax.f32 %v1810_v16, 0.0  ;;  %v1895_v45 = vsel %vm1000_vm14, %v1887_v1, 0.0  ;;  %v7987_v16 = vld [vmem:[#allocation19_spill] sm:$0xff] }
 0x330   : > { %v1896_v35 = vsel %vm1001_vm0, %v1888_v10, 0.0  ;;  %vm2512_vm0 = vcmask 556032  }
 0x331   : > { %1949 = vrot.lane.b32.xlu1 %v7968_v21, %s7961_s20 }
 0x33b   : > { %v1878_v53 = vpop.f32.mrf.mxu1 }
 0x33c   : > { %v1879_v57 = vadd.f32 %v1878_v53, %v1593_v59  ;;  %v7984_v53 = vld [vmem:[#allocation17_spill] sm:$0xff] }
 0x33d   : > { %v1880_v30 = vpop.f32.mrf.mxu1  ;;  %vm2072_vm4 = vcmp.eq.s32.totalorder %v7984_v53, 1 }
 0x33e   : > { %v1889_v20 = vmax.f32 %v1879_v57, 0.0  ;;  %v1881_v52 = vadd.f32 %v1880_v30, %v1593_v59  ;;  %v7988_v30 = vld [vmem:[#allocation16_spill] sm:$0xff] }
 0x33f   : > { %vm2075_vm13 = vcmp.eq.s32.totalorder %v7988_v30, 1 }
 0x340   : > { %v6673_v24 = vsel %vm1002_vm12, %v1889_v20, 0.0  ;;  %v1890_v19 = vmax.f32 %v1881_v52, 0.0  ;;  %vm2313_vm12 = vcmask 15360  }
 0x341   : > { %1945 = vrot.lane.b32.xlu1 %v6673_v24, %s7961_s20 }
 0x342   : > { %v1898_v48 = vsel %vm1003_vm10, %v1890_v19, 0.0  ;;  %vm2076_vm10 = vcmp.eq.s32.totalorder %v7987_v16, 1 }
 0x345   : > { %2295 = vrot.lane.b32.xlu1 %v7968_v21, %s7921_s26  ;;  %s7927_s26 = smov 70  }
 0x349   : > { %2173 = vrot.lane.b32.xlu1 %v7968_v21, %s7919_s28  ;;  %s7925_s28 = smov 68  }
 0x385   : > { %v1934_v33 = vpop.permute.xlu1 %1933 }
 0x389   : > { %v1936_v63 = vpop.permute.xlu1 %1935 }
 0x38a   : > { %v1951_v28 = vsel %vm561_vm7, %v1934_v33, %v1936_v63 }
 0x38b   : > { %v6682_v47 = vmax.f32 %v1891_v25, %v1951_v28  ;;  %v7976_v25 = vld [vmem:[#allocation13_spill] sm:$0xff] }
 0x38c   : > { %vm2070_vm2 = vcmp.eq.s32.totalorder %v7976_v25, 1 }
 0x38d   : > { %1994 = vrot.lane.b32.xlu1 %v6682_v47, %s7960_s0 }
 0x39d   : > { %v1938_v55 = vpop.permute.xlu0 %1937 }
 0x39e   : > { %v1952_v58 = vsel %vm561_vm7, %v1936_v63, %v1938_v55 }
 0x39f   : > { %v1940_v4 = vpop.permute.xlu1 %1939  ;;  %v1968_v39 = vmax.f32 %v6659_v62, %v1952_v58  ;;  %v7989_v58 = vld [vmem:[#allocation20_spill] sm:$0xff] }
 0x3a0   : > { %v1953_v14 = vsel %vm561_vm7, %v1938_v55, %v1940_v4  ;;  %vm2077_vm14 = vcmp.eq.s32.totalorder %v7989_v58, 1 }
 0x3a1   : > { %v6687_v11 = vmax.f32 %v1893_v38, %v1953_v14 }
 0x3a3   : > { %1998 = vrot.lane.b32.xlu1 %v6687_v11, %s7960_s0  ;;  %v1950_v8 = vpop.permute.xlu1 %1949 }
 0x3a4   : > { %v1984_v26 = vmax.f32 %v1950_v8, 0.0 }
 0x3a6   : > { %2010 = vrot.lane.b32.xlu0 %v1984_v26, %s7960_s0 }
 0x3aa   : > { %1941 = vrot.lane.b32.xlu0 %v1895_v45, %s7961_s20 }
 0x3ae   : > { %1943 = vrot.lane.b32.xlu0 %v1896_v35, %s7961_s20 }
 0x3b2   : > { %2234 = vrot.lane.b32.xlu0 %v7968_v21, %s7929_s27 }
 0x3b3   : > { %v1946_v49 = vpop.permute.xlu1 %1945 }
 0x3b6   : > { %2112 = vrot.lane.b32.xlu0 %v7968_v21, %s7923_s1  ;;  %s7931_s1 = smov 126  }
 0x3b7   : > { %v6744_v59 = vpop.permute.xlu1 %2295 }
 0x3ba   : > { %1947 = vrot.lane.b32.xlu0 %v1898_v48, %s7961_s20  ;;  %s7979_s20 = smov 62  }
 0x3bb   : > { %v6750_v54 = vpop.permute.xlu1 %2173 }
 0x3be   : > { %2571 = vrot.lane.b32.xlu0 %v7968_v21, %s7933_s21 }
 0x3c2   : > { %2510 = vrot.lane.b32.xlu0 %v7968_v21, %s7925_s28 }
 0x3c6   : > { %2449 = vrot.lane.b32.xlu0 %v7968_v21, %s7927_s26 }
 0x3ca   : > { %2388 = vrot.lane.b32.xlu0 %v7968_v21, %s7931_s1 }
 0x3ce   : > { %1996 = vrot.lane.b32.xlu0 %v1968_v39, %s7960_s0 }
 0x3ff   : > { %v1995_v3 = vpop.permute.xlu1 %1994 }
 0x415   : > { %v1999_v46 = vpop.permute.xlu1 %1998 }
 0x418   : > { %v6716_v5 = vpop.permute.xlu0 %2010 }
 0x41c   : > { %v1942_v56 = vpop.permute.xlu0 %1941 }
 0x41d   : > { %v1954_v61 = vsel %vm561_vm7, %v1940_v4, %v1942_v56 }
 0x41e   : > { %v1970_v22 = vmax.f32 %v1894_v41, %v1954_v61 }
 0x420   : > { %2000 = vrot.lane.b32.xlu0 %v1970_v22, %s7960_s0  ;;  %v1944_v32 = vpop.permute.xlu0 %1943 }
 0x421   : > { %v1955_v37 = vsel %vm561_vm7, %v1942_v56, %v1944_v32  ;;  %v1956_v2 = vsel %vm561_vm7, %v1944_v32, %v1946_v49 }
 0x422   : > { %v1971_v43 = vmax.f32 %v1895_v45, %v1955_v37  ;;  %v6722_v18 = vmax.f32 %v1896_v35, %v1956_v2 }
 0x424   : > { %2002 = vrot.lane.b32.xlu0 %v1971_v43, %s7960_s0  ;;  %v6725_v15 = vpop.permute.xlu0 %2234  ;;  %2004 = vrot.lane.b32.xlu1 %v6722_v18, %s7960_s0 }
 0x428   : > { %v6729_v0 = vpop.permute.xlu0 %2112 }
 0x42c   : > { %v1948_v7 = vpop.permute.xlu0 %1947 }
 0x42d   : > { %v1957_v12 = vsel %vm561_vm7, %v1946_v49, %v1948_v7  ;;  %v1958_v40 = vsel %vm561_vm7, %v1948_v7, %v1950_v8  ;;  %vm2073_vm7 = vcmp.eq.s32.totalorder %v7985_v36, 1 }
 0x42e   : > { %v6734_v42 = vmax.f32 %v6673_v24, %v1957_v12  ;;  %v6736_v27 = vmax.f32 %v1898_v48, %v1958_v40  ;;  %v2671_v40 = vld [vmem:[%s7874_s6] sm:$0xff] }
 0x430   : > { %v6738_v23 = vpop.permute.xlu0 %2571  ;;  %2006 = vrot.lane.b32.xlu0 %v6734_v42, %s7960_s0  ;;  %2008 = vrot.lane.b32.xlu1 %v6736_v27, %s7960_s0  ;;  %s7977_s0 = smov 2  }
 0x434   : > { %v6746_v17 = vpop.permute.xlu0 %2510 }
 0x438   : > { %v6748_v31 = vpop.permute.xlu0 %2449 }
 0x43c   : > { %v6752_v50 = vpop.permute.xlu0 %2388 }
 0x440   : > { %v1997_v34 = vpop.permute.xlu0 %1996 }
 0x441   : > { %v2012_v62 = vsel %vm595_vm9, %v1995_v3, %v1997_v34  ;;  %v2013_v29 = vsel %vm595_vm9, %v1997_v34, %v1999_v46 }
 0x442   : > { %v6757_v9 = vmax.f32 %v6682_v47, %v2012_v62  ;;  %v6769_v51 = vmax.f32 %v1968_v39, %v2013_v29 }
 0x444   : > { %v2078_v13 = vsel %vm2070_vm2, %v6757_v9, 0.0  ;;  %v2079_v38 = vsel %vm7936_vm3, %v6769_v51, 0.0 }
 0x445   : > { %2494 = vrot.lane.b32.xlu0 %v2078_v13, %s7925_s28  ;;  %2555 = vrot.lane.b32.xlu1 %v2078_v13, %s7933_s21  ;;  %s7980_s28 = smov 60  }
 0x449   : > { %2372 = vrot.lane.b32.xlu0 %v2078_v13, %s7931_s1  ;;  %2433 = vrot.lane.b32.xlu1 %v2078_v13, %s7927_s26  ;;  %s7981_s26 = smov 68  }
 0x44d   : > { %2236 = vrot.lane.b32.xlu0 %v2078_v13, %s7929_s27  ;;  %2297 = vrot.lane.b32.xlu1 %v2078_v13, %s7977_s0  ;;  %s7982_s27 = smov 70  }
 0x451   : > { %2114 = vrot.lane.b32.xlu0 %v2078_v13, %s7979_s20  ;;  %2175 = vrot.lane.b32.xlu1 %v2078_v13, %s7980_s28 }
 0x455   : > { %2496 = vrot.lane.b32.xlu0 %v2079_v38, %s7981_s26  ;;  %2557 = vrot.lane.b32.xlu1 %v2079_v38, %s7933_s21 }
 0x459   : > { %2374 = vrot.lane.b32.xlu0 %v2079_v38, %s7931_s1  ;;  %2435 = vrot.lane.b32.xlu1 %v2079_v38, %s7982_s27 }
 0x45d   : > { %2299 = vrot.lane.b32.xlu0 %v2079_v38, %s7977_s0  ;;  %2238 = vrot.lane.b32.xlu1 %v2079_v38, %s7983_s2 }
 0x461   : > { %2177 = vrot.lane.b32.xlu0 %v2079_v38, %s7980_s28  ;;  %2116 = vrot.lane.b32.xlu1 %v2079_v38, %s7979_s20 }
 0x492   : > { %v2001_v41 = vpop.permute.xlu0 %2000 }
 0x493   : > { %v2014_v57 = vsel %vm595_vm9, %v1999_v46, %v2001_v41 }
 0x494   : > { %v6788_v20 = vmax.f32 %v6687_v11, %v2014_v57 }
 0x496   : > { %v2080_v24 = vsel %vm2072_vm4, %v6788_v20, 0.0  ;;  %v2003_v33 = vpop.permute.xlu0 %2002  ;;  %v2005_v28 = vpop.permute.xlu1 %2004 }
 0x497   : > { %v2015_v63 = vsel %vm595_vm9, %v2001_v41, %v2003_v33  ;;  %2559 = vrot.lane.b32.xlu0 %v2080_v24, %s7933_s21  ;;  %2498 = vrot.lane.b32.xlu1 %v2080_v24, %s7981_s26  ;;  %v2016_v55 = vsel %vm595_vm9, %v2003_v33, %v2005_v28 }
 0x498   : > { %v6796_v47 = vmax.f32 %v1970_v22, %v2015_v63  ;;  %v6805_v14 = vmax.f32 %v1971_v43, %v2016_v55 }
 0x49a   : > { %v2081_v4 = vsel %vm2073_vm7, %v6796_v47, 0.0  ;;  %v2082_v11 = vsel %vm2074_vm8, %v6805_v14, 0.0 }
 0x49b   : > { %2437 = vrot.lane.b32.xlu0 %v2080_v24, %s7982_s27  ;;  %2376 = vrot.lane.b32.xlu1 %v2080_v24, %s7931_s1 }
 0x49f   : > { %2561 = vrot.lane.b32.xlu0 %v2081_v4, %s7933_s21  ;;  %2301 = vrot.lane.b32.xlu1 %v2080_v24, %s7977_s0 }
 0x4a2   : > { %v2007_v60 = vpop.permute.xlu0 %2006  ;;  %v2009_v8 = vpop.permute.xlu1 %2008 }
 0x4a3   : > { %2240 = vrot.lane.b32.xlu1 %v2080_v24, %s7983_s2  ;;  %2502 = vrot.lane.b32.xlu0 %v2082_v11, %s7981_s26  ;;  %v2018_v26 = vsel %vm595_vm9, %v2007_v60, %v2009_v8  ;;  %v2017_v45 = vsel %vm595_vm9, %v2005_v28, %v2007_v60  ;;  %v2019_v19 = vsel %vm595_vm9, %v2009_v8, %v6716_v5  ;;  %vm2573_vm9 = vcmask 539648  }
 0x4a4   : > { %v6827_v1 = vmax.f32 %v6734_v42, %v2018_v26  ;;  %v6843_v35 = vmax.f32 %v6722_v18, %v2017_v45  ;;  %v6860_v48 = vmax.f32 %v6736_v27, %v2019_v19 }
 0x4a6   : > { %v2084_v10 = vsel %vm2076_vm10, %v6827_v1, 0.0  ;;  %v2083_v52 = vsel %vm2075_vm13, %v6843_v35, 0.0  ;;  %v2085_v61 = vsel %vm2077_vm14, %v6860_v48, 0.0 }
 0x4a7   : > { %2179 = vrot.lane.b32.xlu1 %v2080_v24, %s7980_s28  ;;  %2439 = vrot.lane.b32.xlu0 %v2081_v4, %s7982_s27 }
 0x4ab   : > { %2118 = vrot.lane.b32.xlu1 %v2080_v24, %s7979_s20  ;;  %2380 = vrot.lane.b32.xlu0 %v2082_v11, %s7931_s1 }
 0x4af   : > { %2303 = vrot.lane.b32.xlu0 %v2081_v4, %s7977_s0  ;;  %2563 = vrot.lane.b32.xlu1 %v2082_v11, %s7933_s21 }
 0x4b3   : > { %2242 = vrot.lane.b32.xlu0 %v2081_v4, %s7983_s2  ;;  %2500 = vrot.lane.b32.xlu1 %v2081_v4, %s7981_s26 }
 0x4b7   : > { %2181 = vrot.lane.b32.xlu0 %v2081_v4, %s7980_s28  ;;  %2441 = vrot.lane.b32.xlu1 %v2082_v11, %s7982_s27  ;;  %v2495_v39 = vpop.permute.xlu0 %2494  ;;  %v2556_v56 = vpop.permute.xlu1 %2555 }
 0x4bb   : > { %2120 = vrot.lane.b32.xlu0 %v2081_v4, %s7979_s20  ;;  %2378 = vrot.lane.b32.xlu1 %v2081_v4, %s7931_s1  ;;  %v2373_v5 = vpop.permute.xlu0 %2372  ;;  %v2434_v22 = vpop.permute.xlu1 %2433 }
 0x4bf   : > { %2305 = vrot.lane.b32.xlu1 %v2082_v11, %s7977_s0  ;;  %2567 = vrot.lane.b32.xlu0 %v2084_v10, %s7933_s21  ;;  %v6872_v49 = vpop.permute.xlu0 %2236  ;;  %v2298_v32 = vpop.permute.xlu1 %2297 }
 0x4c0   : > { %v2314_v8 = vsel %vm2313_vm12, %v6744_v59, %v2298_v32  ;;  %v2253_v45 = vsel %vm2252_vm1, %v6725_v15, %v6872_v49 }
 0x4c3   : > { %2244 = vrot.lane.b32.xlu1 %v2082_v11, %s7983_s2  ;;  %2506 = vrot.lane.b32.xlu0 %v2084_v10, %s7981_s26  ;;  %v6878_v37 = vpop.permute.xlu0 %2114  ;;  %v6880_v2 = vpop.permute.xlu1 %2175 }
 0x4c7   : > { %2183 = vrot.lane.b32.xlu1 %v2082_v11, %s7980_s28  ;;  %2445 = vrot.lane.b32.xlu0 %v2084_v10, %s7982_s27  ;;  %v2497_v43 = vpop.permute.xlu0 %2496  ;;  %v2558_v18 = vpop.permute.xlu1 %2557 }
 0x4c8   : > { %v2574_v29 = vsel %vm2573_vm9, %v2556_v56, %v2558_v18  ;;  %v2513_v41 = vsel %vm2512_vm0, %v2495_v39, %v2497_v43  ;;  %v6965_v39 = vld [vmem:[%s7873_s5] sm:$0xff] }
 0x4cb   : > { %2122 = vrot.lane.b32.xlu1 %v2082_v11, %s7979_s20  ;;  %2384 = vrot.lane.b32.xlu0 %v2084_v10, %s7931_s1  ;;  %v2375_v7 = vpop.permute.xlu0 %2374  ;;  %v2436_v12 = vpop.permute.xlu1 %2435 }
 0x4cc   : > { %v2452_v63 = vsel %vm2451_vm5, %v2434_v22, %v2436_v12  ;;  %v2391_v55 = vsel %vm2390_vm11, %v2373_v5, %v2375_v7 }
 0x4cf   : > { %2565 = vrot.lane.b32.xlu1 %v2083_v52, %s7933_s21  ;;  %2307 = vrot.lane.b32.xlu0 %v2083_v52, %s7977_s0  ;;  %v6893_v42 = vpop.permute.xlu0 %2299  ;;  %v6895_v27 = vpop.permute.xlu1 %2238 }
 0x4d0   : > { %v2315_v60 = vsel %vm2313_vm12, %v2298_v32, %v6893_v42 }
 0x4d3   : > { %2504 = vrot.lane.b32.xlu1 %v2083_v52, %s7981_s26  ;;  %2246 = vrot.lane.b32.xlu0 %v2083_v52, %s7983_s2  ;;  %v6899_v3 = vpop.permute.xlu0 %2177  ;;  %v6901_v34 = vpop.permute.xlu1 %2116 }
 0x4d4   : > { %v2193_v59 = vsel %vm2191_vm6, %v6880_v2, %v6899_v3 }
 0x4d7   : > { %2443 = vrot.lane.b32.xlu1 %v2083_v52, %s7982_s27  ;;  %2185 = vrot.lane.b32.xlu0 %v2083_v52, %s7980_s28 }
 0x4db   : > { %2382 = vrot.lane.b32.xlu1 %v2083_v52, %s7931_s1  ;;  %2124 = vrot.lane.b32.xlu0 %v2083_v52, %s7979_s20 }
 0x4df   : > { %2569 = vrot.lane.b32.xlu1 %v2085_v61, %s7933_s21  ;;  %2311 = vrot.lane.b32.xlu0 %v2085_v61, %s7977_s0  ;;  %s7991_s21 = smov 126  }
 0x4e3   : > { %2508 = vrot.lane.b32.xlu1 %v2085_v61, %s7981_s26  ;;  %2250 = vrot.lane.b32.xlu0 %v2085_v61, %s7983_s2 }
 0x4e7   : > { %2447 = vrot.lane.b32.xlu1 %v2085_v61, %s7982_s27  ;;  %2189 = vrot.lane.b32.xlu0 %v2085_v61, %s7980_s28 }
 0x4eb   : > { %2386 = vrot.lane.b32.xlu1 %v2085_v61, %s7931_s1  ;;  %2128 = vrot.lane.b32.xlu0 %v2085_v61, %s7979_s20  ;;  %s7990_s1 = smov 66  }
 0x4ef   : > { %2309 = vrot.lane.b32.xlu1 %v2084_v10, %s7977_s0  ;;  %3186 = vrot.lane.b32.xlu0 %v7968_v21, %s7977_s0 }
 0x4f3   : > { %2248 = vrot.lane.b32.xlu1 %v2084_v10, %s7983_s2  ;;  %3066 = vrot.lane.b32.xlu0 %v7968_v21, %s7980_s28 }
 0x4f7   : > { %2187 = vrot.lane.b32.xlu1 %v2084_v10, %s7980_s28 }
 0x4fb   : > { %2126 = vrot.lane.b32.xlu1 %v2084_v10, %s7979_s20 }
 0x4ff   : > { %2674 = vperm.xlu1 %5853, %v2671_v40  }
 0x503   : > { %3126 = vrot.lane.b32.xlu1 %v7968_v21, %s7983_s2 }
 0x507   : > { %3006 = vrot.lane.b32.xlu1 %v7968_v21, %s7979_s20 }
 0x509   : > { %v6905_v62 = vpop.permute.xlu0 %2559  ;;  %v6907_v13 = vpop.permute.xlu1 %2498 }
 0x50a   : > { %v2575_v46 = vsel %vm2573_vm9, %v2558_v18, %v6905_v62  ;;  %v2514_v38 = vsel %vm2512_vm0, %v2497_v43, %v6907_v13 }
 0x50b   : > { %2694 = vmatprep.subr.mxu0 %v2575_v46  ;;  %3458 = vrot.lane.b32.xlu1 %v7968_v21, %s7990_s1 }
 0x50c   : > { %2695 = vmatpush1.msra.mxu0 %v2574_v29 }
 0x50d   : > { %v6917_v57 = vpop.permute.xlu0 %2437  ;;  %v6919_v24 = vpop.permute.xlu1 %2376  ;;  %2696 = vmatprep.subr.mxu0 %v2514_v38 }
 0x50e   : > { %v2453_v33 = vsel %vm2451_vm5, %v2436_v12, %v6917_v57  ;;  %2697 = vmatpush1.msra.mxu0 %v2513_v41  ;;  %v2392_v28 = vsel %vm2390_vm11, %v2375_v7, %v6919_v24 }
 0x50f   : > { %2698 = vmatprep.subr.mxu0 %v2453_v33  ;;  %3398 = vrot.lane.b32.xlu1 %v7968_v21, %s7981_s26 }
 0x510   : > { %2699 = vmatpush1.msra.mxu0 %v2452_v63 }
 0x511   : > { %v2562_v4 = vpop.permute.xlu0 %2561  ;;  %v6929_v11 = vpop.permute.xlu1 %2301  ;;  %2700 = vmatprep.subr.mxu0 %v2392_v28 }
 0x512   : > { %2701 = vmatpush1.msra.mxu0 %v2391_v55  ;;  %v2576_v32 = vsel %vm2573_vm9, %v6905_v62, %v2562_v4 }
 0x513   : > { %5862 = vmatprep.subr.msk.mxu0 %vm7936_vm3, %v6769_v51  ;;  %3338 = vrot.lane.b32.xlu1 %v7968_v21, %s7982_s27  ;;  %v2254_v51 = vsel %vm2252_vm1, %v6872_v49, %v6895_v27  ;;  %vm2130_vm3 = vcmask 506880  }
 0x514   : > { %5863 = vmatpush1.msk.msra.mxu0 %vm2070_vm2, %v6757_v9  ;;  %v2192_v9 = vsel %vm2191_vm6, %v6750_v54, %v6880_v2  ;;  %v2132_v15 = vsel %vm2130_vm3, %v6878_v37, %v6901_v34  ;;  %v2131_v56 = vsel %vm2130_vm3, %v6729_v0, %v6878_v37 }
 0x515   : > { %v6943_v26 = vpop.permute.xlu0 %2502  ;;  %v2241_v10 = vpop.permute.xlu1 %2240  ;;  %2704 = vmatprep.subr.mxu0 %v2315_v60 }
 0x516   : > { %2705 = vmatpush1.msra.mxu0 %v2314_v8 }
 0x517   : > { %2706 = vmatprep.subr.mxu0 %v2254_v51  ;;  %3278 = vrot.lane.b32.xlu1 %v7968_v21, %s7991_s21 }
 0x518   : > { %2707 = vmatpush1.msra.mxu0 %v2253_v45 }
 0x519   : > { %v2440_v52 = vpop.permute.xlu0 %2439  ;;  %v2180_v19 = vpop.permute.xlu1 %2179  ;;  %2708 = vmatprep.subr.mxu0 %v2193_v59 }
 0x51a   : > { %2709 = vmatpush1.msra.mxu0 %v2192_v9  ;;  %v2454_v40 = vsel %vm2451_vm5, %v6917_v57, %v2440_v52 }
 0x51b   : > { %2710 = vmatprep.subr.mxu0 %v2132_v15 }
 0x51c   : > { %2711 = vmatpush1.msra.mxu0 %v2131_v56 }
 0x51d   : > { %v6970_v54 = vpop.permute.xlu0 %2380  ;;  %v2119_v61 = vpop.permute.xlu1 %2118  ;;  %5364 = vmatmul.mubr.msk.f32.vlgmr.msra.gmra.mxu0 %vm7937_vm15, %v6965_v39 }
 0x51e   : > { %2886 = vmatprep.mubr.f32.mxu0 %v7968_v21 }
 0x521   : > { %v6975_v5 = vpop.permute.xlu0 %2303  ;;  %v2564_v22 = vpop.permute.xlu1 %2563 }
 0x522   : > { %v2577_v49 = vsel %vm2573_vm9, %v2562_v4, %v2564_v22  ;;  %v2317_v57 = vsel %vm2313_vm12, %v6929_v11, %v6975_v5  ;;  %v2133_v4 = vsel %vm2130_vm3, %v6901_v34, %v2119_v61 }
 0x523   : > { %2765 = vmatprep.subr.mxu1 %v2577_v49 }
 0x524   : > { %2766 = vmatpush1.msra.mxu1 %v2576_v32 }
 0x525   : > { %v6980_v0 = vpop.permute.xlu0 %2242  ;;  %v2501_v37 = vpop.permute.xlu1 %2500 }
 0x526   : > { %v2515_v2 = vsel %vm2512_vm0, %v6907_v13, %v2501_v37  ;;  %v2516_v43 = vsel %vm2512_vm0, %v2501_v37, %v6943_v26  ;;  %v2256_v33 = vsel %vm2252_vm1, %v2241_v10, %v6980_v0 }
 0x527   : > { %2767 = vmatprep.subr.mxu1 %v2516_v43 }
 0x528   : > { %2768 = vmatpush1.msra.mxu1 %v2515_v2 }
 0x529   : > { %v6986_v18 = vpop.permute.xlu0 %2181  ;;  %v2442_v7 = vpop.permute.xlu1 %2441 }
 0x52a   : > { %v2455_v12 = vsel %vm2451_vm5, %v2440_v52, %v2442_v7  ;;  %v2195_v55 = vsel %vm2191_vm6, %v2180_v19, %v6986_v18 }
 0x52b   : > { %2769 = vmatprep.subr.mxu1 %v2455_v12 }
 0x52c   : > { %2770 = vmatpush1.msra.mxu1 %v2454_v40 }
 0x52d   : > { %v6991_v62 = vpop.permute.xlu0 %2120  ;;  %v2379_v46 = vpop.permute.xlu1 %2378 }
 0x52e   : > { %v2393_v13 = vsel %vm2390_vm11, %v6919_v24, %v2379_v46  ;;  %v2394_v29 = vsel %vm2390_vm11, %v2379_v46, %v6970_v54  ;;  %v2316_v24 = vsel %vm2313_vm12, %v6893_v42, %v6929_v11  ;;  %v2134_v42 = vsel %vm2130_vm3, %v2119_v61, %v6991_v62 }
 0x52f   : > { %2771 = vmatprep.subr.mxu1 %v2394_v29 }
 0x530   : > { %2772 = vmatpush1.msra.mxu1 %v2393_v13 }
 0x531   : > { %v2568_v38 = vpop.permute.xlu0 %2567  ;;  %v2306_v41 = vpop.permute.xlu1 %2305  ;;  %5864 = vmatprep.subr.msk.mxu1 %vm2073_vm7, %v6796_v47  ;;  %v2255_v47 = vsel %vm2252_vm1, %v6895_v27, %v2241_v10 }
 0x532   : > { %5865 = vmatpush1.msk.msra.mxu1 %vm2072_vm4, %v6788_v20  ;;  %v2194_v20 = vsel %vm2191_vm6, %v6899_v3, %v2180_v19 }
 0x533   : > { %2775 = vmatprep.subr.mxu1 %v2317_v57 }
 0x534   : > { %2776 = vmatpush1.msra.mxu1 %v2316_v24 }
 0x535   : > { %v2507_v63 = vpop.permute.xlu0 %2506  ;;  %v2245_v28 = vpop.permute.xlu1 %2244  ;;  %2777 = vmatprep.subr.mxu1 %v2256_v33 }
 0x536   : > { %2778 = vmatpush1.msra.mxu1 %v2255_v47 }
 0x537   : > { %2779 = vmatprep.subr.mxu1 %v2195_v55 }
 0x538   : > { %2780 = vmatpush1.msra.mxu1 %v2194_v20 }
 0x539   : > { %v2446_v11 = vpop.permute.xlu0 %2445  ;;  %v2184_v27 = vpop.permute.xlu1 %2183  ;;  %2781 = vmatprep.subr.mxu1 %v2134_v42 }
 0x53a   : > { %2782 = vmatpush1.msra.mxu1 %v2133_v4  ;;  %v2196_v46 = vsel %vm2191_vm6, %v6986_v18, %v2184_v27 }
 0x53b   : > { %5365 = vmatmul.mubr.msk.f32.vlgmr.msra.gmra.mxu1 %vm7937_vm15, %v6965_v39 }
 0x53c   : > { %2957 = vmatprep.mubr.f32.mxu1 %v7968_v21 }
 0x53d   : > { %v7024_v60 = vpop.permute.xlu0 %2384  ;;  %v2123_v3 = vpop.permute.xlu1 %2122 }
 0x541   : > { %v2566_v8 = vpop.permute.xlu1 %2565  ;;  %v7028_v45 = vpop.permute.xlu0 %2307 }
 0x542   : > { %v2578_v10 = vsel %vm2573_vm9, %v2564_v22, %v2566_v8  ;;  %v2579_v51 = vsel %vm2573_vm9, %v2566_v8, %v2568_v38  ;;  %v2319_v37 = vsel %vm2313_vm12, %v2306_v41, %v7028_v45 }
 0x543   : > { %2836 = vmatprep.subr.mxu0 %v2579_v51 }
 0x544   : > { %2837 = vmatpush1.msra.mxu0 %v2578_v10 }
 0x545   : > { %v2505_v34 = vpop.permute.xlu1 %2504  ;;  %v7033_v52 = vpop.permute.xlu0 %2246 }
 0x546   : > { %v2517_v59 = vsel %vm2512_vm0, %v6943_v26, %v2505_v34  ;;  %v2518_v9 = vsel %vm2512_vm0, %v2505_v34, %v2507_v63 }
 0x547   : > { %2838 = vmatprep.subr.mxu0 %v2518_v9 }
 0x548   : > { %2839 = vmatpush1.msra.mxu0 %v2517_v59 }
 0x549   : > { %v2444_v19 = vpop.permute.xlu1 %2443  ;;  %v2186_v49 = vpop.permute.xlu0 %2185 }
 0x54a   : > { %v2456_v15 = vsel %vm2451_vm5, %v2442_v7, %v2444_v19  ;;  %v2457_v56 = vsel %vm2451_vm5, %v2444_v19, %v2446_v11  ;;  %v2257_v7 = vsel %vm2252_vm1, %v6980_v0, %v2245_v28  ;;  %v2135_v0 = vsel %vm2130_vm3, %v6991_v62, %v2123_v3 }
 0x54b   : > { %2840 = vmatprep.subr.mxu0 %v2457_v56 }
 0x54c   : > { %2841 = vmatpush1.msra.mxu0 %v2456_v15 }
 0x54d   : > { %v2383_v61 = vpop.permute.xlu1 %2382  ;;  %v2125_v12 = vpop.permute.xlu0 %2124 }
 0x54e   : > { %v2395_v22 = vsel %vm2390_vm11, %v6970_v54, %v2383_v61  ;;  %v2396_v26 = vsel %vm2390_vm11, %v2383_v61, %v7024_v60  ;;  %v2318_v54 = vsel %vm2313_vm12, %v6975_v5, %v2306_v41  ;;  %v2136_v13 = vsel %vm2130_vm3, %v2123_v3, %v2125_v12 }
 0x54f   : > { %2842 = vmatprep.subr.mxu0 %v2396_v26 }
 0x550   : > { %2843 = vmatpush1.msra.mxu0 %v2395_v22 }
 0x551   : > { %v2570_v32 = vpop.permute.xlu1 %2569  ;;  %5866 = vmatprep.subr.msk.mxu0 %vm2075_vm13, %v6843_v35  ;;  %v2258_v35 = vsel %vm2252_vm1, %v2245_v28, %v7033_v52  ;;  %v2312_v41 = vpop.permute.xlu0 %2311 }
 0x552   : > { %v2580_v2 = vsel %vm2573_vm9, %v2568_v38, %v2570_v32  ;;  %v2581_v43 = vsel %vm2573_vm9, %v2570_v32, %v6738_v23  ;;  %5867 = vmatpush1.msk.msra.mxu0 %vm2074_vm8, %v6805_v14  ;;  %v2197_v23 = vsel %vm2191_vm6, %v2184_v27, %v2186_v49 }
 0x553   : > { %2846 = vmatprep.subr.mxu0 %v2319_v37  ;;  %2907 = vmatprep.subr.mxu1 %v2581_v43 }
 0x554   : > { %2847 = vmatpush1.msra.mxu0 %v2318_v54  ;;  %2908 = vmatpush1.msra.mxu1 %v2580_v2 }
 0x555   : > { %v2509_v40 = vpop.permute.xlu1 %2508  ;;  %2848 = vmatprep.subr.mxu0 %v2258_v35  ;;  %v2251_v24 = vpop.permute.xlu0 %2250 }
 0x556   : > { %v2519_v14 = vsel %vm2512_vm0, %v2507_v63, %v2509_v40  ;;  %v2520_v5 = vsel %vm2512_vm0, %v2509_v40, %v6746_v17  ;;  %2849 = vmatpush1.msra.mxu0 %v2257_v7 }
 0x557   : > { %2850 = vmatprep.subr.mxu0 %v2197_v23  ;;  %2909 = vmatprep.subr.mxu1 %v2520_v5 }
 0x558   : > { %2851 = vmatpush1.msra.mxu0 %v2196_v46  ;;  %2910 = vmatpush1.msra.mxu1 %v2519_v14 }
 0x559   : > { %v2448_v29 = vpop.permute.xlu1 %2447  ;;  %2852 = vmatprep.subr.mxu0 %v2136_v13  ;;  %v2190_v55 = vpop.permute.xlu0 %2189 }
 0x55a   : > { %v2458_v38 = vsel %vm2451_vm5, %v2446_v11, %v2448_v29  ;;  %v2459_v17 = vsel %vm2451_vm5, %v2448_v29, %v6748_v31  ;;  %2853 = vmatpush1.msra.mxu0 %v2135_v0 }
 0x55b   : > { %5366 = vmatmul.mubr.msk.f32.vlgmr.msra.gmra.mxu0 %vm7937_vm15, %v6965_v39  ;;  %2911 = vmatprep.subr.mxu1 %v2459_v17 }
 0x55c   : > { %2912 = vmatpush1.msra.mxu1 %v2458_v38  ;;  %3630 = vmatprep.mubr.f32.mxu0 %v7968_v21 }
 0x55d   : > { %v2387_v18 = vpop.permute.xlu1 %2386  ;;  %v2129_v4 = vpop.permute.xlu0 %2128 }
 0x55e   : > { %v2397_v62 = vsel %vm2390_vm11, %v7024_v60, %v2387_v18  ;;  %v2398_v57 = vsel %vm2390_vm11, %v2387_v18, %v6752_v50 }
 0x55f   : > { %2913 = vmatprep.subr.mxu1 %v2398_v57 }
 0x560   : > { %2914 = vmatpush1.msra.mxu1 %v2397_v62 }
 0x561   : > { %v2310_v31 = vpop.permute.xlu1 %2309  ;;  %5868 = vmatprep.subr.msk.mxu1 %vm2077_vm14, %v6860_v48  ;;  %v3187_v18 = vpop.permute.xlu0 %3186 }
 0x562   : > { %v2320_v33 = vsel %vm2313_vm12, %v7028_v45, %v2310_v31  ;;  %v2321_v47 = vsel %vm2313_vm12, %v2310_v31, %v2312_v41  ;;  %5869 = vmatpush1.msk.msra.mxu1 %vm2076_vm10, %v6827_v1 }
 0x563   : > { %2917 = vmatprep.subr.mxu1 %v2321_v47 }
 0x564   : > { %2918 = vmatpush1.msra.mxu1 %v2320_v33 }
 0x565   : > { %v2249_v50 = vpop.permute.xlu1 %2248  ;;  %v3067_v57 = vpop.permute.xlu0 %3066 }
 0x566   : > { %v2259_v63 = vsel %vm2252_vm1, %v7033_v52, %v2249_v50  ;;  %v2260_v28 = vsel %vm2252_vm1, %v2249_v50, %v2251_v24 }
 0x567   : > { %2919 = vmatprep.subr.mxu1 %v2260_v28 }
 0x568   : > { %2920 = vmatpush1.msra.mxu1 %v2259_v63 }
 0x569   : > { %v2188_v48 = vpop.permute.xlu1 %2187 }
 0x56a   : > { %v2198_v20 = vsel %vm2191_vm6, %v2186_v49, %v2188_v48  ;;  %v2199_v42 = vsel %vm2191_vm6, %v2188_v48, %v2190_v55 }
 0x56b   : > { %2921 = vmatprep.subr.mxu1 %v2199_v42 }
 0x56c   : > { %2922 = vmatpush1.msra.mxu1 %v2198_v20 }
 0x56d   : > { %v2127_v1 = vpop.permute.xlu1 %2126 }
 0x56e   : > { %v2137_v11 = vsel %vm2130_vm3, %v2125_v12, %v2127_v1  ;;  %v2138_v27 = vsel %vm2130_vm3, %v2127_v1, %v2129_v4 }
 0x56f   : > { %2923 = vmatprep.subr.mxu1 %v2138_v27 }
 0x570   : > { %2924 = vmatpush1.msra.mxu1 %v2137_v11 }
 0x571   : > { %5367 = vmatmul.mubr.msk.f32.vlgmr.msra.gmra.mxu1 %vm7937_vm15, %v6965_v39  ;;  %vm7992_vm15 = vcmp.eq.s32.totalorder %v7978_v6, 1 }
 0x572   : > { %3701 = vmatprep.mubr.f32.mxu1 %v7968_v21 }
 0x57a   : > { %v7096_v60 = vpop.permute.xlu1 %2674 }
 0x57e   : > { %v3127_v40 = vpop.permute.xlu1 %3126 }
 0x582   : > { %v3007_v29 = vpop.permute.xlu1 %3006 }
 0x586   : > { %v7203_v17 = vpop.permute.xlu1 %3458 }
 0x58a   : > { %v7207_v41 = vpop.permute.xlu1 %3398 }
 0x58e   : > { %v7213_v62 = vpop.permute.xlu1 %3338 }
 0x592   : > { %v7217_v24 = vpop.permute.xlu1 %3278 }
 0x5dd   : > { %v2746_v3 = vpop.f32.mrf.mxu0 }
 0x5de   : > { %v7099_v8 = vadd.f32 %v2746_v3, %v7096_v60 }
 0x5df   : > { %v2748_v10 = vpop.f32.mrf.mxu0 }
 0x5e0   : > { %v2964_v51 = vmax.f32 %v7099_v8, 0.0  ;;  %v7103_v45 = vadd.f32 %v2748_v10, %v7096_v60  ;;  %v7271_v8 = vld [vmem:[%s7875_s7] sm:$0xff] }
 0x5e2   : > { %v2972_v34 = vsel %vm2070_vm2, %v2964_v51, 0.0  ;;  %v2965_v39 = vmax.f32 %v7103_v45, 0.0 }
 0x5e3   : > { %3382 = vrot.lane.b32.xlu1 %v2972_v34, %s7981_s26  ;;  %3442 = vrot.lane.b32.xlu0 %v2972_v34, %s7990_s1 }
 0x5e4   : > { %v2973_v59 = vsel %vm7992_vm15, %v2965_v39, 0.0 }
 0x5e7   : > { %3262 = vrot.lane.b32.xlu1 %v2972_v34, %s7991_s21  ;;  %3322 = vrot.lane.b32.xlu0 %v2972_v34, %s7982_s27 }
 0x5eb   : > { %3128 = vrot.lane.b32.xlu1 %v2972_v34, %s7983_s2  ;;  %3188 = vrot.lane.b32.xlu0 %v2972_v34, %s7977_s0 }
 0x5ef   : > { %3008 = vrot.lane.b32.xlu1 %v2972_v34, %s7979_s20  ;;  %3068 = vrot.lane.b32.xlu0 %v2972_v34, %s7980_s28 }
 0x5f3   : > { %3444 = vrot.lane.b32.xlu0 %v2973_v59, %s7990_s1 }
 0x5fb   : > { %v2817_v9 = vpop.f32.mrf.mxu1 }
 0x5fc   : > { %v7124_v52 = vadd.f32 %v2817_v9, %v7096_v60 }
 0x5fd   : > { %v2819_v19 = vpop.f32.mrf.mxu1 }
 0x5fe   : > { %v2966_v15 = vmax.f32 %v7124_v52, 0.0  ;;  %v7128_v56 = vadd.f32 %v2819_v19, %v7096_v60 }
 0x600   : > { %v2974_v61 = vsel %vm2072_vm4, %v2966_v15, 0.0  ;;  %v2967_v22 = vmax.f32 %v7128_v56, 0.0 }
 0x601   : > { %3446 = vrot.lane.b32.xlu1 %v2974_v61, %s7990_s1  ;;  %3386 = vrot.lane.b32.xlu0 %v2974_v61, %s7981_s26 }
 0x602   : > { %v2975_v26 = vsel %vm2073_vm7, %v2967_v22, 0.0 }
 0x605   : > { %3384 = vrot.lane.b32.xlu1 %v2973_v59, %s7981_s26  ;;  %3324 = vrot.lane.b32.xlu0 %v2973_v59, %s7982_s27 }
 0x609   : > { %3326 = vrot.lane.b32.xlu1 %v2974_v61, %s7982_s27  ;;  %3266 = vrot.lane.b32.xlu0 %v2974_v61, %s7991_s21 }
 0x60d   : > { %3264 = vrot.lane.b32.xlu1 %v2973_v59, %s7991_s21  ;;  %3130 = vrot.lane.b32.xlu0 %v2973_v59, %s7983_s2 }
 0x611   : > { %3190 = vrot.lane.b32.xlu1 %v2973_v59, %s7977_s0  ;;  %3010 = vrot.lane.b32.xlu0 %v2973_v59, %s7979_s20 }
 0x615   : > { %3070 = vrot.lane.b32.xlu1 %v2973_v59, %s7980_s28  ;;  %3192 = vrot.lane.b32.xlu0 %v2974_v61, %s7977_s0 }
 0x619   : > { %3328 = vrot.lane.b32.xlu1 %v2975_v26, %s7982_s27  ;;  %3132 = vrot.lane.b32.xlu0 %v2974_v61, %s7983_s2 }
 0x61b   : > { %v2888_v49 = vpop.f32.mrf.mxu0 }
 0x61c   : > { %v7154_v32 = vadd.f32 %v2888_v49, %v7096_v60 }
 0x61d   : > { %v2890_v37 = vpop.f32.mrf.mxu0  ;;  %3194 = vrot.lane.b32.xlu1 %v2975_v26, %s7977_s0  ;;  %3072 = vrot.lane.b32.xlu0 %v2974_v61, %s7980_s28 }
 0x61e   : > { %v2968_v2 = vmax.f32 %v7154_v32, 0.0  ;;  %v7160_v43 = vadd.f32 %v2890_v37, %v7096_v60 }
 0x620   : > { %v2976_v54 = vsel %vm2074_vm8, %v2968_v2, 0.0  ;;  %v2969_v35 = vmax.f32 %v7160_v43, 0.0 }
 0x621   : > { %3134 = vrot.lane.b32.xlu1 %v2975_v26, %s7983_s2  ;;  %3012 = vrot.lane.b32.xlu0 %v2974_v61, %s7979_s20 }
 0x622   : > { %v2977_v7 = vsel %vm2075_vm13, %v2969_v35, 0.0 }
 0x625   : > { %3074 = vrot.lane.b32.xlu1 %v2975_v26, %s7980_s28  ;;  %3448 = vrot.lane.b32.xlu0 %v2975_v26, %s7990_s1 }
 0x629   : > { %3014 = vrot.lane.b32.xlu1 %v2975_v26, %s7979_s20  ;;  %3388 = vrot.lane.b32.xlu0 %v2975_v26, %s7981_s26 }
 0x62d   : > { %3450 = vrot.lane.b32.xlu1 %v2976_v54, %s7990_s1  ;;  %3268 = vrot.lane.b32.xlu0 %v2975_v26, %s7991_s21 }
 0x631   : > { %v2959_v12 = vpop.f32.mrf.mxu1  ;;  %3390 = vrot.lane.b32.xlu1 %v2976_v54, %s7981_s26  ;;  %3330 = vrot.lane.b32.xlu0 %v2976_v54, %s7982_s27 }
 0x632   : > { %v7182_v23 = vadd.f32 %v2959_v12, %v7096_v60 }
 0x633   : > { %v2961_v14 = vpop.f32.mrf.mxu1 }
 0x634   : > { %v2970_v5 = vmax.f32 %v7182_v23, 0.0  ;;  %v7186_v46 = vadd.f32 %v2961_v14, %v7096_v60  ;;  %v3557_v60 = vld [vmem:[%s7876_s8] sm:$0xff] }
 0x635   : > { %3270 = vrot.lane.b32.xlu1 %v2976_v54, %s7991_s21  ;;  %3196 = vrot.lane.b32.xlu0 %v2976_v54, %s7977_s0 }
 0x636   : > { %v2978_v13 = vsel %vm2076_vm10, %v2970_v5, 0.0  ;;  %v2971_v0 = vmax.f32 %v7186_v46, 0.0 }
 0x638   : > { %v2979_v38 = vsel %vm2077_vm14, %v2971_v0, 0.0 }
 0x639   : > { %3454 = vrot.lane.b32.xlu1 %v2978_v13, %s7990_s1  ;;  %3136 = vrot.lane.b32.xlu0 %v2976_v54, %s7983_s2 }
 0x63d   : > { %3394 = vrot.lane.b32.xlu1 %v2978_v13, %s7981_s26  ;;  %3076 = vrot.lane.b32.xlu0 %v2976_v54, %s7980_s28 }
 0x641   : > { %3334 = vrot.lane.b32.xlu1 %v2978_v13, %s7982_s27  ;;  %3016 = vrot.lane.b32.xlu0 %v2976_v54, %s7979_s20 }
 0x645   : > { %3274 = vrot.lane.b32.xlu1 %v2978_v13, %s7991_s21  ;;  %3452 = vrot.lane.b32.xlu0 %v2977_v7, %s7990_s1 }
 0x649   : > { %3198 = vrot.lane.b32.xlu1 %v2977_v7, %s7977_s0  ;;  %3392 = vrot.lane.b32.xlu0 %v2977_v7, %s7981_s26 }
 0x64d   : > { %3138 = vrot.lane.b32.xlu1 %v2977_v7, %s7983_s2  ;;  %3332 = vrot.lane.b32.xlu0 %v2977_v7, %s7982_s27 }
 0x651   : > { %3078 = vrot.lane.b32.xlu1 %v2977_v7, %s7980_s28  ;;  %3272 = vrot.lane.b32.xlu0 %v2977_v7, %s7991_s21 }
 0x655   : > { %3018 = vrot.lane.b32.xlu1 %v2977_v7, %s7979_s20  ;;  %3200 = vrot.lane.b32.xlu0 %v2978_v13, %s7977_s0  ;;  %v3443_v31 = vpop.permute.xlu0 %3442  ;;  %v3383_v33 = vpop.permute.xlu1 %3382 }
 0x659   : > { %3202 = vrot.lane.b32.xlu1 %v2979_v38, %s7977_s0  ;;  %3456 = vrot.lane.b32.xlu0 %v2979_v38, %s7990_s1  ;;  %v3323_v47 = vpop.permute.xlu0 %3322  ;;  %v3263_v50 = vpop.permute.xlu1 %3262  ;;  %s5963_s0 = smov 17   ;;  %s5966_s1 = smov 24  }
 0x65d   : > { %3142 = vrot.lane.b32.xlu1 %v2979_v38, %s7983_s2  ;;  %3396 = vrot.lane.b32.xlu0 %v2979_v38, %s7981_s26  ;;  %v3189_v63 = vpop.permute.xlu0 %3188  ;;  %v3129_v28 = vpop.permute.xlu1 %3128 }
 0x65e   : > { %v3204_v55 = vsel %vm2313_vm12, %v3187_v18, %v3189_v63  ;;  %v3144_v48 = vsel %vm2252_vm1, %v3127_v40, %v3129_v28 }
 0x661   : > { %3082 = vrot.lane.b32.xlu1 %v2979_v38, %s7980_s28  ;;  %3336 = vrot.lane.b32.xlu0 %v2979_v38, %s7982_s27  ;;  %v3069_v20 = vpop.permute.xlu0 %3068  ;;  %v3009_v42 = vpop.permute.xlu1 %3008  ;;  %s5961_s27 = smov 121  }
 0x662   : > { %v3084_v4 = vsel %vm2191_vm6, %v3067_v57, %v3069_v20  ;;  %v3024_v1 = vsel %vm2130_vm3, %v3007_v29, %v3009_v42 }
 0x663   : > { %3100 = vst [vmem:[#allocation8 + $0x40] sm:$0xff] %v3084_v4  ;;  %3040 = vst [vmem:[#allocation8] sm:$0xff] %v3024_v1 }
 0x665   : > { %3022 = vrot.lane.b32.xlu1 %v2979_v38, %s7979_s20  ;;  %3276 = vrot.lane.b32.xlu0 %v2979_v38, %s7991_s21  ;;  %v3445_v11 = vpop.permute.xlu0 %3444 }
 0x666   : > { %v3460_v27 = vsel %vm2573_vm9, %v3443_v31, %v3445_v11 }
 0x669   : > { %3140 = vrot.lane.b32.xlu0 %v2978_v13, %s7983_s2  ;;  %s457_s2 = scalar_lea.vmem [#allocation10], %s456_s3 }
 0x66d   : > { %3080 = vrot.lane.b32.xlu0 %v2978_v13, %s7980_s28  ;;  %s5960_s28 = smov 113  }
 0x671   : > { %3020 = vrot.lane.b32.xlu0 %v2978_v13, %s7979_s20  ;;  %s5965_s20 = smov 16  }
 0x673   : > { %v7242_v3 = vpop.permute.xlu0 %3386  ;;  %v7244_v10 = vpop.permute.xlu1 %3446 }
 0x674   : > { %v3461_v34 = vsel %vm2573_vm9, %v3445_v11, %v7244_v10 }
 0x675   : > { %3560 = vperm.xlu0 %5852, %v3557_v60   ;;  %3580 = vmatprep.subr.mxu0 %v3461_v34 }
 0x676   : > { %3581 = vmatpush1.msra.mxu0 %v3460_v27 }
 0x677   : > { %v3325_v59 = vpop.permute.xlu0 %3324  ;;  %v3385_v9 = vpop.permute.xlu1 %3384 }
 0x678   : > { %v3340_v19 = vsel %vm2451_vm5, %v3323_v47, %v3325_v59  ;;  %v3400_v61 = vsel %vm2512_vm0, %v3383_v33, %v3385_v9  ;;  %v3401_v26 = vsel %vm2512_vm0, %v3385_v9, %v7242_v3 }
 0x679   : > { %3582 = vmatprep.subr.mxu0 %v3401_v26 }
 0x67a   : > { %3583 = vmatpush1.msra.mxu0 %v3400_v61 }
 0x67b   : > { %v3267_v49 = vpop.permute.xlu0 %3266  ;;  %v3327_v37 = vpop.permute.xlu1 %3326 }
 0x67c   : > { %v3341_v54 = vsel %vm2451_vm5, %v3325_v59, %v3327_v37 }
 0x67d   : > { %3584 = vmatprep.subr.mxu0 %v3341_v54 }
 0x67e   : > { %3585 = vmatpush1.msra.mxu0 %v3340_v19 }
 0x67f   : > { %v3131_v7 = vpop.permute.xlu0 %3130  ;;  %v3265_v12 = vpop.permute.xlu1 %3264 }
 0x680   : > { %v3145_v40 = vsel %vm2252_vm1, %v3129_v28, %v3131_v7  ;;  %v3280_v14 = vsel %vm2390_vm11, %v3263_v50, %v3265_v12  ;;  %v3281_v13 = vsel %vm2390_vm11, %v3265_v12, %v3267_v49 }
 0x681   : > { %3586 = vmatprep.subr.mxu0 %v3281_v13 }
 0x682   : > { %3587 = vmatpush1.msra.mxu0 %v3280_v14 }
 0x683   : > { %v3011_v29 = vpop.permute.xlu0 %3010  ;;  %v3191_v38 = vpop.permute.xlu1 %3190  ;;  %5870 = vmatprep.subr.msk.mxu0 %vm7992_vm15, %v2965_v39  ;;  %vm7993_vm15 = vcmask 588800  }
 0x684   : > { %v3025_v18 = vsel %vm2130_vm3, %v3009_v42, %v3011_v29  ;;  %v3205_v57 = vsel %vm2313_vm12, %v3189_v63, %v3191_v38  ;;  %5871 = vmatpush1.msk.msra.mxu0 %vm2070_vm2, %v2964_v51 }
 0x685   : > { %3041 = vst [vmem:[#allocation8 + $0x8] sm:$0xff] %v3025_v18  ;;  %3590 = vmatprep.subr.mxu0 %v3205_v57 }
 0x686   : > { %3591 = vmatpush1.msra.mxu0 %v3204_v55 }
 0x687   : > { %v3193_v31 = vpop.permute.xlu0 %3192  ;;  %v3071_v33 = vpop.permute.xlu1 %3070  ;;  %3592 = vmatprep.subr.mxu0 %v3145_v40 }
 0x688   : > { %v3206_v45 = vsel %vm2313_vm12, %v3191_v38, %v3193_v31  ;;  %v3085_v47 = vsel %vm2191_vm6, %v3069_v20, %v3071_v33  ;;  %3593 = vmatpush1.msra.mxu0 %v3144_v48 }
 0x689   : > { %3101 = vst [vmem:[#allocation8 + $0x48] sm:$0xff] %v3085_v47  ;;  %3594 = vmatprep.subr.mxu0 %v3085_v47 }
 0x68a   : > { %3595 = vmatpush1.msra.mxu0 %v3084_v4 }
 0x68b   : > { %v3133_v51 = vpop.permute.xlu0 %3132  ;;  %v3329_v39 = vpop.permute.xlu1 %3328  ;;  %3596 = vmatprep.subr.mxu0 %v3025_v18 }
 0x68c   : > { %v3146_v50 = vsel %vm2252_vm1, %v3131_v7, %v3133_v51  ;;  %v3342_v63 = vsel %vm2451_vm5, %v3327_v37, %v3329_v39  ;;  %3597 = vmatpush1.msra.mxu0 %v3024_v1 }
 0x68d   : > { %5368 = vmatmul.mubr.msk.f32.vlgmr.msra.gmra.mxu0 %vm7993_vm15, %v7271_v8 }
 0x68e   : > { %3772 = vmatprep.mubr.f32.mxu0 %v7968_v21 }
 0x68f   : > { %v3073_v28 = vpop.permute.xlu0 %3072  ;;  %v3195_v55 = vpop.permute.xlu1 %3194 }
 0x690   : > { %v3086_v48 = vsel %vm2191_vm6, %v3071_v33, %v3073_v28  ;;  %v3207_v20 = vsel %vm2313_vm12, %v3193_v31, %v3195_v55 }
 0x691   : > { %3102 = vst [vmem:[#allocation8 + $0x50] sm:$0xff] %v3086_v48 }
 0x693   : > { %v3013_v42 = vpop.permute.xlu0 %3012  ;;  %v3135_v4 = vpop.permute.xlu1 %3134 }
 0x694   : > { %v3026_v11 = vsel %vm2130_vm3, %v3011_v29, %v3013_v42  ;;  %v3147_v27 = vsel %vm2252_vm1, %v3133_v51, %v3135_v4 }
 0x695   : > { %3042 = vst [vmem:[#allocation8 + $0x10] sm:$0xff] %v3026_v11 }
 0x697   : > { %v3449_v1 = vpop.permute.xlu0 %3448  ;;  %v3075_v60 = vpop.permute.xlu1 %3074 }
 0x698   : > { %v3462_v34 = vsel %vm2573_vm9, %v7244_v10, %v3449_v1  ;;  %v3087_v59 = vsel %vm2191_vm6, %v3073_v28, %v3075_v60 }
 0x699   : > { %3103 = vst [vmem:[#allocation8 + $0x58] sm:$0xff] %v3087_v59 }
 0x69b   : > { %v3389_v9 = vpop.permute.xlu0 %3388  ;;  %v3015_v19 = vpop.permute.xlu1 %3014 }
 0x69c   : > { %v3402_v61 = vsel %vm2512_vm0, %v7242_v3, %v3389_v9  ;;  %v3027_v26 = vsel %vm2130_vm3, %v3013_v42, %v3015_v19 }
 0x69d   : > { %3043 = vst [vmem:[#allocation8 + $0x18] sm:$0xff] %v3027_v26 }
 0x69f   : > { %v3269_v37 = vpop.permute.xlu0 %3268  ;;  %v3451_v54 = vpop.permute.xlu1 %3450 }
 0x6a0   : > { %v3282_v7 = vsel %vm2390_vm11, %v3267_v49, %v3269_v37  ;;  %v3463_v12 = vsel %vm2573_vm9, %v3449_v1, %v3451_v54 }
 0x6a1   : > { %3651 = vmatprep.subr.mxu1 %v3463_v12 }
 0x6a2   : > { %3652 = vmatpush1.msra.mxu1 %v3462_v34 }
 0x6a3   : > { %v3331_v10 = vpop.permute.xlu0 %3330  ;;  %v3391_v40 = vpop.permute.xlu1 %3390 }
 0x6a4   : > { %v3343_v14 = vsel %vm2451_vm5, %v3329_v39, %v3331_v10  ;;  %v3403_v13 = vsel %vm2512_vm0, %v3389_v9, %v3391_v40 }
 0x6a5   : > { %3653 = vmatprep.subr.mxu1 %v3403_v13 }
 0x6a6   : > { %3654 = vmatpush1.msra.mxu1 %v3402_v61 }
 0x6a7   : > { %v3197_v3 = vpop.permute.xlu0 %3196  ;;  %v3271_v29 = vpop.permute.xlu1 %3270  ;;  %3655 = vmatprep.subr.mxu1 %v3343_v14 }
 0x6a8   : > { %v7293_v38 = vsel %vm2313_vm12, %v3195_v55, %v3197_v3  ;;  %v3283_v49 = vsel %vm2390_vm11, %v3269_v37, %v3271_v29  ;;  %3656 = vmatpush1.msra.mxu1 %v3342_v63 }
 0x6a9   : > { %3657 = vmatprep.subr.mxu1 %v3283_v49 }
 0x6aa   : > { %3658 = vmatpush1.msra.mxu1 %v3282_v7 }
 0x6ab   : > { %v3137_v18 = vpop.permute.xlu0 %3136  ;;  %v7296_v57 = vpop.permute.xlu1 %3454  ;;  %5872 = vmatprep.subr.msk.mxu1 %vm2073_vm7, %v2967_v22 }
 0x6ac   : > { %v7303_v31 = vsel %vm2252_vm1, %v3135_v4, %v3137_v18  ;;  %5873 = vmatpush1.msk.msra.mxu1 %vm2072_vm4, %v2966_v15 }
 0x6ad   : > { %3661 = vmatprep.subr.mxu1 %v3207_v20 }
 0x6ae   : > { %3662 = vmatpush1.msra.mxu1 %v3206_v45 }
 0x6af   : > { %v3077_v33 = vpop.permute.xlu0 %3076  ;;  %v7309_v47 = vpop.permute.xlu1 %3394  ;;  %3663 = vmatprep.subr.mxu1 %v3147_v27 }
 0x6b0   : > { %v3088_v51 = vsel %vm2191_vm6, %v3075_v60, %v3077_v33  ;;  %3664 = vmatpush1.msra.mxu1 %v3146_v50 }
 0x6b1   : > { %3104 = vst [vmem:[#allocation8 + $0x60] sm:$0xff] %v3088_v51  ;;  %3665 = vmatprep.subr.mxu1 %v3087_v59 }
 0x6b2   : > { %3666 = vmatpush1.msra.mxu1 %v3086_v48 }
 0x6b3   : > { %v3017_v56 = vpop.permute.xlu0 %3016  ;;  %v7312_v22 = vpop.permute.xlu1 %3334  ;;  %3667 = vmatprep.subr.mxu1 %v3027_v26 }
 0x6b4   : > { %v3028_v52 = vsel %vm2130_vm3, %v3015_v19, %v3017_v56  ;;  %3668 = vmatpush1.msra.mxu1 %v3026_v11 }
 0x6b5   : > { %3044 = vst [vmem:[#allocation8 + $0x20] sm:$0xff] %v3028_v52  ;;  %5369 = vmatmul.mubr.msk.f32.vlgmr.msra.gmra.mxu1 %vm7993_vm15, %v7271_v8 }
 0x6b6   : > { %3843 = vmatprep.mubr.f32.mxu1 %v7968_v21 }
 0x6b7   : > { %v3453_v15 = vpop.permute.xlu0 %3452  ;;  %v7318_v45 = vpop.permute.xlu1 %3274 }
 0x6b8   : > { %v3464_v39 = vsel %vm2573_vm9, %v3451_v54, %v3453_v15  ;;  %v3465_v50 = vsel %vm2573_vm9, %v3453_v15, %v7296_v57 }
 0x6b9   : > { %3722 = vmatprep.subr.mxu0 %v3465_v50 }
 0x6ba   : > { %3723 = vmatpush1.msra.mxu0 %v3464_v39 }
 0x6bb   : > { %v3393_v63 = vpop.permute.xlu0 %3392  ;;  %v3199_v28 = vpop.permute.xlu1 %3198 }
 0x6bc   : > { %v3404_v55 = vsel %vm2512_vm0, %v3391_v40, %v3393_v63  ;;  %v3405_v48 = vsel %vm2512_vm0, %v3393_v63, %v7309_v47  ;;  %v3209_v20 = vsel %vm2313_vm12, %v3197_v3, %v3199_v28 }
 0x6bd   : > { %3724 = vmatprep.subr.mxu0 %v3405_v48 }
 0x6be   : > { %3725 = vmatpush1.msra.mxu0 %v3404_v55 }
 0x6bf   : > { %v3333_v42 = vpop.permute.xlu0 %3332  ;;  %v3139_v4 = vpop.permute.xlu1 %3138 }
 0x6c0   : > { %v3344_v11 = vsel %vm2451_vm5, %v3331_v10, %v3333_v42  ;;  %v3345_v27 = vsel %vm2451_vm5, %v3333_v42, %v7312_v22  ;;  %v3149_v1 = vsel %vm2252_vm1, %v3137_v18, %v3139_v4 }
 0x6c1   : > { %3726 = vmatprep.subr.mxu0 %v3345_v27 }
 0x6c2   : > { %3727 = vmatpush1.msra.mxu0 %v3344_v11 }
 0x6c3   : > { %v3273_v60 = vpop.permute.xlu0 %3272  ;;  %v3079_v34 = vpop.permute.xlu1 %3078 }
 0x6c4   : > { %v3284_v59 = vsel %vm2390_vm11, %v3271_v29, %v3273_v60  ;;  %v3285_v9 = vsel %vm2390_vm11, %v3273_v60, %v7318_v45  ;;  %v3089_v19 = vsel %vm2191_vm6, %v3077_v33, %v3079_v34 }
 0x6c5   : > { %3105 = vst [vmem:[#allocation8 + $0x68] sm:$0xff] %v3089_v19  ;;  %3728 = vmatprep.subr.mxu0 %v3285_v9 }
 0x6c6   : > { %3729 = vmatpush1.msra.mxu0 %v3284_v59 }
 0x6c7   : > { %v3201_v61 = vpop.permute.xlu0 %3200  ;;  %v3019_v26 = vpop.permute.xlu1 %3018  ;;  %5874 = vmatprep.subr.msk.mxu0 %vm2075_vm13, %v2969_v35 }
 0x6c8   : > { %v3210_v37 = vsel %vm2313_vm12, %v3199_v28, %v3201_v61  ;;  %v3029_v54 = vsel %vm2130_vm3, %v3017_v56, %v3019_v26  ;;  %5875 = vmatpush1.msk.msra.mxu0 %vm2074_vm8, %v2968_v2 }
 0x6c9   : > { %3045 = vst [vmem:[#allocation8 + $0x28] sm:$0xff] %v3029_v54  ;;  %3732 = vmatprep.subr.mxu0 %v3209_v20 }
 0x6ca   : > { %3733 = vmatpush1.msra.mxu0 %v7293_v38 }
 0x6cb   : > { %v3457_v7 = vpop.permute.xlu0 %3456  ;;  %v3203_v12 = vpop.permute.xlu1 %3202  ;;  %3734 = vmatprep.subr.mxu0 %v3149_v1 }
 0x6cc   : > { %v3466_v43 = vsel %vm2573_vm9, %v7296_v57, %v3457_v7  ;;  %v3467_v35 = vsel %vm2573_vm9, %v3457_v7, %v7203_v17  ;;  %v3211_v10 = vsel %vm2313_vm12, %v3201_v61, %v3203_v12  ;;  %3735 = vmatpush1.msra.mxu0 %v7303_v31  ;;  %vm7994_vm9 = vmmov %vm7993_vm15  ;;  %vm4512_vm12 = vcmask 392512  }
 0x6cd   : > { %3736 = vmatprep.subr.mxu0 %v3089_v19  ;;  %3793 = vmatprep.subr.mxu1 %v3467_v35 }
 0x6ce   : > { %3737 = vmatpush1.msra.mxu0 %v3088_v51  ;;  %3794 = vmatpush1.msra.mxu1 %v3466_v43 }
 0x6cf   : > { %v3397_v32 = vpop.permute.xlu0 %3396  ;;  %3738 = vmatprep.subr.mxu0 %v3029_v54  ;;  %v3143_v3 = vpop.permute.xlu1 %3142 }
 0x6d0   : > { %v3406_v2 = vsel %vm2512_vm0, %v7309_v47, %v3397_v32  ;;  %v3407_v40 = vsel %vm2512_vm0, %v3397_v32, %v7207_v41  ;;  %3739 = vmatpush1.msra.mxu0 %v3028_v52 }
 0x6d1   : > { %5370 = vmatmul.mubr.msk.f32.vlgmr.msra.gmra.mxu0 %vm7993_vm15, %v7271_v8  ;;  %3795 = vmatprep.subr.mxu1 %v3407_v40  ;;  %vm5274_vm15 = vcmask 73728  }
 0x6d2   : > { %3796 = vmatpush1.msra.mxu1 %v3406_v2  ;;  %5553 = vmatprep.subr.mxu0 %v7968_v21 }
 0x6d3   : > { %v3337_v17 = vpop.permute.xlu0 %3336  ;;  %v3083_v57 = vpop.permute.xlu1 %3082 }
 0x6d4   : > { %v3346_v14 = vsel %vm2451_vm5, %v7312_v22, %v3337_v17  ;;  %v3347_v13 = vsel %vm2451_vm5, %v3337_v17, %v7213_v62  ;;  %vm4338_vm5 = vcmask 261312  }
 0x6d5   : > { %3797 = vmatprep.subr.mxu1 %v3347_v13 }
 0x6d6   : > { %3798 = vmatpush1.msra.mxu1 %v3346_v14 }
 0x6d7   : > { %v3277_v29 = vpop.permute.xlu0 %3276 }
 0x6d8   : > { %v3286_v41 = vsel %vm2390_vm11, %v7318_v45, %v3277_v29  ;;  %v3287_v38 = vsel %vm2390_vm11, %v3277_v29, %v7217_v24 }
 0x6d9   : > { %3799 = vmatprep.subr.mxu1 %v3287_v38 }
 0x6da   : > { %3800 = vmatpush1.msra.mxu1 %v3286_v41 }
 0x6db   : > { %v3141_v49 = vpop.permute.xlu0 %3140  ;;  %5876 = vmatprep.subr.msk.mxu1 %vm2077_vm14, %v2971_v0  ;;  %v3023_v0 = vpop.permute.xlu1 %3022 }
 0x6dc   : > { %v3150_v62 = vsel %vm2252_vm1, %v3139_v4, %v3141_v49  ;;  %v3151_v18 = vsel %vm2252_vm1, %v3141_v49, %v3143_v3  ;;  %5877 = vmatpush1.msk.msra.mxu1 %vm2076_vm10, %v2970_v5  ;;  %vm4600_vm1 = vcmask 458112  }
 0x6dd   : > { %3803 = vmatprep.subr.mxu1 %v3211_v10 }
 0x6de   : > { %3804 = vmatpush1.msra.mxu1 %v3210_v37 }
 0x6df   : > { %v3081_v24 = vpop.permute.xlu0 %3080  ;;  %3805 = vmatprep.subr.mxu1 %v3151_v18  ;;  %v7437_v18 = vld [vmem:[%s7879_s11 + $0x10] sm:$0xff] }
 0x6e0   : > { %v3090_v31 = vsel %vm2191_vm6, %v3079_v34, %v3081_v24  ;;  %v3091_v46 = vsel %vm2191_vm6, %v3081_v24, %v3083_v57  ;;  %3806 = vmatpush1.msra.mxu1 %v3150_v62  ;;  %vm7995_vm6 = vcmp.eq.s32.totalorder %v7978_v6, 1  ;;  %v7432_v62 = vld [vmem:[%s7879_s11 + $0x18] sm:$0xff] }
 0x6e1   : > { %3106 = vst [vmem:[#allocation8 + $0x70] sm:$0xff] %v3090_v31  ;;  %3107 = vst [vmem:[#allocation8 + $0x78] sm:$0xff] %v3091_v46  ;;  %3807 = vmatprep.subr.mxu1 %v3091_v46  ;;  %5554 = vmatpush3.msra.mxu0 %v7432_v62  ;;  %v7450_v46 = vld [vmem:[%s7879_s11 + $0x8] sm:$0xff] }
 0x6e2   : > { %3808 = vmatpush1.msra.mxu1 %v3090_v31  ;;  %5555 = vmatprep.subr.mxu0 %v7968_v21 }
 0x6e3   : > { %v3021_v33 = vpop.permute.xlu0 %3020  ;;  %5556 = vmatpush3.msra.mxu0 %v7437_v18 }
 0x6e4   : > { %v3030_v23 = vsel %vm2130_vm3, %v3019_v26, %v3021_v33  ;;  %v3031_v5 = vsel %vm2130_vm3, %v3021_v33, %v3023_v0  ;;  %5557 = vmatprep.subr.mxu0 %v7968_v21  ;;  %vm474_vm3 = vcmask 523264  }
 0x6e5   : > { %3046 = vst [vmem:[#allocation8 + $0x30] sm:$0xff] %v3030_v23  ;;  %3047 = vst [vmem:[#allocation8 + $0x38] sm:$0xff] %v3031_v5  ;;  %3809 = vmatprep.subr.mxu1 %v3031_v5  ;;  %5558 = vmatpush3.msra.mxu0 %v7450_v46 }
 0x6e6   : > { %3810 = vmatpush1.msra.mxu1 %v3030_v23  ;;  %v7461_v23 = vld [vmem:[%s7879_s11] sm:$0xff]  ;;  %5559 = vmatprep.subr.mxu0 %v7968_v21  ;;  %475 = vst.msk [vmem:[#allocation9] sm:$0xff] %vm474_vm3, %v7968_v21 }
 0x6e7   : > { %5371 = vmatmul.mubr.msk.f32.vlgmr.msra.gmra.mxu1 %vm7994_vm9, %v7271_v8  ;;  %5564 = vmatprep.subr.mxu1 %v7968_v21 }
 0x6e8   : > { %5565 = vmatpush3.msra.mxu1 %v7432_v62  ;;  %5560 = vmatpush3.msra.mxu0 %v7461_v23 }
 0x6e9   : > { %5566 = vmatprep.subr.mxu1 %v7968_v21  ;;  %5575 = vmatprep.subr.mxu0 %v7968_v21 }
 0x6ea   : > { %5567 = vmatpush3.msra.mxu1 %v7437_v18 }
 0x6eb   : > { %5568 = vmatprep.subr.mxu1 %v7968_v21 }
 0x6ec   : > { %5569 = vmatpush3.msra.mxu1 %v7450_v46 }
 0x6ed   : > { %5570 = vmatprep.subr.mxu1 %v7968_v21 }
 0x6ee   : > { %5571 = vmatpush3.msra.mxu1 %v7461_v23 }
 0x6ef   : > { %5586 = vmatprep.subr.mxu1 %v7968_v21 }
 0x6f0   : > { %v3561_v47 = vpop.permute.xlu0 %3560 }
 0x74d   : > { %v3632_v51 = vpop.f32.mrf.mxu0 }
 0x74e   : > { %v3633_v56 = vadd.f32 %v3632_v51, %v3561_v47 }
 0x74f   : > { %v3634_v22 = vpop.f32.mrf.mxu0 }
 0x750   : > { %v3850_v52 = vmax.f32 %v3633_v56, 0.0  ;;  %v3635_v15 = vadd.f32 %v3634_v22, %v3561_v47 }
 0x752   : > { %v3858_v45 = vsel %vm2070_vm2, %v3850_v52, 0.0  ;;  %v3851_v39 = vmax.f32 %v3635_v15, 0.0  ;;  %vm5958_vm2 = vmmov 0  }
 0x753   : > { %3900 = vrot.lane.b32.xlu1 %v3858_v45, %s7991_s21  ;;  %5561 = vmatprep.mubr.msk.f32.mxu0 %vm5958_vm2, %v7968_v21 }
 0x754   : > { %v3859_v50 = vsel %vm7995_vm6, %v3851_v39, 0.0  ;;  %5572 = vmatprep.mubr.msk.f32.mxu1 %vm5958_vm2, %v7968_v21 }
 0x755   : > { %3902 = vrot.lane.b32.xlu0 %v3859_v50, %s7991_s21 }
 0x775   : > { %v3703_v8 = vpop.f32.mrf.mxu1 }
 0x776   : > { %v3704_v63 = vadd.f32 %v3703_v8, %v3561_v47 }
 0x777   : > { %v3705_v28 = vpop.f32.mrf.mxu1 }
 0x778   : > { %v3852_v55 = vmax.f32 %v3704_v63, 0.0  ;;  %v3706_v48 = vadd.f32 %v3705_v28, %v3561_v47 }
 0x77a   : > { %v3860_v20 = vsel %vm2072_vm4, %v3852_v55, 0.0  ;;  %v3853_v42 = vmax.f32 %v3706_v48, 0.0  ;;  %vm4019_vm4 = vcmask 261120  }
 0x77b   : > { %3904 = vrot.lane.b32.xlu1 %v3860_v20, %s7991_s21 }
 0x77c   : > { %v3861_v25 = vsel %vm2073_vm7, %v3853_v42, 0.0  ;;  %vm7996_vm7 = vcmask 7168  }
 0x77d   : > { %3906 = vrot.lane.b32.xlu0 %v3861_v25, %s7991_s21 }
 0x791   : > { %v3774_v6 = vpop.f32.mrf.mxu0 }
 0x792   : > { %v3775_v4 = vadd.f32 %v3774_v6, %v3561_v47 }
 0x793   : > { %v3776_v11 = vpop.f32.mrf.mxu0 }
 0x794   : > { %v3854_v27 = vmax.f32 %v3775_v4, 0.0  ;;  %v3777_v1 = vadd.f32 %v3776_v11, %v3561_v47 }
 0x796   : > { %v3862_v60 = vsel %vm2074_vm8, %v3854_v27, 0.0  ;;  %v3855_v34 = vmax.f32 %v3777_v1, 0.0  ;;  %vm7997_vm8 = vcmask 72704  }
 0x797   : > { %3908 = vrot.lane.b32.xlu1 %v3862_v60, %s7991_s21 }
 0x798   : > { %v3863_v53 = vsel %vm2075_vm13, %v3855_v34, 0.0  ;;  %vm4092_vm13 = vcmask 64512  }
 0x799   : > { %3910 = vrot.lane.b32.xlu0 %v3863_v53, %s7991_s21 }
 0x7a7   : > { %v3845_v36 = vpop.f32.mrf.mxu1 }
 0x7a8   : > { %v3846_v59 = vadd.f32 %v3845_v36, %v3561_v47 }
 0x7a9   : > { %v3847_v9 = vpop.f32.mrf.mxu1 }
 0x7aa   : > { %v3856_v19 = vmax.f32 %v3846_v59, 0.0  ;;  %v3848_v61 = vadd.f32 %v3847_v9, %v3561_v47 }
 0x7ac   : > { %v3864_v26 = vsel %vm2076_vm10, %v3856_v19, 0.0  ;;  %v3857_v37 = vmax.f32 %v3848_v61, 0.0  ;;  %vm4522_vm10 = vcmask 138240  }
 0x7ad   : > { %3912 = vrot.lane.b32.xlu1 %v3864_v26, %s7991_s21 }
 0x7ae   : > { %v3865_v44 = vsel %vm2077_vm14, %v3857_v37, 0.0  ;;  %vm4174_vm14 = vcmask 130112  }
 0x7af   : > { %3914 = vrot.lane.b32.xlu0 %v3865_v44, %s7991_s21 }
 0x7b1   : > { %3916 = vrot.lane.b32.xlu1 %v7968_v21, %s7991_s21 }
 0x7c5   : > { %v3901_v30 = vpop.permute.xlu1 %3900 }
 0x7c7   : > { %v3903_v54 = vpop.permute.xlu0 %3902 }
 0x7c8   : > { %v3918_v7 = vsel %vm2390_vm11, %v3901_v30, %v3903_v54 }
 0x7c9   : > { %v3934_v12 = vmax.f32 %v3858_v45, %v3918_v7 }
 0x7cb   : > { %3961 = vrot.lane.b32.xlu0 %v3934_v12, %s7981_s26 }
 0x7ed   : > { %v3905_v16 = vpop.permute.xlu1 %3904 }
 0x7ee   : > { %v3919_v43 = vsel %vm2390_vm11, %v3903_v54, %v3905_v16 }
 0x7ef   : > { %v3935_v35 = vmax.f32 %v3859_v50, %v3919_v43  ;;  %v3907_v10 = vpop.permute.xlu0 %3906 }
 0x7f0   : > { %v3920_v58 = vsel %vm2390_vm11, %v3905_v16, %v3907_v10 }
 0x7f1   : > { %v7414_v32 = vmax.f32 %v3860_v20, %v3920_v58  ;;  %3963 = vrot.lane.b32.xlu1 %v3935_v35, %s7981_s26 }
 0x7f3   : > { %3965 = vrot.lane.b32.xlu0 %v7414_v32, %s7981_s26 }
 0x809   : > { %v3909_v2 = vpop.permute.xlu1 %3908 }
 0x80a   : > { %v3921_v40 = vsel %vm2390_vm11, %v3907_v10, %v3909_v2 }
 0x80b   : > { %v3937_v17 = vmax.f32 %v3861_v25, %v3921_v40  ;;  %v3911_v14 = vpop.permute.xlu0 %3910  ;;  %v4610_v40 = vld [vmem:[%s7877_s9 + $0x30] sm:$0xff] }
 0x80c   : > { %v3922_v13 = vsel %vm2390_vm11, %v3909_v2, %v3911_v14  ;;  %v5387_v2 = vld [vmem:[%s7877_s9 + $0x78] sm:$0xff] }
 0x80d   : > { %v7421_v3 = vmax.f32 %v3862_v60, %v3922_v13  ;;  %3967 = vrot.lane.b32.xlu1 %v3937_v17, %s7981_s26  ;;  %v5385_v13 = vld [vmem:[%s7877_s9 + $0x68] sm:$0xff] }
 0x80f   : > { %3969 = vrot.lane.b32.xlu0 %v7421_v3, %s7981_s26 }
 0x81f   : > { %v3913_v29 = vpop.permute.xlu1 %3912 }
 0x820   : > { %v3923_v41 = vsel %vm2390_vm11, %v3911_v14, %v3913_v29  ;;  %v4609_v14 = vld [vmem:[%s7877_s9 + $0x28] sm:$0xff] }
 0x821   : > { %v7427_v38 = vmax.f32 %v3863_v53, %v3923_v41  ;;  %v3915_v49 = vpop.permute.xlu0 %3914  ;;  %v4607_v41 = vld [vmem:[%s7877_s9 + $0x18] sm:$0xff] }
 0x822   : > { %v3924_v57 = vsel %vm2390_vm11, %v3913_v29, %v3915_v49  ;;  %v5384_v29 = vld [vmem:[%s7877_s9 + $0x60] sm:$0xff] }
 0x823   : > { %v7442_v24 = vmax.f32 %v3864_v26, %v3924_v57  ;;  %3971 = vrot.lane.b32.xlu1 %v7427_v38, %s7981_s26  ;;  %v3917_v31 = vpop.permute.xlu1 %3916  ;;  %v5381_v57 = vld [vmem:[%s7877_s9 + $0x48] sm:$0xff] }
 0x824   : > { %v3925_v0 = vsel %vm2390_vm11, %v3915_v49, %v3917_v31  ;;  %v4606_v49 = vld [vmem:[%s7877_s9 + $0x10] sm:$0xff]  ;;  %v4604_v31 = vld [vmem:[%s7877_s9] sm:$0xff]  ;;  %vm4425_vm11 = vcmask 326912  }
 0x825   : > { %v3941_v33 = vmax.f32 %v3865_v44, %v3925_v0  ;;  %3973 = vrot.lane.b32.xlu0 %v7442_v24, %s7981_s26 }
 0x827   : > { %3975 = vrot.lane.b32.xlu1 %v3941_v33, %s7981_s26  ;;  %s5959_s26 = smov 105  }
 0x83d   : > { %v3962_v5 = vpop.permute.xlu0 %3961 }
 0x863   : > { %v3964_v47 = vpop.permute.xlu1 %3963 }
 0x864   : > { %v3979_v51 = vsel %vm2512_vm0, %v3962_v5, %v3964_v47 }
 0x865   : > { %v3995_v56 = vmax.f32 %v3934_v12, %v3979_v51  ;;  %v3966_v22 = vpop.permute.xlu0 %3965 }
 0x866   : > { %v3980_v52 = vsel %vm2512_vm0, %v3964_v47, %v3966_v22 }
 0x867   : > { %v3996_v15 = vmax.f32 %v3935_v35, %v3980_v52  ;;  %4017 = vrot.lane.b32.xlu0 %v3995_v56, %s7947_s18  ;;  %s5962_s18 = smov 9  }
 0x869   : > { %4096 = vrot.lane.b32.xlu1 %v3996_v15, %s5959_s26  ;;  %s5289_s26 = sshll.u32 %s457_s2, 4  ;;  %s5290_s26 = int_to_ptr.vmem [resolvable:$true] %s5289_s26 }
 0x87f   : > { %v3968_v45 = vpop.permute.xlu1 %3967 }
 0x880   : > { %v3981_v39 = vsel %vm2512_vm0, %v3966_v22, %v3968_v45 }
 0x881   : > { %v3997_v50 = vmax.f32 %v7414_v32, %v3981_v39  ;;  %v3970_v8 = vpop.permute.xlu0 %3969  ;;  %v4611_v32 = vld [vmem:[%s7877_s9 + $0x38] sm:$0xff] }
 0x882   : > { %v3982_v63 = vsel %vm2512_vm0, %v3968_v45, %v3970_v8  ;;  %v5396_v39 = vld [vmem:[%s7877_s9 + $0xb8] sm:$0xff] }
 0x883   : > { %v3998_v28 = vmax.f32 %v3937_v17, %v3982_v63  ;;  %4178 = vrot.lane.b32.xlu0 %v3997_v50, %s5960_s28  ;;  %v5386_v17 = vld [vmem:[%s7877_s9 + $0x70] sm:$0xff]  ;;  %v5405_v50 = vld [vmem:[%s7877_s9 + $0xf8] sm:$0xff] }
 0x885   : > { %4260 = vrot.lane.b32.xlu1 %v3998_v28, %s5961_s27  ;;  %s5967_s27 = smov 32  }
 0x887   : > { %4344 = vrot.lane.b32.xlu0 %v3998_v28, %s7948_s25  ;;  %v5395_v28 = vld [vmem:[%s7877_s9 + $0xb0] sm:$0xff] }
 0x895   : > { %v3972_v55 = vpop.permute.xlu1 %3971 }
 0x896   : > { %v3983_v48 = vsel %vm2512_vm0, %v3970_v8, %v3972_v55 }
 0x897   : > { %v3999_v20 = vmax.f32 %v7421_v3, %v3983_v48  ;;  %v3974_v42 = vpop.permute.xlu0 %3973  ;;  %v4608_v3 = vld [vmem:[%s7877_s9 + $0x20] sm:$0xff]  ;;  %v5394_v48 = vld [vmem:[%s7877_s9 + $0xa8] sm:$0xff] }
 0x898   : > { %v3984_v25 = vsel %vm2512_vm0, %v3972_v55, %v3974_v42  ;;  %v5404_v55 = vld [vmem:[%s7877_s9 + $0xf0] sm:$0xff] }
 0x899   : > { %4431 = vrot.lane.b32.xlu0 %v3999_v20, %s5962_s18  ;;  %4346 = vrot.lane.b32.xlu1 %v3999_v20, %s7948_s25  ;;  %v3976_v6 = vpop.permute.xlu1 %3975  ;;  %v4000_v4 = vmax.f32 %v7427_v38, %v3984_v25  ;;  %s5964_s25 = smov 8   ;;  %v5383_v38 = vld [vmem:[%s7877_s9 + $0x58] sm:$0xff]  ;;  %v5403_v20 = vld [vmem:[%s7877_s9 + $0xe8] sm:$0xff] }
 0x89a   : > { %v3985_v11 = vsel %vm2512_vm0, %v3974_v42, %v3976_v6  ;;  %vm4256_vm0 = vcmask 195712   ;;  %v5393_v42 = vld [vmem:[%s7877_s9 + $0xa0] sm:$0xff]  ;;  %v5392_v6 = vld [vmem:[%s7877_s9 + $0x98] sm:$0xff] }
 0x89b   : > { %v4001_v27 = vmax.f32 %v7442_v24, %v3985_v11  ;;  %v5402_v25 = vld [vmem:[%s7877_s9 + $0xe0] sm:$0xff]  ;;  %v5391_v11 = vld [vmem:[%s7877_s9 + $0x90] sm:$0xff] }
 0x89d   : > { %4518 = vrot.lane.b32.xlu0 %v4000_v4, %s5963_s0  ;;  %4433 = vrot.lane.b32.xlu1 %v4000_v4, %s5962_s18  ;;  %v5401_v4 = vld [vmem:[%s7877_s9 + $0xd8] sm:$0xff]  ;;  %s5287_s18 = scalar_lea.hbm %s7882_s14, %s5443_s4 }
 0x8a1   : > { %4520 = vrot.lane.b32.xlu1 %v4001_v27, %s5963_s0  ;;  %v5400_v27 = vld [vmem:[%s7877_s9 + $0xd0] sm:$0xff]  ;;  %s5277_s0 = scalar_lea.sflag [#allocation11], %s456_s3 }
 0x8d9   : > { %v4018_v1 = vpop.permute.xlu0 %4017 }
 0x8da   : > { %5562 = vmatmul.mubr.msk.f32.vlgmr.msra.gmra.mxu0 %vm4019_vm4, %v4018_v1  ;;  %v5390_v1 = vld [vmem:[%s7877_s9 + $0x88] sm:$0xff] }
 0x8db   : > { %v4097_v60 = vpop.permute.xlu1 %4096  ;;  %5576 = vmatpush3.msra.mxu0 %v7432_v62  ;;  %5583 = vmatprep.mubr.msk.f32.mxu0 %vm5958_vm2, %v7968_v21 }
 0x8dc   : > { %5573 = vmatmul.mubr.msk.f32.vlgmr.msra.gmra.mxu1 %vm4019_vm4, %v4097_v60  ;;  %5577 = vmatprep.subr.mxu0 %v7968_v21  ;;  %v5399_v60 = vld [vmem:[%s7877_s9 + $0xc8] sm:$0xff] }
 0x8dd   : > { %5578 = vmatpush3.msra.mxu0 %v7437_v18  ;;  %5587 = vmatpush3.msra.mxu1 %v7432_v62 }
 0x8de   : > { %5579 = vmatprep.subr.mxu0 %v7968_v21  ;;  %5588 = vmatprep.subr.mxu1 %v7968_v21 }
 0x8df   : > { %5580 = vmatpush3.msra.mxu0 %v7450_v46  ;;  %5589 = vmatpush3.msra.mxu1 %v7437_v18 }
 0x8e0   : > { %5581 = vmatprep.subr.mxu0 %v7968_v21  ;;  %5590 = vmatprep.subr.mxu1 %v7968_v21 }
 0x8e1   : > { %5582 = vmatpush3.msra.mxu0 %v7461_v23  ;;  %5591 = vmatpush3.msra.mxu1 %v7450_v46 }
 0x8e2   : > { %5592 = vmatprep.subr.mxu1 %v7968_v21  ;;  %5594 = vmatprep.mubr.msk.f32.mxu1 %vm5958_vm2, %v7968_v21 }
 0x8e3   : > { %5593 = vmatpush3.msra.mxu1 %v7461_v23  ;;  %5597 = vmatprep.subr.mxu0 %v7968_v21 }
 0x8e4   : > { %5608 = vmatprep.subr.mxu1 %v7968_v21 }
 0x8f5   : > { %v4179_v34 = vpop.permute.xlu0 %4178 }
 0x8f6   : > { %5584 = vmatmul.mubr.msk.f32.vlgmr.msra.gmra.mxu0 %vm4019_vm4, %v4179_v34  ;;  %v5389_v34 = vld [vmem:[%s7877_s9 + $0x80] sm:$0xff] }
 0x8f7   : > { %v4261_v53 = vpop.permute.xlu1 %4260  ;;  %5598 = vmatpush3.msra.mxu0 %v7432_v62  ;;  %5605 = vmatprep.mubr.msk.f32.mxu0 %vm5958_vm2, %v7968_v21 }
 0x8f8   : > { %5595 = vmatmul.mubr.msk.f32.vlgmr.msra.gmra.mxu1 %vm4019_vm4, %v4261_v53  ;;  %5599 = vmatprep.subr.mxu0 %v7968_v21  ;;  %v5398_v53 = vld [vmem:[%s7877_s9 + $0xc0] sm:$0xff] }
 0x8f9   : > { %5600 = vmatpush3.msra.mxu0 %v7437_v18  ;;  %5609 = vmatpush3.msra.mxu1 %v7432_v62  ;;  %v4345_v36 = vpop.permute.xlu0 %4344 }
 0x8fa   : > { %5601 = vmatprep.subr.mxu0 %v7968_v21  ;;  %5610 = vmatprep.subr.mxu1 %v7968_v21 }
 0x8fb   : > { %5602 = vmatpush3.msra.mxu0 %v7450_v46  ;;  %5611 = vmatpush3.msra.mxu1 %v7437_v18 }
 0x8fc   : > { %5603 = vmatprep.subr.mxu0 %v7968_v21  ;;  %5612 = vmatprep.subr.mxu1 %v7968_v21 }
 0x8fd   : > { %5604 = vmatpush3.msra.mxu0 %v7461_v23  ;;  %5613 = vmatpush3.msra.mxu1 %v7450_v46 }
 0x8fe   : > { %5619 = vmatprep.subr.mxu0 %v7968_v21  ;;  %5614 = vmatprep.subr.mxu1 %v7968_v21 }
 0x8ff   : > { %5615 = vmatpush3.msra.mxu1 %v7461_v23  ;;  %5616 = vmatprep.mubr.msk.f32.mxu1 %vm5958_vm2, %v7968_v21 }
 0x900   : > { %5630 = vmatprep.subr.mxu1 %v7968_v21 }
 0x90b   : > { %v4347_v59 = vpop.permute.xlu1 %4346  ;;  %v4432_v19 = vpop.permute.xlu0 %4431 }
 0x90c   : > { %v4348_v9 = vsel %vm7996_vm7, %v4345_v36, %v4347_v59  ;;  %v5414_v36 = vld [vmem:[%s7877_s9 + $0x138] sm:$0xff] }
 0x90d   : > { %5606 = vmatmul.mubr.msk.f32.vlgmr.msra.gmra.mxu0 %vm4019_vm4, %v4348_v9 }
 0x90e   : > { %5620 = vmatpush3.msra.mxu0 %v7432_v62  ;;  %5627 = vmatprep.mubr.msk.f32.mxu0 %vm5958_vm2, %v7968_v21  ;;  %v5382_v62 = vld [vmem:[%s7877_s9 + $0x50] sm:$0xff] }
 0x90f   : > { %5621 = vmatprep.subr.mxu0 %v7968_v21  ;;  %v4434_v61 = vpop.permute.xlu1 %4433  ;;  %v4519_v37 = vpop.permute.xlu0 %4518 }
 0x910   : > { %v4435_v26 = vsel %vm7997_vm8, %v4432_v19, %v4434_v61  ;;  %5622 = vmatpush3.msra.mxu0 %v7437_v18  ;;  %v4605_v18 = vld [vmem:[%s7877_s9 + $0x8] sm:$0xff]  ;;  %v5423_v19 = vld [vmem:[%s7877_s9 + $0x178] sm:$0xff]  ;;  %v5413_v61 = vld [vmem:[%s7877_s9 + $0x130] sm:$0xff] }
 0x911   : > { %5617 = vmatmul.mubr.msk.f32.vlgmr.msra.gmra.mxu1 %vm4019_vm4, %v4435_v26  ;;  %5623 = vmatprep.subr.mxu0 %v7968_v21  ;;  %v5422_v26 = vld [vmem:[%s7877_s9 + $0x170] sm:$0xff] }
 0x912   : > { %5624 = vmatpush3.msra.mxu0 %v7450_v46  ;;  %5646 = vmatprep.mubr.msk.f32.mxu1 %vm5958_vm2, %v7968_v21  ;;  %v5380_v46 = vld [vmem:[%s7877_s9 + $0x40] sm:$0xff] }
 0x913   : > { %5625 = vmatprep.subr.mxu0 %v7968_v21  ;;  %v4521_v44 = vpop.permute.xlu1 %4520  ;;  %5631 = vmatpush3.msra.mxu1 %v4611_v32  ;;  %v5416_v32 = vld [vmem:[%s7877_s9 + $0x140] sm:$0xff] }
 0x914   : > { %v4523_v30 = vsel %vm4522_vm10, %v4519_v37, %v4521_v44  ;;  %5626 = vmatpush3.msra.mxu0 %v7461_v23  ;;  %5632 = vmatprep.subr.mxu1 %v7968_v21  ;;  %v5412_v37 = vld [vmem:[%s7877_s9 + $0x128] sm:$0xff] }
 0x915   : > { %5628 = vmatmul.mubr.msk.f32.vlgmr.msra.gmra.mxu0 %vm4019_vm4, %v4523_v30  ;;  %5649 = vmatprep.subr.mxu0 %v7968_v21  ;;  %v5421_v44 = vld [vmem:[%s7877_s9 + $0x168] sm:$0xff]  ;;  %v5411_v30 = vld [vmem:[%s7877_s9 + $0x120] sm:$0xff] }
 0x916   : > { %5665 = vmatprep.mubr.msk.f32.mxu0 %vm5958_vm2, %v7968_v21  ;;  %5650 = vmatpush3.msra.mxu0 %v5387_v2  ;;  %v5432_v2 = vld [vmem:[%s7877_s9 + $0x1b8] sm:$0xff] }
 0x917   : > { %5651 = vmatprep.subr.mxu0 %v7968_v21  ;;  %5633 = vmatpush3.msra.mxu1 %v4610_v40 }
 0x918   : > { %5652 = vmatpush3.msra.mxu0 %v5386_v17  ;;  %5634 = vmatprep.subr.mxu1 %v7968_v21 }
 0x919   : > { %5653 = vmatprep.subr.mxu0 %v7968_v21  ;;  %5635 = vmatpush3.msra.mxu1 %v4609_v14  ;;  %v5441_v14 = vld [vmem:[%s7877_s9 + $0x1f8] sm:$0xff] }
 0x91a   : > { %5654 = vmatpush3.msra.mxu0 %v5385_v13  ;;  %5636 = vmatprep.subr.mxu1 %v7968_v21  ;;  %v5431_v13 = vld [vmem:[%s7877_s9 + $0x1b0] sm:$0xff] }
 0x91b   : > { %5655 = vmatprep.subr.mxu0 %v7968_v21  ;;  %5637 = vmatpush3.msra.mxu1 %v4608_v3  ;;  %v5440_v3 = vld [vmem:[%s7877_s9 + $0x1f0] sm:$0xff] }
 0x91c   : > { %5656 = vmatpush3.msra.mxu0 %v5384_v29  ;;  %5638 = vmatprep.subr.mxu1 %v7968_v21  ;;  %v5430_v29 = vld [vmem:[%s7877_s9 + $0x1a8] sm:$0xff] }
 0x91d   : > { %5657 = vmatprep.subr.mxu0 %v7968_v21  ;;  %5639 = vmatpush3.msra.mxu1 %v4607_v41  ;;  %v5439_v41 = vld [vmem:[%s7877_s9 + $0x1e8] sm:$0xff] }
 0x91e   : > { %5658 = vmatpush3.msra.mxu0 %v5383_v38  ;;  %5640 = vmatprep.subr.mxu1 %v7968_v21  ;;  %v5429_v38 = vld [vmem:[%s7877_s9 + $0x1a0] sm:$0xff] }
 0x91f   : > { %5659 = vmatprep.subr.mxu0 %v7968_v21  ;;  %5641 = vmatpush3.msra.mxu1 %v4606_v49  ;;  %v5438_v49 = vld [vmem:[%s7877_s9 + $0x1e0] sm:$0xff] }
 0x920   : > { %5660 = vmatpush3.msra.mxu0 %v5382_v62  ;;  %5642 = vmatprep.subr.mxu1 %v7968_v21  ;;  %v5428_v62 = vld [vmem:[%s7877_s9 + $0x198] sm:$0xff] }
 0x921   : > { %5661 = vmatprep.subr.mxu0 %v7968_v21  ;;  %5643 = vmatpush3.msra.mxu1 %v4605_v18  ;;  %v5437_v18 = vld [vmem:[%s7877_s9 + $0x1d8] sm:$0xff] }
 0x922   : > { %5662 = vmatpush3.msra.mxu0 %v5381_v57  ;;  %5644 = vmatprep.subr.mxu1 %v7968_v21  ;;  %v5427_v57 = vld [vmem:[%s7877_s9 + $0x190] sm:$0xff] }
 0x923   : > { %5663 = vmatprep.subr.mxu0 %v7968_v21  ;;  %5645 = vmatpush3.msra.mxu1 %v4604_v31  ;;  %v5426_v31 = vld [vmem:[%s7877_s9 + $0x188] sm:$0xff] }
 0x924   : > { %5664 = vmatpush3.msra.mxu0 %v5380_v46  ;;  %5668 = vmatprep.subr.mxu1 %v7968_v21  ;;  %v5435_v46 = vld [vmem:[%s7877_s9 + $0x1c8] sm:$0xff] }
 0x925   : > { %5687 = vmatprep.subr.mxu0 %v7968_v21 }
 0x99a   : > { %v4088_v54 = vpop.f32.mrf.mxu0 }
 0x99b   : > { %4093 = vst.msk [vmem:[#allocation9] sm:$0xff] %vm4092_vm13, %v4088_v54  ;;  %v5420_v54 = vld [vmem:[%s7877_s9 + $0x160] sm:$0xff] }
 0x99c   : > { %v5563_v7 = vpop.f32.mrf.mxu0  ;;  %v4166_v12 = vpop.f32.mrf.mxu1 }
 0x99d   : > { %4171 = vrot.lane.b32.xlu0 %v4166_v12, %s5964_s25  ;;  %s5968_s25 = smov 40   ;;  %v5410_v7 = vld [vmem:[%s7877_s9 + $0x118] sm:$0xff] }
 0x99e   : > { %v5574_v16 = vpop.f32.mrf.mxu1  ;;  %v5419_v12 = vld [vmem:[%s7877_s9 + $0x158] sm:$0xff] }
 0x99f   : > { %v5409_v16 = vld [vmem:[%s7877_s9 + $0x110] sm:$0xff] }
 0x9b6   : > { %v4248_v43 = vpop.f32.mrf.mxu0 }
 0x9b7   : > { %4253 = vrot.lane.b32.xlu1 %v4248_v43, %s5965_s20  ;;  %s5969_s20 = smov 48   ;;  %v5418_v43 = vld [vmem:[%s7877_s9 + $0x150] sm:$0xff] }
 0x9b8   : > { %v5585_v35 = vpop.f32.mrf.mxu0  ;;  %v4330_v10 = vpop.f32.mrf.mxu1 }
 0x9b9   : > { %4335 = vrot.lane.b32.xlu0 %v4330_v10, %s5966_s1  ;;  %v5408_v35 = vld [vmem:[%s7877_s9 + $0x108] sm:$0xff] }
 0x9ba   : > { %v5596_v58 = vpop.f32.mrf.mxu1  ;;  %v5417_v10 = vld [vmem:[%s7877_s9 + $0x148] sm:$0xff] }
 0x9bb   : > { %v5407_v58 = vld [vmem:[%s7877_s9 + $0x100] sm:$0xff] }
 0x9cd   : > { %v4417_v24 = vpop.f32.mrf.mxu0 }
 0x9ce   : > { %4422 = vrot.lane.b32.xlu1 %v4417_v24, %s5967_s27  ;;  %v5436_v24 = vld [vmem:[%s7877_s9 + $0x1d0] sm:$0xff] }
 0x9cf   : > { %v5607_v0 = vpop.f32.mrf.mxu0 }
 0x9d0   : > { %v5425_v0 = vld [vmem:[%s7877_s9 + $0x180] sm:$0xff] }
 0x9d1   : > { %v4504_v33 = vpop.f32.mrf.mxu1 }
 0x9d2   : > { %4509 = vrot.lane.b32.xlu0 %v4504_v33, %s5968_s25  ;;  %v5434_v33 = vld [vmem:[%s7877_s9 + $0x1c0] sm:$0xff]  ;;  %s5878_s25 = scalar_lea.vmem %s5290_s26, 16 }
 0x9d3   : > { %v5618_v23 = vpop.f32.mrf.mxu1  ;;  %p5879_p11 = scmp.ne.s32.totalorder %s5290_s26, %s5878_s25 }
 0x9d5   : > { %v4592_v5 = vpop.f32.mrf.mxu0  ;;  %p5880_p12 = pnand %p5879_p11, %p6084_p5 }
 0x9d6   : > { %4597 = vrot.lane.b32.xlu1 %v4592_v5, %s5969_s20  ;;  %s5882_s20 = sshll.u32 %s5970_s17, 4  ;;  %s5883_s20 = int_to_ptr.vmem [resolvable:$false] %s5882_s20 }
 0x9d7   : > { %v5629_v47 = vpop.f32.mrf.mxu0  ;;  %p5881_p13 = pneg %p5880_p12  ;;  %s5884_s1 = scalar_lea.vmem %s5883_s20, 32 }
 0x9d8   : > { %p5885_p0 = scmp.lt.s32.totalorder %s5290_s26, %s5883_s20  ;;  %p5886_p1 = scmp.lt.s32.totalorder %s5884_s1, %s5878_s25 }
 0x9da   : > { %p5887_p2 = por %p5886_p1, %p5885_p0 }
 0x9dc   : > { %p5888_p3 = pnand %p5887_p2, %p5881_p13 }
 0xa0f   : > { %v4172_v51 = vpop.permute.xlu0 %4171 }
 0xa10   : > { %4175 = vst.msk [vmem:[#allocation9] sm:$0xff] %vm4174_vm14, %v4172_v51 }
 0xa29   : > { %v4254_v56 = vpop.permute.xlu1 %4253 }
 0xa2a   : > { %4257 = vst.msk [vmem:[#allocation9] sm:$0xff] %vm4256_vm0, %v4254_v56 }
 0xa2b   : > { %v4336_v22 = vpop.permute.xlu0 %4335 }
 0xa2c   : > { %4339 = vst.msk [vmem:[#allocation9] sm:$0xff] %vm4338_vm5, %v4336_v22 }
 0xa40   : > { %v4423_v52 = vpop.permute.xlu1 %4422 }
 0xa41   : > { %4426 = vst.msk [vmem:[#allocation9] sm:$0xff] %vm4425_vm11, %v4423_v52 }
 0xa44   : > { %v4510_v15 = vpop.permute.xlu0 %4509 }
 0xa45   : > { %4513 = vst.msk [vmem:[#allocation9] sm:$0xff] %vm4512_vm12, %v4510_v15 }
 0xa48   : > { %v4598_v45 = vpop.permute.xlu1 %4597 }
 0xa49   : > { %4601 = vst.msk [vmem:[#allocation9] sm:$0xff] %vm4600_vm1, %v4598_v45 }
 0xa50   : > { %v4603_v8 = vld [vmem:[#allocation9] sm:$0x1]  ;;  %v4686_v63 = vld [vmem:[#allocation9 + $0x1] sm:$0x1]  ;;  %v4770_v59 = vld [vmem:[#allocation9 + $0x2] sm:$0x1] }
 0xa51   : > { %5647 = vmatmul.mubr.msk.f32.vlgmr.msra.gmra.mxu1 %vm474_vm3, %v4603_v8  ;;  %5666 = vmatmul.mubr.msk.f32.vlgmr.msra.gmra.mxu0 %vm474_vm3, %v4686_v63  ;;  %v4854_v9 = vld [vmem:[#allocation9 + $0x3] sm:$0x1]  ;;  %v4938_v40 = vld [vmem:[#allocation9 + $0x4] sm:$0x1]  ;;  %v5022_v17 = vld [vmem:[#allocation9 + $0x5] sm:$0x1] }
 0xa52   : > { %5669 = vmatpush3.msra.mxu1 %v5396_v39  ;;  %5688 = vmatpush3.msra.mxu0 %v5405_v50  ;;  %v5106_v23 = vld [vmem:[#allocation9 + $0x6] sm:$0x1]  ;;  %v5190_v5 = vld [vmem:[#allocation9 + $0x7] sm:$0x1] }
 0xa53   : > { %5670 = vmatprep.subr.mxu1 %v7968_v21  ;;  %5689 = vmatprep.subr.mxu0 %v7968_v21 }
 0xa54   : > { %5671 = vmatpush3.msra.mxu1 %v5395_v28  ;;  %5690 = vmatpush3.msra.mxu0 %v5404_v55 }
 0xa55   : > { %5672 = vmatprep.subr.mxu1 %v7968_v21  ;;  %5691 = vmatprep.subr.mxu0 %v7968_v21 }
 0xa56   : > { %5673 = vmatpush3.msra.mxu1 %v5394_v48  ;;  %5692 = vmatpush3.msra.mxu0 %v5403_v20 }
 0xa57   : > { %5674 = vmatprep.subr.mxu1 %v7968_v21  ;;  %5693 = vmatprep.subr.mxu0 %v7968_v21 }
 0xa58   : > { %5675 = vmatpush3.msra.mxu1 %v5393_v42  ;;  %5694 = vmatpush3.msra.mxu0 %v5402_v25 }
 0xa59   : > { %5676 = vmatprep.subr.mxu1 %v7968_v21  ;;  %5695 = vmatprep.subr.mxu0 %v7968_v21 }
 0xa5a   : > { %5677 = vmatpush3.msra.mxu1 %v5392_v6  ;;  %5696 = vmatpush3.msra.mxu0 %v5401_v4 }
 0xa5b   : > { %5678 = vmatprep.subr.mxu1 %v7968_v21  ;;  %5697 = vmatprep.subr.mxu0 %v7968_v21 }
 0xa5c   : > { %5679 = vmatpush3.msra.mxu1 %v5391_v11  ;;  %5698 = vmatpush3.msra.mxu0 %v5400_v27 }
 0xa5d   : > { %5680 = vmatprep.subr.mxu1 %v7968_v21  ;;  %5699 = vmatprep.subr.mxu0 %v7968_v21 }
 0xa5e   : > { %5681 = vmatpush3.msra.mxu1 %v5390_v1  ;;  %5700 = vmatpush3.msra.mxu0 %v5399_v60 }
 0xa5f   : > { %5682 = vmatprep.subr.mxu1 %v7968_v21  ;;  %5701 = vmatprep.subr.mxu0 %v7968_v21 }
 0xa60   : > { %5683 = vmatpush3.msra.mxu1 %v5389_v34  ;;  %5684 = vmatprep.mubr.msk.f32.mxu1 %vm5958_vm2, %v7968_v21 }
 0xa61   : > { %5702 = vmatpush3.msra.mxu0 %v5398_v53  ;;  %5703 = vmatprep.mubr.msk.f32.mxu0 %vm5958_vm2, %v7968_v21 }
 0xa62   : > { %5685 = vmatmul.mubr.msk.f32.vlgmr.msra.gmra.mxu1 %vm474_vm3, %v4770_v59  ;;  %5704 = vmatmul.mubr.msk.f32.vlgmr.msra.gmra.mxu0 %vm474_vm3, %v4854_v9 }
 0xa63   : > { %5706 = vmatprep.subr.mxu1 %v7968_v21  ;;  %5725 = vmatprep.subr.mxu0 %v7968_v21 }
 0xa64   : > { %5707 = vmatpush3.msra.mxu1 %v5414_v36  ;;  %5726 = vmatpush3.msra.mxu0 %v5423_v19 }
 0xa65   : > { %5708 = vmatprep.subr.mxu1 %v7968_v21  ;;  %5727 = vmatprep.subr.mxu0 %v7968_v21 }
 0xa66   : > { %5709 = vmatpush3.msra.mxu1 %v5413_v61  ;;  %5728 = vmatpush3.msra.mxu0 %v5422_v26 }
 0xa67   : > { %5710 = vmatprep.subr.mxu1 %v7968_v21  ;;  %5729 = vmatprep.subr.mxu0 %v7968_v21 }
 0xa68   : > { %5711 = vmatpush3.msra.mxu1 %v5412_v37  ;;  %5730 = vmatpush3.msra.mxu0 %v5421_v44 }
 0xa69   : > { %5712 = vmatprep.subr.mxu1 %v7968_v21  ;;  %5731 = vmatprep.subr.mxu0 %v7968_v21 }
 0xa6a   : > { %5713 = vmatpush3.msra.mxu1 %v5411_v30  ;;  %5732 = vmatpush3.msra.mxu0 %v5420_v54 }
 0xa6b   : > { %5714 = vmatprep.subr.mxu1 %v7968_v21  ;;  %5733 = vmatprep.subr.mxu0 %v7968_v21 }
 0xa6c   : > { %5715 = vmatpush3.msra.mxu1 %v5410_v7  ;;  %5734 = vmatpush3.msra.mxu0 %v5419_v12 }
 0xa6d   : > { %5716 = vmatprep.subr.mxu1 %v7968_v21  ;;  %5735 = vmatprep.subr.mxu0 %v7968_v21 }
 0xa6e   : > { %5717 = vmatpush3.msra.mxu1 %v5409_v16  ;;  %5736 = vmatpush3.msra.mxu0 %v5418_v43 }
 0xa6f   : > { %5718 = vmatprep.subr.mxu1 %v7968_v21  ;;  %5737 = vmatprep.subr.mxu0 %v7968_v21 }
 0xa70   : > { %5719 = vmatpush3.msra.mxu1 %v5408_v35  ;;  %5738 = vmatpush3.msra.mxu0 %v5417_v10 }
 0xa71   : > { %5720 = vmatprep.subr.mxu1 %v7968_v21  ;;  %5739 = vmatprep.subr.mxu0 %v7968_v21 }
 0xa72   : > { %5721 = vmatpush3.msra.mxu1 %v5407_v58  ;;  %5722 = vmatprep.mubr.msk.f32.mxu1 %vm5958_vm2, %v7968_v21 }
 0xa73   : > { %5740 = vmatpush3.msra.mxu0 %v5416_v32  ;;  %5741 = vmatprep.mubr.msk.f32.mxu0 %vm5958_vm2, %v7968_v21 }
 0xa74   : > { %5723 = vmatmul.mubr.msk.f32.vlgmr.msra.gmra.mxu1 %vm474_vm3, %v4938_v40  ;;  %5742 = vmatmul.mubr.msk.f32.vlgmr.msra.gmra.mxu0 %vm474_vm3, %v5022_v17 }
 0xa75   : > { %5744 = vmatprep.subr.mxu1 %v7968_v21  ;;  %5763 = vmatprep.subr.mxu0 %v7968_v21 }
 0xa76   : > { %5745 = vmatpush3.msra.mxu1 %v5432_v2  ;;  %5764 = vmatpush3.msra.mxu0 %v5441_v14 }
 0xa77   : > { %5746 = vmatprep.subr.mxu1 %v7968_v21  ;;  %5765 = vmatprep.subr.mxu0 %v7968_v21 }
 0xa78   : > { %5747 = vmatpush3.msra.mxu1 %v5431_v13  ;;  %5766 = vmatpush3.msra.mxu0 %v5440_v3 }
 0xa79   : > { %5748 = vmatprep.subr.mxu1 %v7968_v21  ;;  %5767 = vmatprep.subr.mxu0 %v7968_v21 }
 0xa7a   : > { %5749 = vmatpush3.msra.mxu1 %v5430_v29  ;;  %5768 = vmatpush3.msra.mxu0 %v5439_v41 }
 0xa7b   : > { %5750 = vmatprep.subr.mxu1 %v7968_v21  ;;  %5769 = vmatprep.subr.mxu0 %v7968_v21 }
 0xa7c   : > { %5751 = vmatpush3.msra.mxu1 %v5429_v38  ;;  %5770 = vmatpush3.msra.mxu0 %v5438_v49 }
 0xa7d   : > { %5752 = vmatprep.subr.mxu1 %v7968_v21  ;;  %5771 = vmatprep.subr.mxu0 %v7968_v21 }
 0xa7e   : > { %5753 = vmatpush3.msra.mxu1 %v5428_v62  ;;  %5772 = vmatpush3.msra.mxu0 %v5437_v18 }
 0xa7f   : > { %5754 = vmatprep.subr.mxu1 %v7968_v21  ;;  %5773 = vmatprep.subr.mxu0 %v7968_v21 }
 0xa80   : > { %5755 = vmatpush3.msra.mxu1 %v5427_v57  ;;  %5774 = vmatpush3.msra.mxu0 %v5436_v24 }
 0xa81   : > { %5756 = vmatprep.subr.mxu1 %v7968_v21  ;;  %5775 = vmatprep.subr.mxu0 %v7968_v21 }
 0xa82   : > { %5757 = vmatpush3.msra.mxu1 %v5426_v31  ;;  %5776 = vmatpush3.msra.mxu0 %v5435_v46 }
 0xa83   : > { %5758 = vmatprep.subr.mxu1 %v7968_v21  ;;  %5777 = vmatprep.subr.mxu0 %v7968_v21 }
 0xa84   : > { %5759 = vmatpush3.msra.mxu1 %v5425_v0  ;;  %5760 = vmatprep.mubr.msk.f32.mxu1 %vm5958_vm2, %v7968_v21 }
 0xa85   : > { %5778 = vmatpush3.msra.mxu0 %v5434_v33  ;;  %5779 = vmatprep.mubr.msk.f32.mxu0 %vm5958_vm2, %v7968_v21  ;;  %v4602_v21 = vld [vmem:[%s7878_s10] sm:$0x1] }
 0xa86   : > { %5761 = vmatmul.mubr.msk.f32.vlgmr.msra.gmra.mxu1 %vm474_vm3, %v5106_v23  ;;  %5780 = vmatmul.mubr.msk.f32.vlgmr.msra.gmra.mxu0 %vm474_vm3, %v5190_v5 }
 0xb11   : > { %v4681_v47 = vpop.f32.mrf.mxu1  ;;  %v4765_v51 = vpop.f32.mrf.mxu0 }
 0xb12   : > { %v4685_v63 = vadd.f32 %v4681_v47, %v4602_v21 }
 0xb13   : > { %v5648_v56 = vpop.f32.mrf.mxu1  ;;  %v5667_v22 = vpop.f32.mrf.mxu0 }
 0xb14   : > { %v4769_v48 = vadd.f32 %v4765_v51, %v4685_v63 }
 0xb22   : > { %v4849_v52 = vpop.f32.mrf.mxu1  ;;  %v4933_v15 = vpop.f32.mrf.mxu0 }
 0xb23   : > { %v4853_v20 = vadd.f32 %v4849_v52, %v4769_v48 }
 0xb24   : > { %v5686_v45 = vpop.f32.mrf.mxu1  ;;  %v5705_v39 = vpop.f32.mrf.mxu0 }
 0xb25   : > { %v4937_v42 = vadd.f32 %v4933_v15, %v4853_v20 }
 0xb34   : > { %v5017_v50 = vpop.f32.mrf.mxu1  ;;  %v5101_v8 = vpop.f32.mrf.mxu0 }
 0xb35   : > { %v5021_v25 = vadd.f32 %v5017_v50, %v4937_v42 }
 0xb36   : > { %v5724_v28 = vpop.f32.mrf.mxu1  ;;  %v5743_v55 = vpop.f32.mrf.mxu0 }
 0xb37   : > { %v5105_v6 = vadd.f32 %v5101_v8, %v5021_v25 }
 0xb46   : > { %v5185_v4 = vpop.f32.mrf.mxu1  ;;  %v5269_v11 = vpop.f32.mrf.mxu0 }
 0xb47   : > { %v5189_v27 = vadd.f32 %v5185_v4, %v5105_v6 }
 0xb48   : > { %v5762_v1 = vpop.f32.mrf.mxu1  ;;  %v5781_v60 = vpop.f32.mrf.mxu0 }
 0xb49   : > { %v5273_v34 = vadd.f32 %v5269_v11, %v5189_v27 }
 0xb4b   : > { %5275 = vst.msk [vmem:[%s457_s2] sm:$0x1] %vm5274_vm15, %v5273_v34 }
 0xb4c   : > { %5891 = shalt.err (!%p5888_p3)
}
 0xb4d   : > { %s5892_s21 = scalar_lea.hbm %s5287_s18, 16  ;;  %s5896_s2 = scalar_lea.hbm %s7882_s14, 32 }
 0xb4e   : > { %p5893_p4 = scmp.ne.s32.totalorder %s5287_s18, %s5892_s21  ;;  %p5897_p9 = scmp.lt.s32.totalorder %s5287_s18, %s7882_s14 }
 0xb4f   : > { %p5898_p10 = scmp.lt.s32.totalorder %s5896_s2, %s5892_s21 }
 0xb50   : > { %p5894_p7 = pnand %p5893_p4, %p6084_p5 }
 0xb51   : > { %p5899_p11 = por %p5898_p10, %p5897_p9 }
 0xb52   : > { %p5895_p8 = pneg %p5894_p7 }
 0xb54   : > { %p5900_p12 = pnand %p5899_p11, %p5895_p8 }
 0xb56   : > { %5903 = shalt.err (!%p5900_p12)
}
 0xb57   : > { %5783 = dma.vmem_to_hbm [thread:$0]  (%p6084_p5), %s5290_s26, 16, %s5287_s18, %s5277_s0  }
 0xb58 PF: > { %p5789_p13 = scmp.ge.s32.totalorder %s5938_s16, 2  ;;  %s5301_s25 = sand.u32 1, %s5926_s29  }
 0xb59   : > { %s5302_s17 = scalar_lea.sflag [#allocation11], %s5301_s25 }
 0xb5a   : > { %p5786_p0 = pnand %p5789_p13, %p6088_p6 }
 0xb5c   : > { %p5787_p1 = pneg %p5786_p0 }
 0xb5e   : > { %5921 = dma.done.wait (%p5787_p1), %s5302_s17, 16  }
 0xb5f   : > { %5923 = vsyncadd (%p5787_p1), %s5302_s17, 4294967280  ;;  %p24_p2 = scmp.ge.s32.totalorder %s6071_s19, 4   ;;  %s7998_s29 = smov %s5930_s30 }
 0xb60   : > { %s7999_s30 = smov %s5934_s15  ;;  %s8000_s15 = smov %s6082_s22 }
 0xb61   : > { %s8001_s16 = smov %s6071_s19  ;;  %26 = sbr.rel (!%p24_p2) target bundleno = 9 (0x9), region = 126 }
 0xb66   :  { %5306 = vsyncpa [#allocation11], 1 }
 0xb67   :  { %5308 = vsyncpa [#allocation11 + $0x1], 1 }

</bundles_post_ra>
